<compile_context>
chip_gen: v7x
topology: tpu7x:2x2x1
jax: 0.10.0
libtpu: 0.0.40
codegen_flags: <defaults>
</compile_context>

<pallas_src>
import functools

import jax
import jax.numpy as jnp
from jax import lax
from jax.experimental import pallas as pl
from jax.experimental.pallas import tpu as pltpu


def _round_up(v, m):
    return (v + m - 1) // m * m


def _bigru_kernel(len_ref, xf_ref, xb_ref,
                  wih_f_ref, bias_f_ref, whh_f_ref, bhn_f_ref,
                  wih_b_ref, bias_b_ref, whh_b_ref, bhn_b_ref,
                  out_f_ref, out_b_ref, hfin_f_ref, hfin_b_ref,
                  hf_s, hb_s, gif_s, gib_s,
                  *, t_chunk, b_block, hidden_pad, num_chunks, unroll):
    TC, Bp, Hp = t_chunk, b_block, hidden_pad
    c = pl.program_id(1)            # time-chunk axis (sequential, "arbitrary")

    # Zero the carried hidden states at the first time chunk of each batch block.
    @pl.when(c == 0)
    def _():
        hf_s[...] = jnp.zeros_like(hf_s)
        hb_s[...] = jnp.zeros_like(hb_s)

    # ---- hoisted input projections: one big bf16 MXU matmul per direction per chunk ----
    # gi = X @ W_ih_fused + (b_ih + [b_hr, b_hz, 0]); the n-gate recurrent bias stays separate.
    # x blocks arrive already flattened to [TC*Bp, D] (no in-kernel reshape).
    gif_s[...] = (jnp.dot(xf_ref[...], wih_f_ref[...],
                          preferred_element_type=jnp.float32) + bias_f_ref[...])
    gib_s[...] = (jnp.dot(xb_ref[...], wih_b_ref[...],
                          preferred_element_type=jnp.float32) + bias_b_ref[...])

    lens = len_ref[...]             # [Bp, Hp] int32 per-row sequence length
    whh_f = whh_f_ref[...]          # bf16 [Hp, 3Hp]
    whh_b = whh_b_ref[...]
    bhn_f = bhn_f_ref[...]          # f32 [Bp, Hp], pre-broadcast b_hn
    bhn_b = bhn_b_ref[...]

    t0_f = c * TC                       # forward walks chunks 0, 1, ...
    t0_b = (num_chunks - 1 - c) * TC    # backward walks chunks ..., 1, 0

    def gru_update(gi, gh, bhn, h_prev):
        # PyTorch GRU cell; gates sliced out of the fused [Bp, 3*Hp] activations.
        r = jax.nn.sigmoid(gi[:, 0:Hp] + gh[:, 0:Hp])
        z = jax.nn.sigmoid(gi[:, Hp:2 * Hp] + gh[:, Hp:2 * Hp])
        n = jnp.tanh(gi[:, 2 * Hp:3 * Hp] + r * (gh[:, 2 * Hp:3 * Hp] + bhn))
        return (1.0 - z) * n + z * h_prev

    def step(i, carry):
        h_f, h_b = carry
        j = TC - 1 - i

        # ---- forward direction, global time t0_f + i ----
        row_f = pl.multiple_of(i * Bp, Bp)
        gi_f = gif_s[pl.ds(row_f, Bp), :]
        gh_f = jnp.dot(h_f.astype(jnp.bfloat16), whh_f,
                       preferred_element_type=jnp.float32)
        cand_f = gru_update(gi_f, gh_f, bhn_f, h_f)
        m_f = (t0_f + i) < lens                       # bool mask, single compare
        out_f_ref[i] = jnp.where(m_f, cand_f, 0.0)    # padded steps -> exact 0 (pad_packed)
        h_f = jnp.where(m_f, cand_f, h_f)             # hold last valid state past seq end

        # ---- backward direction, global time t0_b + j ----
        row_b = pl.multiple_of(j * Bp, Bp)
        gi_b = gib_s[pl.ds(row_b, Bp), :]
        gh_b = jnp.dot(h_b.astype(jnp.bfloat16), whh_b,
                       preferred_element_type=jnp.float32)
        cand_b = gru_update(gi_b, gh_b, bhn_b, h_b)
        m_b = (t0_b + j) < lens
        h_b = jnp.where(m_b, cand_b, 0.0)             # state stays 0 until t < length
        out_b_ref[j] = h_b

        return (h_f, h_b)

    h_f, h_b = lax.fori_loop(0, TC, step, (hf_s[...], hb_s[...]), unroll=unroll)
    hf_s[...] = h_f
    hb_s[...] = h_b

    # Constant-index output blocks stay VMEM-resident across the time axis; the value from the
    # last time chunk lands in HBM. Forward finishes at the last chunk, backward at t=0.
    hfin_f_ref[...] = h_f
    hfin_b_ref[...] = h_b


def init_encoder_params(key, input_size, hidden_size):
    """Deterministic init matching PyTorch GRU param shapes (split by gate r,z,n; transposed)."""
    k = 1.0 / jnp.sqrt(jnp.float32(hidden_size))
    keys = jax.random.split(key, 8)

    def u(kk, shape):
        return jax.random.uniform(kk, shape, jnp.float32, -k, k)

    return dict(
        wih_f=u(keys[0], (3, input_size, hidden_size)),
        whh_f=u(keys[1], (3, hidden_size, hidden_size)),
        bih_f=u(keys[2], (3, 1, hidden_size)),
        bhh_f=u(keys[3], (3, 1, hidden_size)),
        wih_b=u(keys[4], (3, input_size, hidden_size)),
        whh_b=u(keys[5], (3, hidden_size, hidden_size)),
        bih_b=u(keys[6], (3, 1, hidden_size)),
        bhh_b=u(keys[7], (3, 1, hidden_size)),
    )


def encoder_forward(params, x, lengths, *, t_chunk=None, batch_block=None,
                    single_buffer_weights=True):
    """x: [B, T, D] batch-first (like the PyTorch module); lengths: [B] int.

    Returns (output [B, T, 2H], final [1, B, 2H]) with pack/pad semantics.
    On v7x, pass batch_block = B_pad // 2 (a multiple of 8) to shard batch across both cores.
    """
    B, T, D = x.shape
    H = params["whh_f"].shape[-1]

    B_pad = _round_up(B, 8)          # sublane-aligned batch
    H_pad = _round_up(H, 128)        # lane-dense hidden
    H3 = 3 * H_pad

    if batch_block is None:
        batch_block = B_pad          # one batch block by default (best for single-TC chips)
    assert batch_block % 8 == 0 and B_pad % batch_block == 0
    num_b_blocks = B_pad // batch_block

    if t_chunk is None:
        # Smaller chunks when H_pad is large (gif/gib scratch and out blocks scale with TC*H_pad).
        cap = 32 if H_pad >= 1024 else (64 if H_pad >= 512 else 128)
        t_chunk = min(_round_up(T, 8), cap)
    T_pad = _round_up(T, t_chunk)
    num_chunks = T_pad // t_chunk

    # Time-major, padded, bf16, pre-flattened to [num_b_blocks * T_pad * batch_block, D] so the
    # kernel x block is already the 2-D matmul LHS. Padded rows / timesteps have length 0.
    x_pad = jnp.zeros((T_pad, B_pad, D), jnp.bfloat16).at[:T, :B, :].set(
        jnp.transpose(x, (1, 0, 2)).astype(jnp.bfloat16))
    x_2d = (x_pad.reshape(T_pad, num_b_blocks, batch_block, D)
                 .transpose(1, 0, 2, 3)
                 .reshape(num_b_blocks * T_pad * batch_block, D))

    lens_2d = jnp.zeros((B_pad, H_pad), jnp.int32).at[:B, :].set(
        jnp.broadcast_to(lengths.astype(jnp.int32)[:, None], (B, H_pad)))

    def fuse(wih, whh, bih, bhh):
        # Fused gate layout along lanes: [ r | z | n ], each gate block H_pad wide (zero padded).
        wih_fused = jnp.zeros((D, H3), jnp.float32)
        whh_fused = jnp.zeros((H_pad, H3), jnp.float32)
        bias_fused = jnp.zeros((1, H3), jnp.float32)
        for g in range(3):
            c0 = g * H_pad
            wih_fused = wih_fused.at[:, c0:c0 + H].set(wih[g])
            whh_fused = whh_fused.at[:H, c0:c0 + H].set(whh[g])
            bg = bih[g] if g == 2 else bih[g] + bhh[g]   # b_hn must stay inside r*(...)
            bias_fused = bias_fused.at[:, c0:c0 + H].set(bg)
        bhn = jnp.zeros((B_pad, H_pad), jnp.float32).at[:, :H].set(
            jnp.broadcast_to(bhh[2], (B_pad, H)))
        # Weights in bf16 (native MXU path); biases stay f32 (added to f32 accumulators).
        return (wih_fused.astype(jnp.bfloat16), bias_fused,
                whh_fused.astype(jnp.bfloat16), bhn)

    wih_F, bias_F, whh_F, bhn_F = fuse(params["wih_f"], params["whh_f"],
                                       params["bih_f"], params["bhh_f"])
    wih_B, bias_B, whh_B, bhn_B = fuse(params["wih_b"], params["whh_b"],
                                       params["bih_b"], params["bhh_b"])

    unroll = True if t_chunk <= 8 else (2 if H_pad >= 512 else 4)

    kernel = functools.partial(
        _bigru_kernel, t_chunk=t_chunk, b_block=batch_block, hidden_pad=H_pad,
        num_chunks=num_chunks, unroll=unroll)

    # ---- VMEM budget derived from the actual buffers (instead of a hard-coded limit) ----
    wbuf = 1 if single_buffer_weights else 2
    bytes_weights = wbuf * 2 * (D * H3 * 2 + H3 * 4 + H_pad * H3 * 2)       # wih(bf16)+bias(f32)+whh(bf16), 2 dirs
    bytes_small = 2 * (1 + 2) * batch_block * H_pad * 4                     # lens(i32) + 2x bhn(f32), 2-buffered
    bytes_x = 2 * 2 * t_chunk * batch_block * D * 2                         # fwd+bwd x blocks, 2-buffered, bf16
    bytes_out = 2 * 2 * t_chunk * batch_block * H_pad * 4 + 2 * 2 * batch_block * H_pad * 4
    bytes_scr = 2 * batch_block * H_pad * 4 + 2 * t_chunk * batch_block * H3 * 4
    vmem_est = bytes_weights + bytes_small + bytes_x + bytes_out + bytes_scr
    vmem_limit = int(min(max(vmem_est * 3 // 2 + (4 << 20), 32 << 20), 100 << 20))

    lens_spec = pl.BlockSpec((batch_block, H_pad), lambda b, c: (b, 0))
    bhn_spec = pl.BlockSpec((batch_block, H_pad), lambda b, c: (b, 0))
    x_fwd_spec = pl.BlockSpec((t_chunk * batch_block, D),
                              lambda b, c: (b * num_chunks + c, 0))
    x_bwd_spec = pl.BlockSpec((t_chunk * batch_block, D),
                              lambda b, c: (b * num_chunks + (num_chunks - 1 - c), 0))

    out_shapes = (
        jax.ShapeDtypeStruct((T_pad, B_pad, H_pad), jnp.float32),   # fwd outputs (time-major)
        jax.ShapeDtypeStruct((T_pad, B_pad, H_pad), jnp.float32),   # bwd outputs (time-major)
        jax.ShapeDtypeStruct((B_pad, H_pad), jnp.float32),          # fwd final hidden
        jax.ShapeDtypeStruct((B_pad, H_pad), jnp.float32),          # bwd final hidden
    )
    out_specs = (
        pl.BlockSpec((t_chunk, batch_block, H_pad), lambda b, c: (c, b, 0)),
        pl.BlockSpec((t_chunk, batch_block, H_pad), lambda b, c: (num_chunks - 1 - c, b, 0)),
        pl.BlockSpec((batch_block, H_pad), lambda b, c: (b, 0)),
        pl.BlockSpec((batch_block, H_pad), lambda b, c: (b, 0)),
    )

    def const_spec(shape, single_buffer):
        nd = len(shape)
        if single_buffer:
            # Grid-invariant block: keep a single VMEM copy instead of double-buffering.
            return pl.BlockSpec(shape, lambda b, c, _nd=nd: (0,) * _nd,
                                pipeline_mode=pl.Buffered(1))
        return pl.BlockSpec(shape, lambda b, c, _nd=nd: (0,) * _nd)

    def run(single_buffer):
        return pl.pallas_call(
            kernel,
            grid=(num_b_blocks, num_chunks),
            in_specs=[lens_spec, x_fwd_spec, x_bwd_spec,
                      const_spec(wih_F.shape, single_buffer),
                      const_spec(bias_F.shape, single_buffer),
                      const_spec(whh_F.shape, single_buffer),
                      bhn_spec,
                      const_spec(wih_B.shape, single_buffer),
                      const_spec(bias_B.shape, single_buffer),
                      const_spec(whh_B.shape, single_buffer),
                      bhn_spec],
            out_specs=out_specs,
            out_shape=out_shapes,
            scratch_shapes=[
                pltpu.VMEM((batch_block, H_pad), jnp.float32),            # h_fwd carry (f32)
                pltpu.VMEM((batch_block, H_pad), jnp.float32),            # h_bwd carry (f32)
                pltpu.VMEM((t_chunk * batch_block, H3), jnp.float32),     # fwd input-proj chunk
                pltpu.VMEM((t_chunk * batch_block, H3), jnp.float32),     # bwd input-proj chunk
            ],
            compiler_params=pltpu.CompilerParams(
                dimension_semantics=("parallel", "arbitrary"),   # batch blocks parallel; time carried
                vmem_limit_bytes=vmem_limit,
            ),
        )(lens_2d, x_2d, x_2d,
          wih_F, bias_F, whh_F, bhn_F,
          wih_B, bias_B, whh_B, bhn_B)

    if single_buffer_weights:
        try:
            out_f, out_b, hf, hb = run(True)
        except Exception:
            # Fallback for JAX builds where BlockSpec(pipeline_mode=...) is unsupported.
            out_f, out_b, hf, hb = run(False)
    else:
        out_f, out_b, hf, hb = run(False)

    # Back to PyTorch conventions (strip padding).
    output = jnp.concatenate([out_f[:T, :B, :H], out_b[:T, :B, :H]], axis=-1)   # [T, B, 2H]
    output = jnp.transpose(output, (1, 0, 2))                                   # [B, T, 2H]
    final = jnp.concatenate([hf[:B, :H], hb[:B, :H]], axis=-1)[None]            # [1, B, 2H]
    return output, final


def encoder_reference(params, x, lengths):
    """Pure-JAX reference (PyTorch GRU formulas + pack/pad masking), f32."""
    B, T, D = x.shape
    H = params["whh_f"].shape[-1]
    x = x.astype(jnp.float32)

    def cell(x_t, h, wih, whh, bih, bhh):
        r = jax.nn.sigmoid(x_t @ wih[0] + bih[0] + h @ whh[0] + bhh[0])
        z = jax.nn.sigmoid(x_t @ wih[1] + bih[1] + h @ whh[1] + bhh[1])
        n = jnp.tanh(x_t @ wih[2] + bih[2] + r * (h @ whh[2] + bhh[2]))
        return (1.0 - z) * n + z * h

    mask = (jnp.arange(T)[None, :] < lengths[:, None]).astype(jnp.float32)   # [B, T]

    out_f, h = [], jnp.zeros((B, H), jnp.float32)
    for t in range(T):
        m = mask[:, t:t + 1]
        hn = cell(x[:, t], h, params["wih_f"], params["whh_f"], params["bih_f"], params["bhh_f"])
        h = m * hn + (1.0 - m) * h
        out_f.append(m * hn)
    hf = h

    out_b, h = [None] * T, jnp.zeros((B, H), jnp.float32)
    for t in range(T - 1, -1, -1):
        m = mask[:, t:t + 1]
        hn = cell(x[:, t], h, params["wih_b"], params["whh_b"], params["bih_b"], params["bhh_b"])
        h = m * hn
        out_b[t] = h
    hb = h

    output = jnp.concatenate([jnp.stack(out_f, 1), jnp.stack(out_b, 1)], axis=-1)
    final = jnp.concatenate([hf, hb], axis=-1)[None]
    return output, final


if __name__ == "__main__":
    B, T, D, H = 2, 8, 16, 32
    key = jax.random.PRNGKey(0)
    kp, kx = jax.random.split(key)

    params = init_encoder_params(kp, D, H)
    x = jax.random.normal(kx, (B, T, D), jnp.float32)
    lengths = jnp.array([8, 5], jnp.int32)   # sorted descending, as pack_padded_sequence requires

    # t_chunk=4 -> 2 grid steps along time: exercises chunk pipelining + carried hidden states.
    output, final = encoder_forward(params, x, lengths, t_chunk=4)
    output, final = jax.block_until_ready((output, final))

    assert output.shape == (B, T, 2 * H)
    assert final.shape == (1, B, 2 * H)

    # Numerical check against the pure-JAX f32 reference (kernel uses bf16 weights/inputs).
    ref_out, ref_final = encoder_reference(params, x, lengths)
    assert jnp.allclose(output, ref_out, atol=3e-2, rtol=3e-2), \
        float(jnp.abs(output - ref_out).max())
    assert jnp.allclose(final, ref_final, atol=3e-2, rtol=3e-2), \
        float(jnp.abs(final - ref_final).max())

    # pad_packed_sequence fills padded positions with zeros; check we reproduce that exactly.
    mask = jnp.arange(T)[None, :] < lengths[:, None]
    assert float(jnp.abs(jnp.where(mask[:, :, None], 0.0, output)).max()) == 0.0

    print("KERNEL_OK")
</pallas_src>

<mosaic_0001>
module attributes {stable_mosaic.version = 11 : i64} {
  func.func @_bigru_kernel(%arg0: i32, %arg1: i32, %arg2: memref<8x128xi32, #tpu.memory_space<vmem>>, %arg3: memref<32x16xbf16, #tpu.memory_space<vmem>>, %arg4: memref<32x16xbf16, #tpu.memory_space<vmem>>, %arg5: memref<16x384xbf16, #tpu.memory_space<vmem>>, %arg6: memref<1x384xf32, #tpu.memory_space<vmem>>, %arg7: memref<128x384xbf16, #tpu.memory_space<vmem>>, %arg8: memref<8x128xf32, #tpu.memory_space<vmem>>, %arg9: memref<16x384xbf16, #tpu.memory_space<vmem>>, %arg10: memref<1x384xf32, #tpu.memory_space<vmem>>, %arg11: memref<128x384xbf16, #tpu.memory_space<vmem>>, %arg12: memref<8x128xf32, #tpu.memory_space<vmem>>, %arg13: memref<4x8x128xf32, #tpu.memory_space<vmem>>, %arg14: memref<4x8x128xf32, #tpu.memory_space<vmem>>, %arg15: memref<8x128xf32, #tpu.memory_space<vmem>>, %arg16: memref<8x128xf32, #tpu.memory_space<vmem>>, %arg17: memref<8x128xf32, #tpu.memory_space<vmem>>, %arg18: memref<8x128xf32, #tpu.memory_space<vmem>>, %arg19: memref<32x384xf32, #tpu.memory_space<vmem>>, %arg20: memref<32x384xf32, #tpu.memory_space<vmem>>) attributes {dimension_semantics = [#tpu.dimension_semantics<parallel>, #tpu.dimension_semantics<arbitrary>], iteration_bounds = array<i64: 1, 2>, scalar_prefetch = 0 : i64, scratch_operands = 4 : i64, tpu.core_type = #tpu.core_type<tc>, window_params = [{transform_indices = @transform_0, window_bounds = array<i64: 8, 128>}, {transform_indices = @transform_1, window_bounds = array<i64: 32, 16>}, {transform_indices = @transform_2, window_bounds = array<i64: 32, 16>}, {pipeline_mode = #tpu.pipeline_mode<synchronous>, transform_indices = @transform_3, window_bounds = array<i64: 16, 384>}, {pipeline_mode = #tpu.pipeline_mode<synchronous>, transform_indices = @transform_4, window_bounds = array<i64: 1, 384>}, {pipeline_mode = #tpu.pipeline_mode<synchronous>, transform_indices = @transform_5, window_bounds = array<i64: 128, 384>}, {transform_indices = @transform_6, window_bounds = array<i64: 8, 128>}, {pipeline_mode = #tpu.pipeline_mode<synchronous>, transform_indices = @transform_7, window_bounds = array<i64: 16, 384>}, {pipeline_mode = #tpu.pipeline_mode<synchronous>, transform_indices = @transform_8, window_bounds = array<i64: 1, 384>}, {pipeline_mode = #tpu.pipeline_mode<synchronous>, transform_indices = @transform_9, window_bounds = array<i64: 128, 384>}, {transform_indices = @transform_10, window_bounds = array<i64: 8, 128>}, {transform_indices = @transform_11, window_bounds = array<i64: 4, 8, 128>}, {transform_indices = @transform_12, window_bounds = array<i64: 4, 8, 128>}, {transform_indices = @transform_13, window_bounds = array<i64: 8, 128>}, {transform_indices = @transform_14, window_bounds = array<i64: 8, 128>}]} {
    %c0_i32 = arith.constant 0 : i32
    %0 = arith.cmpi eq, %arg1, %c0_i32 : i32
    %1 = arith.extui %0 : i1 to i32
    %c0_i32_0 = arith.constant 0 : i32
    %2 = arith.cmpi ne, %1, %c0_i32_0 : i32
    scf.if %2 {
      %cst_118 = arith.constant 0.000000e+00 : f32
      %375 = vector.broadcast %cst_118 : f32 to vector<8x128xf32>
      %c0_119 = arith.constant 0 : index
      %c0_120 = arith.constant 0 : index
      %376 = vector.load %arg17[%c0_119, %c0_120] : memref<8x128xf32, #tpu.memory_space<vmem>>, vector<8x128xf32>
      tpu.vector_store %arg17[%c0_119, %c0_120], %375 {strides = array<i32>} : memref<8x128xf32, #tpu.memory_space<vmem>>, vector<8x128xf32>,
      %cst_121 = arith.constant 0.000000e+00 : f32
      %377 = vector.broadcast %cst_121 : f32 to vector<8x128xf32>
      %c0_122 = arith.constant 0 : index
      %c0_123 = arith.constant 0 : index
      %378 = vector.load %arg18[%c0_122, %c0_123] : memref<8x128xf32, #tpu.memory_space<vmem>>, vector<8x128xf32>
      tpu.vector_store %arg18[%c0_122, %c0_123], %377 {strides = array<i32>} : memref<8x128xf32, #tpu.memory_space<vmem>>, vector<8x128xf32>,
    } else {
    }
    %c0 = arith.constant 0 : index
    %c0_1 = arith.constant 0 : index
    %3 = vector.load %arg3[%c0, %c0_1] : memref<32x16xbf16, #tpu.memory_space<vmem>>, vector<32x16xbf16>
    %c0_2 = arith.constant 0 : index
    %c0_3 = arith.constant 0 : index
    %4 = vector.load %arg5[%c0_2, %c0_3] : memref<16x384xbf16, #tpu.memory_space<vmem>>, vector<16x384xbf16>
    %cst = arith.constant dense<0.000000e+00> : vector<32x384xf32>
    %5 = tpu.matmul %3, %4, %cst {dimension_numbers = #tpu.dot_dimension_numbers<[1], [0], [0], [1], [0, 0, 1, 1], [], []>} : vector<32x16xbf16>, vector<16x384xbf16>, vector<32x384xf32> -> vector<32x384xf32>
    %c0_4 = arith.constant 0 : index
    %c0_5 = arith.constant 0 : index
    %6 = vector.load %arg6[%c0_4, %c0_5] : memref<1x384xf32, #tpu.memory_space<vmem>>, vector<1x384xf32>
    %7 = vector.broadcast %6 : vector<1x384xf32> to vector<32x384xf32>
    %8 = arith.addf %5, %7 : vector<32x384xf32>
    %c0_6 = arith.constant 0 : index
    %c0_7 = arith.constant 0 : index
    %9 = vector.load %arg19[%c0_6, %c0_7] : memref<32x384xf32, #tpu.memory_space<vmem>>, vector<32x384xf32>
    tpu.vector_store %arg19[%c0_6, %c0_7], %8 {strides = array<i32>} : memref<32x384xf32, #tpu.memory_space<vmem>>, vector<32x384xf32>,
    %c0_8 = arith.constant 0 : index
    %c0_9 = arith.constant 0 : index
    %10 = vector.load %arg4[%c0_8, %c0_9] : memref<32x16xbf16, #tpu.memory_space<vmem>>, vector<32x16xbf16>
    %c0_10 = arith.constant 0 : index
    %c0_11 = arith.constant 0 : index
    %11 = vector.load %arg9[%c0_10, %c0_11] : memref<16x384xbf16, #tpu.memory_space<vmem>>, vector<16x384xbf16>
    %cst_12 = arith.constant dense<0.000000e+00> : vector<32x384xf32>
    %12 = tpu.matmul %10, %11, %cst_12 {dimension_numbers = #tpu.dot_dimension_numbers<[1], [0], [0], [1], [0, 0, 1, 1], [], []>} : vector<32x16xbf16>, vector<16x384xbf16>, vector<32x384xf32> -> vector<32x384xf32>
    %c0_13 = arith.constant 0 : index
    %c0_14 = arith.constant 0 : index
    %13 = vector.load %arg10[%c0_13, %c0_14] : memref<1x384xf32, #tpu.memory_space<vmem>>, vector<1x384xf32>
    %14 = vector.broadcast %13 : vector<1x384xf32> to vector<32x384xf32>
    %15 = arith.addf %12, %14 : vector<32x384xf32>
    %c0_15 = arith.constant 0 : index
    %c0_16 = arith.constant 0 : index
    %16 = vector.load %arg20[%c0_15, %c0_16] : memref<32x384xf32, #tpu.memory_space<vmem>>, vector<32x384xf32>
    tpu.vector_store %arg20[%c0_15, %c0_16], %15 {strides = array<i32>} : memref<32x384xf32, #tpu.memory_space<vmem>>, vector<32x384xf32>,
    %c0_17 = arith.constant 0 : index
    %c0_18 = arith.constant 0 : index
    %17 = vector.load %arg2[%c0_17, %c0_18] : memref<8x128xi32, #tpu.memory_space<vmem>>, vector<8x128xi32>
    %c0_19 = arith.constant 0 : index
    %c0_20 = arith.constant 0 : index
    %18 = vector.load %arg7[%c0_19, %c0_20] : memref<128x384xbf16, #tpu.memory_space<vmem>>, vector<128x384xbf16>
    %c0_21 = arith.constant 0 : index
    %c0_22 = arith.constant 0 : index
    %19 = vector.load %arg11[%c0_21, %c0_22] : memref<128x384xbf16, #tpu.memory_space<vmem>>, vector<128x384xbf16>
    %c0_23 = arith.constant 0 : index
    %c0_24 = arith.constant 0 : index
    %20 = vector.load %arg8[%c0_23, %c0_24] : memref<8x128xf32, #tpu.memory_space<vmem>>, vector<8x128xf32>
    %c0_25 = arith.constant 0 : index
    %c0_26 = arith.constant 0 : index
    %21 = vector.load %arg12[%c0_25, %c0_26] : memref<8x128xf32, #tpu.memory_space<vmem>>, vector<8x128xf32>
    %c4_i32 = arith.constant 4 : i32
    %22 = arith.muli %arg1, %c4_i32 : i32
    %c1_i32 = arith.constant 1 : i32
    %23 = arith.subi %c1_i32, %arg1 : i32
    %c4_i32_27 = arith.constant 4 : i32
    %24 = arith.muli %23, %c4_i32_27 : i32
    %c0_28 = arith.constant 0 : index
    %c0_29 = arith.constant 0 : index
    %25 = vector.load %arg17[%c0_28, %c0_29] : memref<8x128xf32, #tpu.memory_space<vmem>>, vector<8x128xf32>
    %c0_30 = arith.constant 0 : index
    %c0_31 = arith.constant 0 : index
    %26 = vector.load %arg18[%c0_30, %c0_31] : memref<8x128xf32, #tpu.memory_space<vmem>>, vector<8x128xf32>
    %c0_i32_32 = arith.constant 0 : i32
    %c3_i32 = arith.constant 3 : i32
    %27 = arith.subi %c3_i32, %c0_i32_32 : i32
    %c8_i32 = arith.constant 8 : i32
    %28 = arith.muli %c0_i32_32, %c8_i32 : i32
    %29 = tpu.assume_multiple %28, 8 : i32
    %30 = arith.index_cast %29 : i32 to index
    %c0_33 = arith.constant 0 : index
    %31 = vector.load %arg19[%30, %c0_33] : memref<32x384xf32, #tpu.memory_space<vmem>>, vector<8x384xf32>
    %32 = arith.truncf %25 : vector<8x128xf32> to vector<8x128xbf16>
    %cst_34 = arith.constant dense<0.000000e+00> : vector<8x384xf32>
    %33 = tpu.matmul %32, %18, %cst_34 {dimension_numbers = #tpu.dot_dimension_numbers<[1], [0], [0], [1], [0, 0, 1, 1], [], []>} : vector<8x128xbf16>, vector<128x384xbf16>, vector<8x384xf32> -> vector<8x384xf32>
    %34 = vector.extract_strided_slice %31 {offsets = [0, 0], sizes = [8, 128], strides = [1, 1]} : vector<8x384xf32> to vector<8x128xf32>
    %35 = vector.extract_strided_slice %33 {offsets = [0, 0], sizes = [8, 128], strides = [1, 1]} : vector<8x384xf32> to vector<8x128xf32>
    %36 = arith.addf %34, %35 : vector<8x128xf32>
    %37 = arith.negf %36 : vector<8x128xf32>
    %38 = math.exp %37 : vector<8x128xf32>
    %cst_35 = arith.constant 1.000000e+00 : f32
    %39 = vector.broadcast %cst_35 : f32 to vector<8x128xf32>
    %40 = arith.addf %39, %38 : vector<8x128xf32>
    %41 = arith.divf %39, %40 : vector<8x128xf32>
    %42 = vector.extract_strided_slice %31 {offsets = [0, 128], sizes = [8, 128], strides = [1, 1]} : vector<8x384xf32> to vector<8x128xf32>
    %43 = vector.extract_strided_slice %33 {offsets = [0, 128], sizes = [8, 128], strides = [1, 1]} : vector<8x384xf32> to vector<8x128xf32>
    %44 = arith.addf %42, %43 : vector<8x128xf32>
    %45 = arith.negf %44 : vector<8x128xf32>
    %46 = math.exp %45 : vector<8x128xf32>
    %cst_36 = arith.constant 1.000000e+00 : f32
    %47 = vector.broadcast %cst_36 : f32 to vector<8x128xf32>
    %48 = arith.addf %47, %46 : vector<8x128xf32>
    %49 = arith.divf %47, %48 : vector<8x128xf32>
    %50 = vector.extract_strided_slice %31 {offsets = [0, 256], sizes = [8, 128], strides = [1, 1]} : vector<8x384xf32> to vector<8x128xf32>
    %51 = vector.extract_strided_slice %33 {offsets = [0, 256], sizes = [8, 128], strides = [1, 1]} : vector<8x384xf32> to vector<8x128xf32>
    %52 = arith.addf %51, %20 : vector<8x128xf32>
    %53 = arith.mulf %41, %52 : vector<8x128xf32>
    %54 = arith.addf %50, %53 : vector<8x128xf32>
    %55 = math.tanh %54 : vector<8x128xf32>
    %cst_37 = arith.constant 1.000000e+00 : f32
    %56 = vector.broadcast %cst_37 : f32 to vector<8x128xf32>
    %57 = arith.subf %56, %49 : vector<8x128xf32>
    %58 = arith.mulf %57, %55 : vector<8x128xf32>
    %59 = arith.mulf %49, %25 : vector<8x128xf32>
    %60 = arith.addf %58, %59 : vector<8x128xf32>
    %61 = arith.addi %22, %c0_i32_32 : i32
    %62 = vector.broadcast %61 : i32 to vector<8x128xi32>
    %63 = arith.cmpi slt, %62, %17 : vector<8x128xi32>
    %cst_38 = arith.constant 0.000000e+00 : f32
    %64 = vector.broadcast %cst_38 : f32 to vector<8x128xf32>
    %65 = arith.select %63, %60, %64 : vector<8x128xi1>, vector<8x128xf32>
    %66 = arith.index_cast %c0_i32_32 : i32 to index
    %c0_39 = arith.constant 0 : index
    %c0_40 = arith.constant 0 : index
    %67 = vector.load %arg13[%66, %c0_39, %c0_40] : memref<4x8x128xf32, #tpu.memory_space<vmem>>, vector<1x8x128xf32>
    %68 = vector.shape_cast %67 : vector<1x8x128xf32> to vector<8x128xf32>
    %69 = vector.shape_cast %65 : vector<8x128xf32> to vector<1x8x128xf32>
    tpu.vector_store %arg13[%66, %c0_39, %c0_40], %69 {strides = array<i32>} : memref<4x8x128xf32, #tpu.memory_space<vmem>>, vector<1x8x128xf32>,
    %70 = arith.select %63, %60, %25 : vector<8x128xi1>, vector<8x128xf32>
    %c8_i32_41 = arith.constant 8 : i32
    %71 = arith.muli %27, %c8_i32_41 : i32
    %72 = tpu.assume_multiple %71, 8 : i32
    %73 = arith.index_cast %72 : i32 to index
    %c0_42 = arith.constant 0 : index
    %74 = vector.load %arg20[%73, %c0_42] : memref<32x384xf32, #tpu.memory_space<vmem>>, vector<8x384xf32>
    %75 = arith.truncf %26 : vector<8x128xf32> to vector<8x128xbf16>
    %cst_43 = arith.constant dense<0.000000e+00> : vector<8x384xf32>
    %76 = tpu.matmul %75, %19, %cst_43 {dimension_numbers = #tpu.dot_dimension_numbers<[1], [0], [0], [1], [0, 0, 1, 1], [], []>} : vector<8x128xbf16>, vector<128x384xbf16>, vector<8x384xf32> -> vector<8x384xf32>
    %77 = vector.extract_strided_slice %74 {offsets = [0, 0], sizes = [8, 128], strides = [1, 1]} : vector<8x384xf32> to vector<8x128xf32>
    %78 = vector.extract_strided_slice %76 {offsets = [0, 0], sizes = [8, 128], strides = [1, 1]} : vector<8x384xf32> to vector<8x128xf32>
    %79 = arith.addf %77, %78 : vector<8x128xf32>
    %80 = arith.negf %79 : vector<8x128xf32>
    %81 = math.exp %80 : vector<8x128xf32>
    %cst_44 = arith.constant 1.000000e+00 : f32
    %82 = vector.broadcast %cst_44 : f32 to vector<8x128xf32>
    %83 = arith.addf %82, %81 : vector<8x128xf32>
    %84 = arith.divf %82, %83 : vector<8x128xf32>
    %85 = vector.extract_strided_slice %74 {offsets = [0, 128], sizes = [8, 128], strides = [1, 1]} : vector<8x384xf32> to vector<8x128xf32>
    %86 = vector.extract_strided_slice %76 {offsets = [0, 128], sizes = [8, 128], strides = [1, 1]} : vector<8x384xf32> to vector<8x128xf32>
    %87 = arith.addf %85, %86 : vector<8x128xf32>
    %88 = arith.negf %87 : vector<8x128xf32>
    %89 = math.exp %88 : vector<8x128xf32>
    %cst_45 = arith.constant 1.000000e+00 : f32
    %90 = vector.broadcast %cst_45 : f32 to vector<8x128xf32>
    %91 = arith.addf %90, %89 : vector<8x128xf32>
    %92 = arith.divf %90, %91 : vector<8x128xf32>
    %93 = vector.extract_strided_slice %74 {offsets = [0, 256], sizes = [8, 128], strides = [1, 1]} : vector<8x384xf32> to vector<8x128xf32>
    %94 = vector.extract_strided_slice %76 {offsets = [0, 256], sizes = [8, 128], strides = [1, 1]} : vector<8x384xf32> to vector<8x128xf32>
    %95 = arith.addf %94, %21 : vector<8x128xf32>
    %96 = arith.mulf %84, %95 : vector<8x128xf32>
    %97 = arith.addf %93, %96 : vector<8x128xf32>
    %98 = math.tanh %97 : vector<8x128xf32>
    %cst_46 = arith.constant 1.000000e+00 : f32
    %99 = vector.broadcast %cst_46 : f32 to vector<8x128xf32>
    %100 = arith.subf %99, %92 : vector<8x128xf32>
    %101 = arith.mulf %100, %98 : vector<8x128xf32>
    %102 = arith.mulf %92, %26 : vector<8x128xf32>
    %103 = arith.addf %101, %102 : vector<8x128xf32>
    %104 = arith.addi %24, %27 : i32
    %105 = vector.broadcast %104 : i32 to vector<8x128xi32>
    %106 = arith.cmpi slt, %105, %17 : vector<8x128xi32>
    %cst_47 = arith.constant 0.000000e+00 : f32
    %107 = vector.broadcast %cst_47 : f32 to vector<8x128xf32>
    %108 = arith.select %106, %103, %107 : vector<8x128xi1>, vector<8x128xf32>
    %109 = arith.index_cast %27 : i32 to index
    %c0_48 = arith.constant 0 : index
    %c0_49 = arith.constant 0 : index
    %110 = vector.load %arg14[%109, %c0_48, %c0_49] : memref<4x8x128xf32, #tpu.memory_space<vmem>>, vector<1x8x128xf32>
    %111 = vector.shape_cast %110 : vector<1x8x128xf32> to vector<8x128xf32>
    %112 = vector.shape_cast %108 : vector<8x128xf32> to vector<1x8x128xf32>
    tpu.vector_store %arg14[%109, %c0_48, %c0_49], %112 {strides = array<i32>} : memref<4x8x128xf32, #tpu.memory_space<vmem>>, vector<1x8x128xf32>,
    %c1_i32_50 = arith.constant 1 : i32
    %c3_i32_51 = arith.constant 3 : i32
    %113 = arith.subi %c3_i32_51, %c1_i32_50 : i32
    %c8_i32_52 = arith.constant 8 : i32
    %114 = arith.muli %c1_i32_50, %c8_i32_52 : i32
    %115 = tpu.assume_multiple %114, 8 : i32
    %116 = arith.index_cast %115 : i32 to index
    %c0_53 = arith.constant 0 : index
    %117 = vector.load %arg19[%116, %c0_53] : memref<32x384xf32, #tpu.memory_space<vmem>>, vector<8x384xf32>
    %118 = arith.truncf %70 : vector<8x128xf32> to vector<8x128xbf16>
    %cst_54 = arith.constant dense<0.000000e+00> : vector<8x384xf32>
    %119 = tpu.matmul %118, %18, %cst_54 {dimension_numbers = #tpu.dot_dimension_numbers<[1], [0], [0], [1], [0, 0, 1, 1], [], []>} : vector<8x128xbf16>, vector<128x384xbf16>, vector<8x384xf32> -> vector<8x384xf32>
    %120 = vector.extract_strided_slice %117 {offsets = [0, 0], sizes = [8, 128], strides = [1, 1]} : vector<8x384xf32> to vector<8x128xf32>
    %121 = vector.extract_strided_slice %119 {offsets = [0, 0], sizes = [8, 128], strides = [1, 1]} : vector<8x384xf32> to vector<8x128xf32>
    %122 = arith.addf %120, %121 : vector<8x128xf32>
    %123 = arith.negf %122 : vector<8x128xf32>
    %124 = math.exp %123 : vector<8x128xf32>
    %cst_55 = arith.constant 1.000000e+00 : f32
    %125 = vector.broadcast %cst_55 : f32 to vector<8x128xf32>
    %126 = arith.addf %125, %124 : vector<8x128xf32>
    %127 = arith.divf %125, %126 : vector<8x128xf32>
    %128 = vector.extract_strided_slice %117 {offsets = [0, 128], sizes = [8, 128], strides = [1, 1]} : vector<8x384xf32> to vector<8x128xf32>
    %129 = vector.extract_strided_slice %119 {offsets = [0, 128], sizes = [8, 128], strides = [1, 1]} : vector<8x384xf32> to vector<8x128xf32>
    %130 = arith.addf %128, %129 : vector<8x128xf32>
    %131 = arith.negf %130 : vector<8x128xf32>
    %132 = math.exp %131 : vector<8x128xf32>
    %cst_56 = arith.constant 1.000000e+00 : f32
    %133 = vector.broadcast %cst_56 : f32 to vector<8x128xf32>
    %134 = arith.addf %133, %132 : vector<8x128xf32>
    %135 = arith.divf %133, %134 : vector<8x128xf32>
    %136 = vector.extract_strided_slice %117 {offsets = [0, 256], sizes = [8, 128], strides = [1, 1]} : vector<8x384xf32> to vector<8x128xf32>
    %137 = vector.extract_strided_slice %119 {offsets = [0, 256], sizes = [8, 128], strides = [1, 1]} : vector<8x384xf32> to vector<8x128xf32>
    %138 = arith.addf %137, %20 : vector<8x128xf32>
    %139 = arith.mulf %127, %138 : vector<8x128xf32>
    %140 = arith.addf %136, %139 : vector<8x128xf32>
    %141 = math.tanh %140 : vector<8x128xf32>
    %cst_57 = arith.constant 1.000000e+00 : f32
    %142 = vector.broadcast %cst_57 : f32 to vector<8x128xf32>
    %143 = arith.subf %142, %135 : vector<8x128xf32>
    %144 = arith.mulf %143, %141 : vector<8x128xf32>
    %145 = arith.mulf %135, %70 : vector<8x128xf32>
    %146 = arith.addf %144, %145 : vector<8x128xf32>
    %147 = arith.addi %22, %c1_i32_50 : i32
    %148 = vector.broadcast %147 : i32 to vector<8x128xi32>
    %149 = arith.cmpi slt, %148, %17 : vector<8x128xi32>
    %cst_58 = arith.constant 0.000000e+00 : f32
    %150 = vector.broadcast %cst_58 : f32 to vector<8x128xf32>
    %151 = arith.select %149, %146, %150 : vector<8x128xi1>, vector<8x128xf32>
    %152 = arith.index_cast %c1_i32_50 : i32 to index
    %c0_59 = arith.constant 0 : index
    %c0_60 = arith.constant 0 : index
    %153 = vector.load %arg13[%152, %c0_59, %c0_60] : memref<4x8x128xf32, #tpu.memory_space<vmem>>, vector<1x8x128xf32>
    %154 = vector.shape_cast %153 : vector<1x8x128xf32> to vector<8x128xf32>
    %155 = vector.shape_cast %151 : vector<8x128xf32> to vector<1x8x128xf32>
    tpu.vector_store %arg13[%152, %c0_59, %c0_60], %155 {strides = array<i32>} : memref<4x8x128xf32, #tpu.memory_space<vmem>>, vector<1x8x128xf32>,
    %156 = arith.select %149, %146, %70 : vector<8x128xi1>, vector<8x128xf32>
    %c8_i32_61 = arith.constant 8 : i32
    %157 = arith.muli %113, %c8_i32_61 : i32
    %158 = tpu.assume_multiple %157, 8 : i32
    %159 = arith.index_cast %158 : i32 to index
    %c0_62 = arith.constant 0 : index
    %160 = vector.load %arg20[%159, %c0_62] : memref<32x384xf32, #tpu.memory_space<vmem>>, vector<8x384xf32>
    %161 = arith.truncf %108 : vector<8x128xf32> to vector<8x128xbf16>
    %cst_63 = arith.constant dense<0.000000e+00> : vector<8x384xf32>
    %162 = tpu.matmul %161, %19, %cst_63 {dimension_numbers = #tpu.dot_dimension_numbers<[1], [0], [0], [1], [0, 0, 1, 1], [], []>} : vector<8x128xbf16>, vector<128x384xbf16>, vector<8x384xf32> -> vector<8x384xf32>
    %163 = vector.extract_strided_slice %160 {offsets = [0, 0], sizes = [8, 128], strides = [1, 1]} : vector<8x384xf32> to vector<8x128xf32>
    %164 = vector.extract_strided_slice %162 {offsets = [0, 0], sizes = [8, 128], strides = [1, 1]} : vector<8x384xf32> to vector<8x128xf32>
    %165 = arith.addf %163, %164 : vector<8x128xf32>
    %166 = arith.negf %165 : vector<8x128xf32>
    %167 = math.exp %166 : vector<8x128xf32>
    %cst_64 = arith.constant 1.000000e+00 : f32
    %168 = vector.broadcast %cst_64 : f32 to vector<8x128xf32>
    %169 = arith.addf %168, %167 : vector<8x128xf32>
    %170 = arith.divf %168, %169 : vector<8x128xf32>
    %171 = vector.extract_strided_slice %160 {offsets = [0, 128], sizes = [8, 128], strides = [1, 1]} : vector<8x384xf32> to vector<8x128xf32>
    %172 = vector.extract_strided_slice %162 {offsets = [0, 128], sizes = [8, 128], strides = [1, 1]} : vector<8x384xf32> to vector<8x128xf32>
    %173 = arith.addf %171, %172 : vector<8x128xf32>
    %174 = arith.negf %173 : vector<8x128xf32>
    %175 = math.exp %174 : vector<8x128xf32>
    %cst_65 = arith.constant 1.000000e+00 : f32
    %176 = vector.broadcast %cst_65 : f32 to vector<8x128xf32>
    %177 = arith.addf %176, %175 : vector<8x128xf32>
    %178 = arith.divf %176, %177 : vector<8x128xf32>
    %179 = vector.extract_strided_slice %160 {offsets = [0, 256], sizes = [8, 128], strides = [1, 1]} : vector<8x384xf32> to vector<8x128xf32>
    %180 = vector.extract_strided_slice %162 {offsets = [0, 256], sizes = [8, 128], strides = [1, 1]} : vector<8x384xf32> to vector<8x128xf32>
    %181 = arith.addf %180, %21 : vector<8x128xf32>
    %182 = arith.mulf %170, %181 : vector<8x128xf32>
    %183 = arith.addf %179, %182 : vector<8x128xf32>
    %184 = math.tanh %183 : vector<8x128xf32>
    %cst_66 = arith.constant 1.000000e+00 : f32
    %185 = vector.broadcast %cst_66 : f32 to vector<8x128xf32>
    %186 = arith.subf %185, %178 : vector<8x128xf32>
    %187 = arith.mulf %186, %184 : vector<8x128xf32>
    %188 = arith.mulf %178, %108 : vector<8x128xf32>
    %189 = arith.addf %187, %188 : vector<8x128xf32>
    %190 = arith.addi %24, %113 : i32
    %191 = vector.broadcast %190 : i32 to vector<8x128xi32>
    %192 = arith.cmpi slt, %191, %17 : vector<8x128xi32>
    %cst_67 = arith.constant 0.000000e+00 : f32
    %193 = vector.broadcast %cst_67 : f32 to vector<8x128xf32>
    %194 = arith.select %192, %189, %193 : vector<8x128xi1>, vector<8x128xf32>
    %195 = arith.index_cast %113 : i32 to index
    %c0_68 = arith.constant 0 : index
    %c0_69 = arith.constant 0 : index
    %196 = vector.load %arg14[%195, %c0_68, %c0_69] : memref<4x8x128xf32, #tpu.memory_space<vmem>>, vector<1x8x128xf32>
    %197 = vector.shape_cast %196 : vector<1x8x128xf32> to vector<8x128xf32>
    %198 = vector.shape_cast %194 : vector<8x128xf32> to vector<1x8x128xf32>
    tpu.vector_store %arg14[%195, %c0_68, %c0_69], %198 {strides = array<i32>} : memref<4x8x128xf32, #tpu.memory_space<vmem>>, vector<1x8x128xf32>,
    %c2_i32 = arith.constant 2 : i32
    %c3_i32_70 = arith.constant 3 : i32
    %199 = arith.subi %c3_i32_70, %c2_i32 : i32
    %c8_i32_71 = arith.constant 8 : i32
    %200 = arith.muli %c2_i32, %c8_i32_71 : i32
    %201 = tpu.assume_multiple %200, 8 : i32
    %202 = arith.index_cast %201 : i32 to index
    %c0_72 = arith.constant 0 : index
    %203 = vector.load %arg19[%202, %c0_72] : memref<32x384xf32, #tpu.memory_space<vmem>>, vector<8x384xf32>
    %204 = arith.truncf %156 : vector<8x128xf32> to vector<8x128xbf16>
    %cst_73 = arith.constant dense<0.000000e+00> : vector<8x384xf32>
    %205 = tpu.matmul %204, %18, %cst_73 {dimension_numbers = #tpu.dot_dimension_numbers<[1], [0], [0], [1], [0, 0, 1, 1], [], []>} : vector<8x128xbf16>, vector<128x384xbf16>, vector<8x384xf32> -> vector<8x384xf32>
    %206 = vector.extract_strided_slice %203 {offsets = [0, 0], sizes = [8, 128], strides = [1, 1]} : vector<8x384xf32> to vector<8x128xf32>
    %207 = vector.extract_strided_slice %205 {offsets = [0, 0], sizes = [8, 128], strides = [1, 1]} : vector<8x384xf32> to vector<8x128xf32>
    %208 = arith.addf %206, %207 : vector<8x128xf32>
    %209 = arith.negf %208 : vector<8x128xf32>
    %210 = math.exp %209 : vector<8x128xf32>
    %cst_74 = arith.constant 1.000000e+00 : f32
    %211 = vector.broadcast %cst_74 : f32 to vector<8x128xf32>
    %212 = arith.addf %211, %210 : vector<8x128xf32>
    %213 = arith.divf %211, %212 : vector<8x128xf32>
    %214 = vector.extract_strided_slice %203 {offsets = [0, 128], sizes = [8, 128], strides = [1, 1]} : vector<8x384xf32> to vector<8x128xf32>
    %215 = vector.extract_strided_slice %205 {offsets = [0, 128], sizes = [8, 128], strides = [1, 1]} : vector<8x384xf32> to vector<8x128xf32>
    %216 = arith.addf %214, %215 : vector<8x128xf32>
    %217 = arith.negf %216 : vector<8x128xf32>
    %218 = math.exp %217 : vector<8x128xf32>
    %cst_75 = arith.constant 1.000000e+00 : f32
    %219 = vector.broadcast %cst_75 : f32 to vector<8x128xf32>
    %220 = arith.addf %219, %218 : vector<8x128xf32>
    %221 = arith.divf %219, %220 : vector<8x128xf32>
    %222 = vector.extract_strided_slice %203 {offsets = [0, 256], sizes = [8, 128], strides = [1, 1]} : vector<8x384xf32> to vector<8x128xf32>
    %223 = vector.extract_strided_slice %205 {offsets = [0, 256], sizes = [8, 128], strides = [1, 1]} : vector<8x384xf32> to vector<8x128xf32>
    %224 = arith.addf %223, %20 : vector<8x128xf32>
    %225 = arith.mulf %213, %224 : vector<8x128xf32>
    %226 = arith.addf %222, %225 : vector<8x128xf32>
    %227 = math.tanh %226 : vector<8x128xf32>
    %cst_76 = arith.constant 1.000000e+00 : f32
    %228 = vector.broadcast %cst_76 : f32 to vector<8x128xf32>
    %229 = arith.subf %228, %221 : vector<8x128xf32>
    %230 = arith.mulf %229, %227 : vector<8x128xf32>
    %231 = arith.mulf %221, %156 : vector<8x128xf32>
    %232 = arith.addf %230, %231 : vector<8x128xf32>
    %233 = arith.addi %22, %c2_i32 : i32
    %234 = vector.broadcast %233 : i32 to vector<8x128xi32>
    %235 = arith.cmpi slt, %234, %17 : vector<8x128xi32>
    %cst_77 = arith.constant 0.000000e+00 : f32
    %236 = vector.broadcast %cst_77 : f32 to vector<8x128xf32>
    %237 = arith.select %235, %232, %236 : vector<8x128xi1>, vector<8x128xf32>
    %238 = arith.index_cast %c2_i32 : i32 to index
    %c0_78 = arith.constant 0 : index
    %c0_79 = arith.constant 0 : index
    %239 = vector.load %arg13[%238, %c0_78, %c0_79] : memref<4x8x128xf32, #tpu.memory_space<vmem>>, vector<1x8x128xf32>
    %240 = vector.shape_cast %239 : vector<1x8x128xf32> to vector<8x128xf32>
    %241 = vector.shape_cast %237 : vector<8x128xf32> to vector<1x8x128xf32>
    tpu.vector_store %arg13[%238, %c0_78, %c0_79], %241 {strides = array<i32>} : memref<4x8x128xf32, #tpu.memory_space<vmem>>, vector<1x8x128xf32>,
    %242 = arith.select %235, %232, %156 : vector<8x128xi1>, vector<8x128xf32>
    %c8_i32_80 = arith.constant 8 : i32
    %243 = arith.muli %199, %c8_i32_80 : i32
    %244 = tpu.assume_multiple %243, 8 : i32
    %245 = arith.index_cast %244 : i32 to index
    %c0_81 = arith.constant 0 : index
    %246 = vector.load %arg20[%245, %c0_81] : memref<32x384xf32, #tpu.memory_space<vmem>>, vector<8x384xf32>
    %247 = arith.truncf %194 : vector<8x128xf32> to vector<8x128xbf16>
    %cst_82 = arith.constant dense<0.000000e+00> : vector<8x384xf32>
    %248 = tpu.matmul %247, %19, %cst_82 {dimension_numbers = #tpu.dot_dimension_numbers<[1], [0], [0], [1], [0, 0, 1, 1], [], []>} : vector<8x128xbf16>, vector<128x384xbf16>, vector<8x384xf32> -> vector<8x384xf32>
    %249 = vector.extract_strided_slice %246 {offsets = [0, 0], sizes = [8, 128], strides = [1, 1]} : vector<8x384xf32> to vector<8x128xf32>
    %250 = vector.extract_strided_slice %248 {offsets = [0, 0], sizes = [8, 128], strides = [1, 1]} : vector<8x384xf32> to vector<8x128xf32>
    %251 = arith.addf %249, %250 : vector<8x128xf32>
    %252 = arith.negf %251 : vector<8x128xf32>
    %253 = math.exp %252 : vector<8x128xf32>
    %cst_83 = arith.constant 1.000000e+00 : f32
    %254 = vector.broadcast %cst_83 : f32 to vector<8x128xf32>
    %255 = arith.addf %254, %253 : vector<8x128xf32>
    %256 = arith.divf %254, %255 : vector<8x128xf32>
    %257 = vector.extract_strided_slice %246 {offsets = [0, 128], sizes = [8, 128], strides = [1, 1]} : vector<8x384xf32> to vector<8x128xf32>
    %258 = vector.extract_strided_slice %248 {offsets = [0, 128], sizes = [8, 128], strides = [1, 1]} : vector<8x384xf32> to vector<8x128xf32>
    %259 = arith.addf %257, %258 : vector<8x128xf32>
    %260 = arith.negf %259 : vector<8x128xf32>
    %261 = math.exp %260 : vector<8x128xf32>
    %cst_84 = arith.constant 1.000000e+00 : f32
    %262 = vector.broadcast %cst_84 : f32 to vector<8x128xf32>
    %263 = arith.addf %262, %261 : vector<8x128xf32>
    %264 = arith.divf %262, %263 : vector<8x128xf32>
    %265 = vector.extract_strided_slice %246 {offsets = [0, 256], sizes = [8, 128], strides = [1, 1]} : vector<8x384xf32> to vector<8x128xf32>
    %266 = vector.extract_strided_slice %248 {offsets = [0, 256], sizes = [8, 128], strides = [1, 1]} : vector<8x384xf32> to vector<8x128xf32>
    %267 = arith.addf %266, %21 : vector<8x128xf32>
    %268 = arith.mulf %256, %267 : vector<8x128xf32>
    %269 = arith.addf %265, %268 : vector<8x128xf32>
    %270 = math.tanh %269 : vector<8x128xf32>
    %cst_85 = arith.constant 1.000000e+00 : f32
    %271 = vector.broadcast %cst_85 : f32 to vector<8x128xf32>
    %272 = arith.subf %271, %264 : vector<8x128xf32>
    %273 = arith.mulf %272, %270 : vector<8x128xf32>
    %274 = arith.mulf %264, %194 : vector<8x128xf32>
    %275 = arith.addf %273, %274 : vector<8x128xf32>
    %276 = arith.addi %24, %199 : i32
    %277 = vector.broadcast %276 : i32 to vector<8x128xi32>
    %278 = arith.cmpi slt, %277, %17 : vector<8x128xi32>
    %cst_86 = arith.constant 0.000000e+00 : f32
    %279 = vector.broadcast %cst_86 : f32 to vector<8x128xf32>
    %280 = arith.select %278, %275, %279 : vector<8x128xi1>, vector<8x128xf32>
    %281 = arith.index_cast %199 : i32 to index
    %c0_87 = arith.constant 0 : index
    %c0_88 = arith.constant 0 : index
    %282 = vector.load %arg14[%281, %c0_87, %c0_88] : memref<4x8x128xf32, #tpu.memory_space<vmem>>, vector<1x8x128xf32>
    %283 = vector.shape_cast %282 : vector<1x8x128xf32> to vector<8x128xf32>
    %284 = vector.shape_cast %280 : vector<8x128xf32> to vector<1x8x128xf32>
    tpu.vector_store %arg14[%281, %c0_87, %c0_88], %284 {strides = array<i32>} : memref<4x8x128xf32, #tpu.memory_space<vmem>>, vector<1x8x128xf32>,
    %c3_i32_89 = arith.constant 3 : i32
    %c3_i32_90 = arith.constant 3 : i32
    %285 = arith.subi %c3_i32_90, %c3_i32_89 : i32
    %c8_i32_91 = arith.constant 8 : i32
    %286 = arith.muli %c3_i32_89, %c8_i32_91 : i32
    %287 = tpu.assume_multiple %286, 8 : i32
    %288 = arith.index_cast %287 : i32 to index
    %c0_92 = arith.constant 0 : index
    %289 = vector.load %arg19[%288, %c0_92] : memref<32x384xf32, #tpu.memory_space<vmem>>, vector<8x384xf32>
    %290 = arith.truncf %242 : vector<8x128xf32> to vector<8x128xbf16>
    %cst_93 = arith.constant dense<0.000000e+00> : vector<8x384xf32>
    %291 = tpu.matmul %290, %18, %cst_93 {dimension_numbers = #tpu.dot_dimension_numbers<[1], [0], [0], [1], [0, 0, 1, 1], [], []>} : vector<8x128xbf16>, vector<128x384xbf16>, vector<8x384xf32> -> vector<8x384xf32>
    %292 = vector.extract_strided_slice %289 {offsets = [0, 0], sizes = [8, 128], strides = [1, 1]} : vector<8x384xf32> to vector<8x128xf32>
    %293 = vector.extract_strided_slice %291 {offsets = [0, 0], sizes = [8, 128], strides = [1, 1]} : vector<8x384xf32> to vector<8x128xf32>
    %294 = arith.addf %292, %293 : vector<8x128xf32>
    %295 = arith.negf %294 : vector<8x128xf32>
    %296 = math.exp %295 : vector<8x128xf32>
    %cst_94 = arith.constant 1.000000e+00 : f32
    %297 = vector.broadcast %cst_94 : f32 to vector<8x128xf32>
    %298 = arith.addf %297, %296 : vector<8x128xf32>
    %299 = arith.divf %297, %298 : vector<8x128xf32>
    %300 = vector.extract_strided_slice %289 {offsets = [0, 128], sizes = [8, 128], strides = [1, 1]} : vector<8x384xf32> to vector<8x128xf32>
    %301 = vector.extract_strided_slice %291 {offsets = [0, 128], sizes = [8, 128], strides = [1, 1]} : vector<8x384xf32> to vector<8x128xf32>
    %302 = arith.addf %300, %301 : vector<8x128xf32>
    %303 = arith.negf %302 : vector<8x128xf32>
    %304 = math.exp %303 : vector<8x128xf32>
    %cst_95 = arith.constant 1.000000e+00 : f32
    %305 = vector.broadcast %cst_95 : f32 to vector<8x128xf32>
    %306 = arith.addf %305, %304 : vector<8x128xf32>
    %307 = arith.divf %305, %306 : vector<8x128xf32>
    %308 = vector.extract_strided_slice %289 {offsets = [0, 256], sizes = [8, 128], strides = [1, 1]} : vector<8x384xf32> to vector<8x128xf32>
    %309 = vector.extract_strided_slice %291 {offsets = [0, 256], sizes = [8, 128], strides = [1, 1]} : vector<8x384xf32> to vector<8x128xf32>
    %310 = arith.addf %309, %20 : vector<8x128xf32>
    %311 = arith.mulf %299, %310 : vector<8x128xf32>
    %312 = arith.addf %308, %311 : vector<8x128xf32>
    %313 = math.tanh %312 : vector<8x128xf32>
    %cst_96 = arith.constant 1.000000e+00 : f32
    %314 = vector.broadcast %cst_96 : f32 to vector<8x128xf32>
    %315 = arith.subf %314, %307 : vector<8x128xf32>
    %316 = arith.mulf %315, %313 : vector<8x128xf32>
    %317 = arith.mulf %307, %242 : vector<8x128xf32>
    %318 = arith.addf %316, %317 : vector<8x128xf32>
    %319 = arith.addi %22, %c3_i32_89 : i32
    %320 = vector.broadcast %319 : i32 to vector<8x128xi32>
    %321 = arith.cmpi slt, %320, %17 : vector<8x128xi32>
    %cst_97 = arith.constant 0.000000e+00 : f32
    %322 = vector.broadcast %cst_97 : f32 to vector<8x128xf32>
    %323 = arith.select %321, %318, %322 : vector<8x128xi1>, vector<8x128xf32>
    %324 = arith.index_cast %c3_i32_89 : i32 to index
    %c0_98 = arith.constant 0 : index
    %c0_99 = arith.constant 0 : index
    %325 = vector.load %arg13[%324, %c0_98, %c0_99] : memref<4x8x128xf32, #tpu.memory_space<vmem>>, vector<1x8x128xf32>
    %326 = vector.shape_cast %325 : vector<1x8x128xf32> to vector<8x128xf32>
    %327 = vector.shape_cast %323 : vector<8x128xf32> to vector<1x8x128xf32>
    tpu.vector_store %arg13[%324, %c0_98, %c0_99], %327 {strides = array<i32>} : memref<4x8x128xf32, #tpu.memory_space<vmem>>, vector<1x8x128xf32>,
    %328 = arith.select %321, %318, %242 : vector<8x128xi1>, vector<8x128xf32>
    %c8_i32_100 = arith.constant 8 : i32
    %329 = arith.muli %285, %c8_i32_100 : i32
    %330 = tpu.assume_multiple %329, 8 : i32
    %331 = arith.index_cast %330 : i32 to index
    %c0_101 = arith.constant 0 : index
    %332 = vector.load %arg20[%331, %c0_101] : memref<32x384xf32, #tpu.memory_space<vmem>>, vector<8x384xf32>
    %333 = arith.truncf %280 : vector<8x128xf32> to vector<8x128xbf16>
    %cst_102 = arith.constant dense<0.000000e+00> : vector<8x384xf32>
    %334 = tpu.matmul %333, %19, %cst_102 {dimension_numbers = #tpu.dot_dimension_numbers<[1], [0], [0], [1], [0, 0, 1, 1], [], []>} : vector<8x128xbf16>, vector<128x384xbf16>, vector<8x384xf32> -> vector<8x384xf32>
    %335 = vector.extract_strided_slice %332 {offsets = [0, 0], sizes = [8, 128], strides = [1, 1]} : vector<8x384xf32> to vector<8x128xf32>
    %336 = vector.extract_strided_slice %334 {offsets = [0, 0], sizes = [8, 128], strides = [1, 1]} : vector<8x384xf32> to vector<8x128xf32>
    %337 = arith.addf %335, %336 : vector<8x128xf32>
    %338 = arith.negf %337 : vector<8x128xf32>
    %339 = math.exp %338 : vector<8x128xf32>
    %cst_103 = arith.constant 1.000000e+00 : f32
    %340 = vector.broadcast %cst_103 : f32 to vector<8x128xf32>
    %341 = arith.addf %340, %339 : vector<8x128xf32>
    %342 = arith.divf %340, %341 : vector<8x128xf32>
    %343 = vector.extract_strided_slice %332 {offsets = [0, 128], sizes = [8, 128], strides = [1, 1]} : vector<8x384xf32> to vector<8x128xf32>
    %344 = vector.extract_strided_slice %334 {offsets = [0, 128], sizes = [8, 128], strides = [1, 1]} : vector<8x384xf32> to vector<8x128xf32>
    %345 = arith.addf %343, %344 : vector<8x128xf32>
    %346 = arith.negf %345 : vector<8x128xf32>
    %347 = math.exp %346 : vector<8x128xf32>
    %cst_104 = arith.constant 1.000000e+00 : f32
    %348 = vector.broadcast %cst_104 : f32 to vector<8x128xf32>
    %349 = arith.addf %348, %347 : vector<8x128xf32>
    %350 = arith.divf %348, %349 : vector<8x128xf32>
    %351 = vector.extract_strided_slice %332 {offsets = [0, 256], sizes = [8, 128], strides = [1, 1]} : vector<8x384xf32> to vector<8x128xf32>
    %352 = vector.extract_strided_slice %334 {offsets = [0, 256], sizes = [8, 128], strides = [1, 1]} : vector<8x384xf32> to vector<8x128xf32>
    %353 = arith.addf %352, %21 : vector<8x128xf32>
    %354 = arith.mulf %342, %353 : vector<8x128xf32>
    %355 = arith.addf %351, %354 : vector<8x128xf32>
    %356 = math.tanh %355 : vector<8x128xf32>
    %cst_105 = arith.constant 1.000000e+00 : f32
    %357 = vector.broadcast %cst_105 : f32 to vector<8x128xf32>
    %358 = arith.subf %357, %350 : vector<8x128xf32>
    %359 = arith.mulf %358, %356 : vector<8x128xf32>
    %360 = arith.mulf %350, %280 : vector<8x128xf32>
    %361 = arith.addf %359, %360 : vector<8x128xf32>
    %362 = arith.addi %24, %285 : i32
    %363 = vector.broadcast %362 : i32 to vector<8x128xi32>
    %364 = arith.cmpi slt, %363, %17 : vector<8x128xi32>
    %cst_106 = arith.constant 0.000000e+00 : f32
    %365 = vector.broadcast %cst_106 : f32 to vector<8x128xf32>
    %366 = arith.select %364, %361, %365 : vector<8x128xi1>, vector<8x128xf32>
    %367 = arith.index_cast %285 : i32 to index
    %c0_107 = arith.constant 0 : index
    %c0_108 = arith.constant 0 : index
    %368 = vector.load %arg14[%367, %c0_107, %c0_108] : memref<4x8x128xf32, #tpu.memory_space<vmem>>, vector<1x8x128xf32>
    %369 = vector.shape_cast %368 : vector<1x8x128xf32> to vector<8x128xf32>
    %370 = vector.shape_cast %366 : vector<8x128xf32> to vector<1x8x128xf32>
    tpu.vector_store %arg14[%367, %c0_107, %c0_108], %370 {strides = array<i32>} : memref<4x8x128xf32, #tpu.memory_space<vmem>>, vector<1x8x128xf32>,
    %c4_i32_109 = arith.constant 4 : i32
    %c0_110 = arith.constant 0 : index
    %c0_111 = arith.constant 0 : index
    %371 = vector.load %arg17[%c0_110, %c0_111] : memref<8x128xf32, #tpu.memory_space<vmem>>, vector<8x128xf32>
    tpu.vector_store %arg17[%c0_110, %c0_111], %328 {strides = array<i32>} : memref<8x128xf32, #tpu.memory_space<vmem>>, vector<8x128xf32>,
    %c0_112 = arith.constant 0 : index
    %c0_113 = arith.constant 0 : index
    %372 = vector.load %arg18[%c0_112, %c0_113] : memref<8x128xf32, #tpu.memory_space<vmem>>, vector<8x128xf32>
    tpu.vector_store %arg18[%c0_112, %c0_113], %366 {strides = array<i32>} : memref<8x128xf32, #tpu.memory_space<vmem>>, vector<8x128xf32>,
    %c0_114 = arith.constant 0 : index
    %c0_115 = arith.constant 0 : index
    %373 = vector.load %arg15[%c0_114, %c0_115] : memref<8x128xf32, #tpu.memory_space<vmem>>, vector<8x128xf32>
    tpu.vector_store %arg15[%c0_114, %c0_115], %328 {strides = array<i32>} : memref<8x128xf32, #tpu.memory_space<vmem>>, vector<8x128xf32>,
    %c0_116 = arith.constant 0 : index
    %c0_117 = arith.constant 0 : index
    %374 = vector.load %arg16[%c0_116, %c0_117] : memref<8x128xf32, #tpu.memory_space<vmem>>, vector<8x128xf32>
    tpu.vector_store %arg16[%c0_116, %c0_117], %366 {strides = array<i32>} : memref<8x128xf32, #tpu.memory_space<vmem>>, vector<8x128xf32>,
    return
  }
  func.func @transform_0(%arg0: i32, %arg1: i32) -> (i32, i32) {
    %c0_i32 = arith.constant 0 : i32
    %c0_i32_0 = arith.constant 0 : i32
    return %arg0, %c0_i32 : i32, i32
  }
  func.func @transform_1(%arg0: i32, %arg1: i32) -> (i32, i32) {
    %c2_i32 = arith.constant 2 : i32
    %0 = arith.muli %arg0, %c2_i32 : i32
    %1 = arith.addi %0, %arg1 : i32
    %c0_i32 = arith.constant 0 : i32
    %c0_i32_0 = arith.constant 0 : i32
    return %1, %c0_i32 : i32, i32
  }
  func.func @transform_2(%arg0: i32, %arg1: i32) -> (i32, i32) {
    %c2_i32 = arith.constant 2 : i32
    %0 = arith.muli %arg0, %c2_i32 : i32
    %c1_i32 = arith.constant 1 : i32
    %1 = arith.subi %c1_i32, %arg1 : i32
    %2 = arith.addi %0, %1 : i32
    %c0_i32 = arith.constant 0 : i32
    %c0_i32_0 = arith.constant 0 : i32
    return %2, %c0_i32 : i32, i32
  }
  func.func @transform_3(%arg0: i32, %arg1: i32) -> (i32, i32) {
    %c0_i32 = arith.constant 0 : i32
    %c0_i32_0 = arith.constant 0 : i32
    %c0_i32_1 = arith.constant 0 : i32
    return %c0_i32, %c0_i32_0 : i32, i32
  }
  func.func @transform_4(%arg0: i32, %arg1: i32) -> (i32, i32) {
    %c0_i32 = arith.constant 0 : i32
    %c0_i32_0 = arith.constant 0 : i32
    %c0_i32_1 = arith.constant 0 : i32
    return %c0_i32, %c0_i32_0 : i32, i32
  }
  func.func @transform_5(%arg0: i32, %arg1: i32) -> (i32, i32) {
    %c0_i32 = arith.constant 0 : i32
    %c0_i32_0 = arith.constant 0 : i32
    %c0_i32_1 = arith.constant 0 : i32
    return %c0_i32, %c0_i32_0 : i32, i32
  }
  func.func @transform_6(%arg0: i32, %arg1: i32) -> (i32, i32) {
    %c0_i32 = arith.constant 0 : i32
    %c0_i32_0 = arith.constant 0 : i32
    return %arg0, %c0_i32 : i32, i32
  }
  func.func @transform_7(%arg0: i32, %arg1: i32) -> (i32, i32) {
    %c0_i32 = arith.constant 0 : i32
    %c0_i32_0 = arith.constant 0 : i32
    %c0_i32_1 = arith.constant 0 : i32
    return %c0_i32, %c0_i32_0 : i32, i32
  }
  func.func @transform_8(%arg0: i32, %arg1: i32) -> (i32, i32) {
    %c0_i32 = arith.constant 0 : i32
    %c0_i32_0 = arith.constant 0 : i32
    %c0_i32_1 = arith.constant 0 : i32
    return %c0_i32, %c0_i32_0 : i32, i32
  }
  func.func @transform_9(%arg0: i32, %arg1: i32) -> (i32, i32) {
    %c0_i32 = arith.constant 0 : i32
    %c0_i32_0 = arith.constant 0 : i32
    %c0_i32_1 = arith.constant 0 : i32
    return %c0_i32, %c0_i32_0 : i32, i32
  }
  func.func @transform_10(%arg0: i32, %arg1: i32) -> (i32, i32) {
    %c0_i32 = arith.constant 0 : i32
    %c0_i32_0 = arith.constant 0 : i32
    return %arg0, %c0_i32 : i32, i32
  }
  func.func @transform_11(%arg0: i32, %arg1: i32) -> (i32, i32, i32) {
    %c0_i32 = arith.constant 0 : i32
    %c0_i32_0 = arith.constant 0 : i32
    return %arg1, %arg0, %c0_i32 : i32, i32, i32
  }
  func.func @transform_12(%arg0: i32, %arg1: i32) -> (i32, i32, i32) {
    %c1_i32 = arith.constant 1 : i32
    %0 = arith.subi %c1_i32, %arg1 : i32
    %c0_i32 = arith.constant 0 : i32
    %c0_i32_0 = arith.constant 0 : i32
    return %0, %arg0, %c0_i32 : i32, i32, i32
  }
  func.func @transform_13(%arg0: i32, %arg1: i32) -> (i32, i32) {
    %c0_i32 = arith.constant 0 : i32
    %c0_i32_0 = arith.constant 0 : i32
    return %arg0, %c0_i32 : i32, i32
  }
  func.func @transform_14(%arg0: i32, %arg1: i32) -> (i32, i32) {
    %c0_i32 = arith.constant 0 : i32
    %c0_i32_0 = arith.constant 0 : i32
    return %arg0, %c0_i32 : i32, i32
  }
}

module attributes {stable_mosaic.version = 11 : i64} {
  func.func @_bigru_kernel(%arg0: i32, %arg1: i32, %arg2: memref<8x128xi32, #tpu.memory_space<vmem>>, %arg3: memref<32x16xbf16, #tpu.memory_space<vmem>>, %arg4: memref<32x16xbf16, #tpu.memory_space<vmem>>, %arg5: memref<16x384xbf16, #tpu.memory_space<vmem>>, %arg6: memref<1x384xf32, #tpu.memory_space<vmem>>, %arg7: memref<128x384xbf16, #tpu.memory_space<vmem>>, %arg8: memref<8x128xf32, #tpu.memory_space<vmem>>, %arg9: memref<16x384xbf16, #tpu.memory_space<vmem>>, %arg10: memref<1x384xf32, #tpu.memory_space<vmem>>, %arg11: memref<128x384xbf16, #tpu.memory_space<vmem>>, %arg12: memref<8x128xf32, #tpu.memory_space<vmem>>, %arg13: memref<4x8x128xf32, #tpu.memory_space<vmem>>, %arg14: memref<4x8x128xf32, #tpu.memory_space<vmem>>, %arg15: memref<8x128xf32, #tpu.memory_space<vmem>>, %arg16: memref<8x128xf32, #tpu.memory_space<vmem>>, %arg17: memref<8x128xf32, #tpu.memory_space<vmem>>, %arg18: memref<8x128xf32, #tpu.memory_space<vmem>>, %arg19: memref<32x384xf32, #tpu.memory_space<vmem>>, %arg20: memref<32x384xf32, #tpu.memory_space<vmem>>) attributes {dimension_semantics = [#tpu.dimension_semantics<parallel>, #tpu.dimension_semantics<arbitrary>], iteration_bounds = array<i64: 1, 2>, scalar_prefetch = 0 : i64, scratch_operands = 4 : i64, tpu.core_type = #tpu.core_type<tc>, window_params = [{transform_indices = @transform_0, window_bounds = array<i64: 8, 128>}, {transform_indices = @transform_1, window_bounds = array<i64: 32, 16>}, {transform_indices = @transform_2, window_bounds = array<i64: 32, 16>}, {pipeline_mode = #tpu.pipeline_mode<synchronous>, transform_indices = @transform_3, window_bounds = array<i64: 16, 384>}, {pipeline_mode = #tpu.pipeline_mode<synchronous>, transform_indices = @transform_4, window_bounds = array<i64: 1, 384>}, {pipeline_mode = #tpu.pipeline_mode<synchronous>, transform_indices = @transform_5, window_bounds = array<i64: 128, 384>}, {transform_indices = @transform_6, window_bounds = array<i64: 8, 128>}, {pipeline_mode = #tpu.pipeline_mode<synchronous>, transform_indices = @transform_7, window_bounds = array<i64: 16, 384>}, {pipeline_mode = #tpu.pipeline_mode<synchronous>, transform_indices = @transform_8, window_bounds = array<i64: 1, 384>}, {pipeline_mode = #tpu.pipeline_mode<synchronous>, transform_indices = @transform_9, window_bounds = array<i64: 128, 384>}, {transform_indices = @transform_10, window_bounds = array<i64: 8, 128>}, {transform_indices = @transform_11, window_bounds = array<i64: 4, 8, 128>}, {transform_indices = @transform_12, window_bounds = array<i64: 4, 8, 128>}, {transform_indices = @transform_13, window_bounds = array<i64: 8, 128>}, {transform_indices = @transform_14, window_bounds = array<i64: 8, 128>}]} {
    %c0_i32 = arith.constant 0 : i32
    %0 = arith.cmpi eq, %arg1, %c0_i32 : i32
    %1 = arith.extui %0 : i1 to i32
    %c0_i32_0 = arith.constant 0 : i32
    %2 = arith.cmpi ne, %1, %c0_i32_0 : i32
    scf.if %2 {
      %cst_118 = arith.constant 0.000000e+00 : f32
      %375 = vector.broadcast %cst_118 : f32 to vector<8x128xf32>
      %c0_119 = arith.constant 0 : index
      %c0_120 = arith.constant 0 : index
      %376 = vector.load %arg17[%c0_119, %c0_120] : memref<8x128xf32, #tpu.memory_space<vmem>>, vector<8x128xf32>
      tpu.vector_store %arg17[%c0_119, %c0_120], %375 {strides = array<i32>} : memref<8x128xf32, #tpu.memory_space<vmem>>, vector<8x128xf32>,
      %cst_121 = arith.constant 0.000000e+00 : f32
      %377 = vector.broadcast %cst_121 : f32 to vector<8x128xf32>
      %c0_122 = arith.constant 0 : index
      %c0_123 = arith.constant 0 : index
      %378 = vector.load %arg18[%c0_122, %c0_123] : memref<8x128xf32, #tpu.memory_space<vmem>>, vector<8x128xf32>
      tpu.vector_store %arg18[%c0_122, %c0_123], %377 {strides = array<i32>} : memref<8x128xf32, #tpu.memory_space<vmem>>, vector<8x128xf32>,
    } else {
    }
    %c0 = arith.constant 0 : index
    %c0_1 = arith.constant 0 : index
    %3 = vector.load %arg3[%c0, %c0_1] : memref<32x16xbf16, #tpu.memory_space<vmem>>, vector<32x16xbf16>
    %c0_2 = arith.constant 0 : index
    %c0_3 = arith.constant 0 : index
    %4 = vector.load %arg5[%c0_2, %c0_3] : memref<16x384xbf16, #tpu.memory_space<vmem>>, vector<16x384xbf16>
    %cst = arith.constant dense<0.000000e+00> : vector<32x384xf32>
    %5 = tpu.matmul %3, %4, %cst {dimension_numbers = #tpu.dot_dimension_numbers<[1], [0], [0], [1], [0, 0, 1, 1], [], []>} : vector<32x16xbf16>, vector<16x384xbf16>, vector<32x384xf32> -> vector<32x384xf32>
    %c0_4 = arith.constant 0 : index
    %c0_5 = arith.constant 0 : index
    %6 = vector.load %arg6[%c0_4, %c0_5] : memref<1x384xf32, #tpu.memory_space<vmem>>, vector<1x384xf32>
    %7 = vector.broadcast %6 : vector<1x384xf32> to vector<32x384xf32>
    %8 = arith.addf %5, %7 : vector<32x384xf32>
    %c0_6 = arith.constant 0 : index
    %c0_7 = arith.constant 0 : index
    %9 = vector.load %arg19[%c0_6, %c0_7] : memref<32x384xf32, #tpu.memory_space<vmem>>, vector<32x384xf32>
    tpu.vector_store %arg19[%c0_6, %c0_7], %8 {strides = array<i32>} : memref<32x384xf32, #tpu.memory_space<vmem>>, vector<32x384xf32>,
    %c0_8 = arith.constant 0 : index
    %c0_9 = arith.constant 0 : index
    %10 = vector.load %arg4[%c0_8, %c0_9] : memref<32x16xbf16, #tpu.memory_space<vmem>>, vector<32x16xbf16>
    %c0_10 = arith.constant 0 : index
    %c0_11 = arith.constant 0 : index
    %11 = vector.load %arg9[%c0_10, %c0_11] : memref<16x384xbf16, #tpu.memory_space<vmem>>, vector<16x384xbf16>
    %cst_12 = arith.constant dense<0.000000e+00> : vector<32x384xf32>
    %12 = tpu.matmul %10, %11, %cst_12 {dimension_numbers = #tpu.dot_dimension_numbers<[1], [0], [0], [1], [0, 0, 1, 1], [], []>} : vector<32x16xbf16>, vector<16x384xbf16>, vector<32x384xf32> -> vector<32x384xf32>
    %c0_13 = arith.constant 0 : index
    %c0_14 = arith.constant 0 : index
    %13 = vector.load %arg10[%c0_13, %c0_14] : memref<1x384xf32, #tpu.memory_space<vmem>>, vector<1x384xf32>
    %14 = vector.broadcast %13 : vector<1x384xf32> to vector<32x384xf32>
    %15 = arith.addf %12, %14 : vector<32x384xf32>
    %c0_15 = arith.constant 0 : index
    %c0_16 = arith.constant 0 : index
    %16 = vector.load %arg20[%c0_15, %c0_16] : memref<32x384xf32, #tpu.memory_space<vmem>>, vector<32x384xf32>
    tpu.vector_store %arg20[%c0_15, %c0_16], %15 {strides = array<i32>} : memref<32x384xf32, #tpu.memory_space<vmem>>, vector<32x384xf32>,
    %c0_17 = arith.constant 0 : index
    %c0_18 = arith.constant 0 : index
    %17 = vector.load %arg2[%c0_17, %c0_18] : memref<8x128xi32, #tpu.memory_space<vmem>>, vector<8x128xi32>
    %c0_19 = arith.constant 0 : index
    %c0_20 = arith.constant 0 : index
    %18 = vector.load %arg7[%c0_19, %c0_20] : memref<128x384xbf16, #tpu.memory_space<vmem>>, vector<128x384xbf16>
    %c0_21 = arith.constant 0 : index
    %c0_22 = arith.constant 0 : index
    %19 = vector.load %arg11[%c0_21, %c0_22] : memref<128x384xbf16, #tpu.memory_space<vmem>>, vector<128x384xbf16>
    %c0_23 = arith.constant 0 : index
    %c0_24 = arith.constant 0 : index
    %20 = vector.load %arg8[%c0_23, %c0_24] : memref<8x128xf32, #tpu.memory_space<vmem>>, vector<8x128xf32>
    %c0_25 = arith.constant 0 : index
    %c0_26 = arith.constant 0 : index
    %21 = vector.load %arg12[%c0_25, %c0_26] : memref<8x128xf32, #tpu.memory_space<vmem>>, vector<8x128xf32>
    %c4_i32 = arith.constant 4 : i32
    %22 = arith.muli %arg1, %c4_i32 : i32
    %c1_i32 = arith.constant 1 : i32
    %23 = arith.subi %c1_i32, %arg1 : i32
    %c4_i32_27 = arith.constant 4 : i32
    %24 = arith.muli %23, %c4_i32_27 : i32
    %c0_28 = arith.constant 0 : index
    %c0_29 = arith.constant 0 : index
    %25 = vector.load %arg17[%c0_28, %c0_29] : memref<8x128xf32, #tpu.memory_space<vmem>>, vector<8x128xf32>
    %c0_30 = arith.constant 0 : index
    %c0_31 = arith.constant 0 : index
    %26 = vector.load %arg18[%c0_30, %c0_31] : memref<8x128xf32, #tpu.memory_space<vmem>>, vector<8x128xf32>
    %c0_i32_32 = arith.constant 0 : i32
    %c3_i32 = arith.constant 3 : i32
    %27 = arith.subi %c3_i32, %c0_i32_32 : i32
    %c8_i32 = arith.constant 8 : i32
    %28 = arith.muli %c0_i32_32, %c8_i32 : i32
    %29 = tpu.assume_multiple %28, 8 : i32
    %30 = arith.index_cast %29 : i32 to index
    %c0_33 = arith.constant 0 : index
    %31 = vector.load %arg19[%30, %c0_33] : memref<32x384xf32, #tpu.memory_space<vmem>>, vector<8x384xf32>
    %32 = arith.truncf %25 : vector<8x128xf32> to vector<8x128xbf16>
    %cst_34 = arith.constant dense<0.000000e+00> : vector<8x384xf32>
    %33 = tpu.matmul %32, %18, %cst_34 {dimension_numbers = #tpu.dot_dimension_numbers<[1], [0], [0], [1], [0, 0, 1, 1], [], []>} : vector<8x128xbf16>, vector<128x384xbf16>, vector<8x384xf32> -> vector<8x384xf32>
    %34 = vector.extract_strided_slice %31 {offsets = [0, 0], sizes = [8, 128], strides = [1, 1]} : vector<8x384xf32> to vector<8x128xf32>
    %35 = vector.extract_strided_slice %33 {offsets = [0, 0], sizes = [8, 128], strides = [1, 1]} : vector<8x384xf32> to vector<8x128xf32>
    %36 = arith.addf %34, %35 : vector<8x128xf32>
    %37 = arith.negf %36 : vector<8x128xf32>
    %38 = math.exp %37 : vector<8x128xf32>
    %cst_35 = arith.constant 1.000000e+00 : f32
    %39 = vector.broadcast %cst_35 : f32 to vector<8x128xf32>
    %40 = arith.addf %39, %38 : vector<8x128xf32>
    %41 = arith.divf %39, %40 : vector<8x128xf32>
    %42 = vector.extract_strided_slice %31 {offsets = [0, 128], sizes = [8, 128], strides = [1, 1]} : vector<8x384xf32> to vector<8x128xf32>
    %43 = vector.extract_strided_slice %33 {offsets = [0, 128], sizes = [8, 128], strides = [1, 1]} : vector<8x384xf32> to vector<8x128xf32>
    %44 = arith.addf %42, %43 : vector<8x128xf32>
    %45 = arith.negf %44 : vector<8x128xf32>
    %46 = math.exp %45 : vector<8x128xf32>
    %cst_36 = arith.constant 1.000000e+00 : f32
    %47 = vector.broadcast %cst_36 : f32 to vector<8x128xf32>
    %48 = arith.addf %47, %46 : vector<8x128xf32>
    %49 = arith.divf %47, %48 : vector<8x128xf32>
    %50 = vector.extract_strided_slice %31 {offsets = [0, 256], sizes = [8, 128], strides = [1, 1]} : vector<8x384xf32> to vector<8x128xf32>
    %51 = vector.extract_strided_slice %33 {offsets = [0, 256], sizes = [8, 128], strides = [1, 1]} : vector<8x384xf32> to vector<8x128xf32>
    %52 = arith.addf %51, %20 : vector<8x128xf32>
    %53 = arith.mulf %41, %52 : vector<8x128xf32>
    %54 = arith.addf %50, %53 : vector<8x128xf32>
    %55 = math.tanh %54 : vector<8x128xf32>
    %cst_37 = arith.constant 1.000000e+00 : f32
    %56 = vector.broadcast %cst_37 : f32 to vector<8x128xf32>
    %57 = arith.subf %56, %49 : vector<8x128xf32>
    %58 = arith.mulf %57, %55 : vector<8x128xf32>
    %59 = arith.mulf %49, %25 : vector<8x128xf32>
    %60 = arith.addf %58, %59 : vector<8x128xf32>
    %61 = arith.addi %22, %c0_i32_32 : i32
    %62 = vector.broadcast %61 : i32 to vector<8x128xi32>
    %63 = arith.cmpi slt, %62, %17 : vector<8x128xi32>
    %cst_38 = arith.constant 0.000000e+00 : f32
    %64 = vector.broadcast %cst_38 : f32 to vector<8x128xf32>
    %65 = arith.select %63, %60, %64 : vector<8x128xi1>, vector<8x128xf32>
    %66 = arith.index_cast %c0_i32_32 : i32 to index
    %c0_39 = arith.constant 0 : index
    %c0_40 = arith.constant 0 : index
    %67 = vector.load %arg13[%66, %c0_39, %c0_40] : memref<4x8x128xf32, #tpu.memory_space<vmem>>, vector<1x8x128xf32>
    %68 = vector.shape_cast %67 : vector<1x8x128xf32> to vector<8x128xf32>
    %69 = vector.shape_cast %65 : vector<8x128xf32> to vector<1x8x128xf32>
    tpu.vector_store %arg13[%66, %c0_39, %c0_40], %69 {strides = array<i32>} : memref<4x8x128xf32, #tpu.memory_space<vmem>>, vector<1x8x128xf32>,
    %70 = arith.select %63, %60, %25 : vector<8x128xi1>, vector<8x128xf32>
    %c8_i32_41 = arith.constant 8 : i32
    %71 = arith.muli %27, %c8_i32_41 : i32
    %72 = tpu.assume_multiple %71, 8 : i32
    %73 = arith.index_cast %72 : i32 to index
    %c0_42 = arith.constant 0 : index
    %74 = vector.load %arg20[%73, %c0_42] : memref<32x384xf32, #tpu.memory_space<vmem>>, vector<8x384xf32>
    %75 = arith.truncf %26 : vector<8x128xf32> to vector<8x128xbf16>
    %cst_43 = arith.constant dense<0.000000e+00> : vector<8x384xf32>
    %76 = tpu.matmul %75, %19, %cst_43 {dimension_numbers = #tpu.dot_dimension_numbers<[1], [0], [0], [1], [0, 0, 1, 1], [], []>} : vector<8x128xbf16>, vector<128x384xbf16>, vector<8x384xf32> -> vector<8x384xf32>
    %77 = vector.extract_strided_slice %74 {offsets = [0, 0], sizes = [8, 128], strides = [1, 1]} : vector<8x384xf32> to vector<8x128xf32>
    %78 = vector.extract_strided_slice %76 {offsets = [0, 0], sizes = [8, 128], strides = [1, 1]} : vector<8x384xf32> to vector<8x128xf32>
    %79 = arith.addf %77, %78 : vector<8x128xf32>
    %80 = arith.negf %79 : vector<8x128xf32>
    %81 = math.exp %80 : vector<8x128xf32>
    %cst_44 = arith.constant 1.000000e+00 : f32
    %82 = vector.broadcast %cst_44 : f32 to vector<8x128xf32>
    %83 = arith.addf %82, %81 : vector<8x128xf32>
    %84 = arith.divf %82, %83 : vector<8x128xf32>
    %85 = vector.extract_strided_slice %74 {offsets = [0, 128], sizes = [8, 128], strides = [1, 1]} : vector<8x384xf32> to vector<8x128xf32>
    %86 = vector.extract_strided_slice %76 {offsets = [0, 128], sizes = [8, 128], strides = [1, 1]} : vector<8x384xf32> to vector<8x128xf32>
    %87 = arith.addf %85, %86 : vector<8x128xf32>
    %88 = arith.negf %87 : vector<8x128xf32>
    %89 = math.exp %88 : vector<8x128xf32>
    %cst_45 = arith.constant 1.000000e+00 : f32
    %90 = vector.broadcast %cst_45 : f32 to vector<8x128xf32>
    %91 = arith.addf %90, %89 : vector<8x128xf32>
    %92 = arith.divf %90, %91 : vector<8x128xf32>
    %93 = vector.extract_strided_slice %74 {offsets = [0, 256], sizes = [8, 128], strides = [1, 1]} : vector<8x384xf32> to vector<8x128xf32>
    %94 = vector.extract_strided_slice %76 {offsets = [0, 256], sizes = [8, 128], strides = [1, 1]} : vector<8x384xf32> to vector<8x128xf32>
    %95 = arith.addf %94, %21 : vector<8x128xf32>
    %96 = arith.mulf %84, %95 : vector<8x128xf32>
    %97 = arith.addf %93, %96 : vector<8x128xf32>
    %98 = math.tanh %97 : vector<8x128xf32>
    %cst_46 = arith.constant 1.000000e+00 : f32
    %99 = vector.broadcast %cst_46 : f32 to vector<8x128xf32>
    %100 = arith.subf %99, %92 : vector<8x128xf32>
    %101 = arith.mulf %100, %98 : vector<8x128xf32>
    %102 = arith.mulf %92, %26 : vector<8x128xf32>
    %103 = arith.addf %101, %102 : vector<8x128xf32>
    %104 = arith.addi %24, %27 : i32
    %105 = vector.broadcast %104 : i32 to vector<8x128xi32>
    %106 = arith.cmpi slt, %105, %17 : vector<8x128xi32>
    %cst_47 = arith.constant 0.000000e+00 : f32
    %107 = vector.broadcast %cst_47 : f32 to vector<8x128xf32>
    %108 = arith.select %106, %103, %107 : vector<8x128xi1>, vector<8x128xf32>
    %109 = arith.index_cast %27 : i32 to index
    %c0_48 = arith.constant 0 : index
    %c0_49 = arith.constant 0 : index
    %110 = vector.load %arg14[%109, %c0_48, %c0_49] : memref<4x8x128xf32, #tpu.memory_space<vmem>>, vector<1x8x128xf32>
    %111 = vector.shape_cast %110 : vector<1x8x128xf32> to vector<8x128xf32>
    %112 = vector.shape_cast %108 : vector<8x128xf32> to vector<1x8x128xf32>
    tpu.vector_store %arg14[%109, %c0_48, %c0_49], %112 {strides = array<i32>} : memref<4x8x128xf32, #tpu.memory_space<vmem>>, vector<1x8x128xf32>,
    %c1_i32_50 = arith.constant 1 : i32
    %c3_i32_51 = arith.constant 3 : i32
    %113 = arith.subi %c3_i32_51, %c1_i32_50 : i32
    %c8_i32_52 = arith.constant 8 : i32
    %114 = arith.muli %c1_i32_50, %c8_i32_52 : i32
    %115 = tpu.assume_multiple %114, 8 : i32
    %116 = arith.index_cast %115 : i32 to index
    %c0_53 = arith.constant 0 : index
    %117 = vector.load %arg19[%116, %c0_53] : memref<32x384xf32, #tpu.memory_space<vmem>>, vector<8x384xf32>
    %118 = arith.truncf %70 : vector<8x128xf32> to vector<8x128xbf16>
    %cst_54 = arith.constant dense<0.000000e+00> : vector<8x384xf32>
    %119 = tpu.matmul %118, %18, %cst_54 {dimension_numbers = #tpu.dot_dimension_numbers<[1], [0], [0], [1], [0, 0, 1, 1], [], []>} : vector<8x128xbf16>, vector<128x384xbf16>, vector<8x384xf32> -> vector<8x384xf32>
    %120 = vector.extract_strided_slice %117 {offsets = [0, 0], sizes = [8, 128], strides = [1, 1]} : vector<8x384xf32> to vector<8x128xf32>
    %121 = vector.extract_strided_slice %119 {offsets = [0, 0], sizes = [8, 128], strides = [1, 1]} : vector<8x384xf32> to vector<8x128xf32>
    %122 = arith.addf %120, %121 : vector<8x128xf32>
    %123 = arith.negf %122 : vector<8x128xf32>
    %124 = math.exp %123 : vector<8x128xf32>
    %cst_55 = arith.constant 1.000000e+00 : f32
    %125 = vector.broadcast %cst_55 : f32 to vector<8x128xf32>
    %126 = arith.addf %125, %124 : vector<8x128xf32>
    %127 = arith.divf %125, %126 : vector<8x128xf32>
    %128 = vector.extract_strided_slice %117 {offsets = [0, 128], sizes = [8, 128], strides = [1, 1]} : vector<8x384xf32> to vector<8x128xf32>
    %129 = vector.extract_strided_slice %119 {offsets = [0, 128], sizes = [8, 128], strides = [1, 1]} : vector<8x384xf32> to vector<8x128xf32>
    %130 = arith.addf %128, %129 : vector<8x128xf32>
    %131 = arith.negf %130 : vector<8x128xf32>
    %132 = math.exp %131 : vector<8x128xf32>
    %cst_56 = arith.constant 1.000000e+00 : f32
    %133 = vector.broadcast %cst_56 : f32 to vector<8x128xf32>
    %134 = arith.addf %133, %132 : vector<8x128xf32>
    %135 = arith.divf %133, %134 : vector<8x128xf32>
    %136 = vector.extract_strided_slice %117 {offsets = [0, 256], sizes = [8, 128], strides = [1, 1]} : vector<8x384xf32> to vector<8x128xf32>
    %137 = vector.extract_strided_slice %119 {offsets = [0, 256], sizes = [8, 128], strides = [1, 1]} : vector<8x384xf32> to vector<8x128xf32>
    %138 = arith.addf %137, %20 : vector<8x128xf32>
    %139 = arith.mulf %127, %138 : vector<8x128xf32>
    %140 = arith.addf %136, %139 : vector<8x128xf32>
    %141 = math.tanh %140 : vector<8x128xf32>
    %cst_57 = arith.constant 1.000000e+00 : f32
    %142 = vector.broadcast %cst_57 : f32 to vector<8x128xf32>
    %143 = arith.subf %142, %135 : vector<8x128xf32>
    %144 = arith.mulf %143, %141 : vector<8x128xf32>
    %145 = arith.mulf %135, %70 : vector<8x128xf32>
    %146 = arith.addf %144, %145 : vector<8x128xf32>
    %147 = arith.addi %22, %c1_i32_50 : i32
    %148 = vector.broadcast %147 : i32 to vector<8x128xi32>
    %149 = arith.cmpi slt, %148, %17 : vector<8x128xi32>
    %cst_58 = arith.constant 0.000000e+00 : f32
    %150 = vector.broadcast %cst_58 : f32 to vector<8x128xf32>
    %151 = arith.select %149, %146, %150 : vector<8x128xi1>, vector<8x128xf32>
    %152 = arith.index_cast %c1_i32_50 : i32 to index
    %c0_59 = arith.constant 0 : index
    %c0_60 = arith.constant 0 : index
    %153 = vector.load %arg13[%152, %c0_59, %c0_60] : memref<4x8x128xf32, #tpu.memory_space<vmem>>, vector<1x8x128xf32>
    %154 = vector.shape_cast %153 : vector<1x8x128xf32> to vector<8x128xf32>
    %155 = vector.shape_cast %151 : vector<8x128xf32> to vector<1x8x128xf32>
    tpu.vector_store %arg13[%152, %c0_59, %c0_60], %155 {strides = array<i32>} : memref<4x8x128xf32, #tpu.memory_space<vmem>>, vector<1x8x128xf32>,
    %156 = arith.select %149, %146, %70 : vector<8x128xi1>, vector<8x128xf32>
    %c8_i32_61 = arith.constant 8 : i32
    %157 = arith.muli %113, %c8_i32_61 : i32
    %158 = tpu.assume_multiple %157, 8 : i32
    %159 = arith.index_cast %158 : i32 to index
    %c0_62 = arith.constant 0 : index
    %160 = vector.load %arg20[%159, %c0_62] : memref<32x384xf32, #tpu.memory_space<vmem>>, vector<8x384xf32>
    %161 = arith.truncf %108 : vector<8x128xf32> to vector<8x128xbf16>
    %cst_63 = arith.constant dense<0.000000e+00> : vector<8x384xf32>
    %162 = tpu.matmul %161, %19, %cst_63 {dimension_numbers = #tpu.dot_dimension_numbers<[1], [0], [0], [1], [0, 0, 1, 1], [], []>} : vector<8x128xbf16>, vector<128x384xbf16>, vector<8x384xf32> -> vector<8x384xf32>
    %163 = vector.extract_strided_slice %160 {offsets = [0, 0], sizes = [8, 128], strides = [1, 1]} : vector<8x384xf32> to vector<8x128xf32>
    %164 = vector.extract_strided_slice %162 {offsets = [0, 0], sizes = [8, 128], strides = [1, 1]} : vector<8x384xf32> to vector<8x128xf32>
    %165 = arith.addf %163, %164 : vector<8x128xf32>
    %166 = arith.negf %165 : vector<8x128xf32>
    %167 = math.exp %166 : vector<8x128xf32>
    %cst_64 = arith.constant 1.000000e+00 : f32
    %168 = vector.broadcast %cst_64 : f32 to vector<8x128xf32>
    %169 = arith.addf %168, %167 : vector<8x128xf32>
    %170 = arith.divf %168, %169 : vector<8x128xf32>
    %171 = vector.extract_strided_slice %160 {offsets = [0, 128], sizes = [8, 128], strides = [1, 1]} : vector<8x384xf32> to vector<8x128xf32>
    %172 = vector.extract_strided_slice %162 {offsets = [0, 128], sizes = [8, 128], strides = [1, 1]} : vector<8x384xf32> to vector<8x128xf32>
    %173 = arith.addf %171, %172 : vector<8x128xf32>
    %174 = arith.negf %173 : vector<8x128xf32>
    %175 = math.exp %174 : vector<8x128xf32>
    %cst_65 = arith.constant 1.000000e+00 : f32
    %176 = vector.broadcast %cst_65 : f32 to vector<8x128xf32>
    %177 = arith.addf %176, %175 : vector<8x128xf32>
    %178 = arith.divf %176, %177 : vector<8x128xf32>
    %179 = vector.extract_strided_slice %160 {offsets = [0, 256], sizes = [8, 128], strides = [1, 1]} : vector<8x384xf32> to vector<8x128xf32>
    %180 = vector.extract_strided_slice %162 {offsets = [0, 256], sizes = [8, 128], strides = [1, 1]} : vector<8x384xf32> to vector<8x128xf32>
    %181 = arith.addf %180, %21 : vector<8x128xf32>
    %182 = arith.mulf %170, %181 : vector<8x128xf32>
    %183 = arith.addf %179, %182 : vector<8x128xf32>
    %184 = math.tanh %183 : vector<8x128xf32>
    %cst_66 = arith.constant 1.000000e+00 : f32
    %185 = vector.broadcast %cst_66 : f32 to vector<8x128xf32>
    %186 = arith.subf %185, %178 : vector<8x128xf32>
    %187 = arith.mulf %186, %184 : vector<8x128xf32>
    %188 = arith.mulf %178, %108 : vector<8x128xf32>
    %189 = arith.addf %187, %188 : vector<8x128xf32>
    %190 = arith.addi %24, %113 : i32
    %191 = vector.broadcast %190 : i32 to vector<8x128xi32>
    %192 = arith.cmpi slt, %191, %17 : vector<8x128xi32>
    %cst_67 = arith.constant 0.000000e+00 : f32
    %193 = vector.broadcast %cst_67 : f32 to vector<8x128xf32>
    %194 = arith.select %192, %189, %193 : vector<8x128xi1>, vector<8x128xf32>
    %195 = arith.index_cast %113 : i32 to index
    %c0_68 = arith.constant 0 : index
    %c0_69 = arith.constant 0 : index
    %196 = vector.load %arg14[%195, %c0_68, %c0_69] : memref<4x8x128xf32, #tpu.memory_space<vmem>>, vector<1x8x128xf32>
    %197 = vector.shape_cast %196 : vector<1x8x128xf32> to vector<8x128xf32>
    %198 = vector.shape_cast %194 : vector<8x128xf32> to vector<1x8x128xf32>
    tpu.vector_store %arg14[%195, %c0_68, %c0_69], %198 {strides = array<i32>} : memref<4x8x128xf32, #tpu.memory_space<vmem>>, vector<1x8x128xf32>,
    %c2_i32 = arith.constant 2 : i32
    %c3_i32_70 = arith.constant 3 : i32
    %199 = arith.subi %c3_i32_70, %c2_i32 : i32
    %c8_i32_71 = arith.constant 8 : i32
    %200 = arith.muli %c2_i32, %c8_i32_71 : i32
    %201 = tpu.assume_multiple %200, 8 : i32
    %202 = arith.index_cast %201 : i32 to index
    %c0_72 = arith.constant 0 : index
    %203 = vector.load %arg19[%202, %c0_72] : memref<32x384xf32, #tpu.memory_space<vmem>>, vector<8x384xf32>
    %204 = arith.truncf %156 : vector<8x128xf32> to vector<8x128xbf16>
    %cst_73 = arith.constant dense<0.000000e+00> : vector<8x384xf32>
    %205 = tpu.matmul %204, %18, %cst_73 {dimension_numbers = #tpu.dot_dimension_numbers<[1], [0], [0], [1], [0, 0, 1, 1], [], []>} : vector<8x128xbf16>, vector<128x384xbf16>, vector<8x384xf32> -> vector<8x384xf32>
    %206 = vector.extract_strided_slice %203 {offsets = [0, 0], sizes = [8, 128], strides = [1, 1]} : vector<8x384xf32> to vector<8x128xf32>
    %207 = vector.extract_strided_slice %205 {offsets = [0, 0], sizes = [8, 128], strides = [1, 1]} : vector<8x384xf32> to vector<8x128xf32>
    %208 = arith.addf %206, %207 : vector<8x128xf32>
    %209 = arith.negf %208 : vector<8x128xf32>
    %210 = math.exp %209 : vector<8x128xf32>
    %cst_74 = arith.constant 1.000000e+00 : f32
    %211 = vector.broadcast %cst_74 : f32 to vector<8x128xf32>
    %212 = arith.addf %211, %210 : vector<8x128xf32>
    %213 = arith.divf %211, %212 : vector<8x128xf32>
    %214 = vector.extract_strided_slice %203 {offsets = [0, 128], sizes = [8, 128], strides = [1, 1]} : vector<8x384xf32> to vector<8x128xf32>
    %215 = vector.extract_strided_slice %205 {offsets = [0, 128], sizes = [8, 128], strides = [1, 1]} : vector<8x384xf32> to vector<8x128xf32>
    %216 = arith.addf %214, %215 : vector<8x128xf32>
    %217 = arith.negf %216 : vector<8x128xf32>
    %218 = math.exp %217 : vector<8x128xf32>
    %cst_75 = arith.constant 1.000000e+00 : f32
    %219 = vector.broadcast %cst_75 : f32 to vector<8x128xf32>
    %220 = arith.addf %219, %218 : vector<8x128xf32>
    %221 = arith.divf %219, %220 : vector<8x128xf32>
    %222 = vector.extract_strided_slice %203 {offsets = [0, 256], sizes = [8, 128], strides = [1, 1]} : vector<8x384xf32> to vector<8x128xf32>
    %223 = vector.extract_strided_slice %205 {offsets = [0, 256], sizes = [8, 128], strides = [1, 1]} : vector<8x384xf32> to vector<8x128xf32>
    %224 = arith.addf %223, %20 : vector<8x128xf32>
    %225 = arith.mulf %213, %224 : vector<8x128xf32>
    %226 = arith.addf %222, %225 : vector<8x128xf32>
    %227 = math.tanh %226 : vector<8x128xf32>
    %cst_76 = arith.constant 1.000000e+00 : f32
    %228 = vector.broadcast %cst_76 : f32 to vector<8x128xf32>
    %229 = arith.subf %228, %221 : vector<8x128xf32>
    %230 = arith.mulf %229, %227 : vector<8x128xf32>
    %231 = arith.mulf %221, %156 : vector<8x128xf32>
    %232 = arith.addf %230, %231 : vector<8x128xf32>
    %233 = arith.addi %22, %c2_i32 : i32
    %234 = vector.broadcast %233 : i32 to vector<8x128xi32>
    %235 = arith.cmpi slt, %234, %17 : vector<8x128xi32>
    %cst_77 = arith.constant 0.000000e+00 : f32
    %236 = vector.broadcast %cst_77 : f32 to vector<8x128xf32>
    %237 = arith.select %235, %232, %236 : vector<8x128xi1>, vector<8x128xf32>
    %238 = arith.index_cast %c2_i32 : i32 to index
    %c0_78 = arith.constant 0 : index
    %c0_79 = arith.constant 0 : index
    %239 = vector.load %arg13[%238, %c0_78, %c0_79] : memref<4x8x128xf32, #tpu.memory_space<vmem>>, vector<1x8x128xf32>
    %240 = vector.shape_cast %239 : vector<1x8x128xf32> to vector<8x128xf32>
    %241 = vector.shape_cast %237 : vector<8x128xf32> to vector<1x8x128xf32>
    tpu.vector_store %arg13[%238, %c0_78, %c0_79], %241 {strides = array<i32>} : memref<4x8x128xf32, #tpu.memory_space<vmem>>, vector<1x8x128xf32>,
    %242 = arith.select %235, %232, %156 : vector<8x128xi1>, vector<8x128xf32>
    %c8_i32_80 = arith.constant 8 : i32
    %243 = arith.muli %199, %c8_i32_80 : i32
    %244 = tpu.assume_multiple %243, 8 : i32
    %245 = arith.index_cast %244 : i32 to index
    %c0_81 = arith.constant 0 : index
    %246 = vector.load %arg20[%245, %c0_81] : memref<32x384xf32, #tpu.memory_space<vmem>>, vector<8x384xf32>
    %247 = arith.truncf %194 : vector<8x128xf32> to vector<8x128xbf16>
    %cst_82 = arith.constant dense<0.000000e+00> : vector<8x384xf32>
    %248 = tpu.matmul %247, %19, %cst_82 {dimension_numbers = #tpu.dot_dimension_numbers<[1], [0], [0], [1], [0, 0, 1, 1], [], []>} : vector<8x128xbf16>, vector<128x384xbf16>, vector<8x384xf32> -> vector<8x384xf32>
    %249 = vector.extract_strided_slice %246 {offsets = [0, 0], sizes = [8, 128], strides = [1, 1]} : vector<8x384xf32> to vector<8x128xf32>
    %250 = vector.extract_strided_slice %248 {offsets = [0, 0], sizes = [8, 128], strides = [1, 1]} : vector<8x384xf32> to vector<8x128xf32>
    %251 = arith.addf %249, %250 : vector<8x128xf32>
    %252 = arith.negf %251 : vector<8x128xf32>
    %253 = math.exp %252 : vector<8x128xf32>
    %cst_83 = arith.constant 1.000000e+00 : f32
    %254 = vector.broadcast %cst_83 : f32 to vector<8x128xf32>
    %255 = arith.addf %254, %253 : vector<8x128xf32>
    %256 = arith.divf %254, %255 : vector<8x128xf32>
    %257 = vector.extract_strided_slice %246 {offsets = [0, 128], sizes = [8, 128], strides = [1, 1]} : vector<8x384xf32> to vector<8x128xf32>
    %258 = vector.extract_strided_slice %248 {offsets = [0, 128], sizes = [8, 128], strides = [1, 1]} : vector<8x384xf32> to vector<8x128xf32>
    %259 = arith.addf %257, %258 : vector<8x128xf32>
    %260 = arith.negf %259 : vector<8x128xf32>
    %261 = math.exp %260 : vector<8x128xf32>
    %cst_84 = arith.constant 1.000000e+00 : f32
    %262 = vector.broadcast %cst_84 : f32 to vector<8x128xf32>
    %263 = arith.addf %262, %261 : vector<8x128xf32>
    %264 = arith.divf %262, %263 : vector<8x128xf32>
    %265 = vector.extract_strided_slice %246 {offsets = [0, 256], sizes = [8, 128], strides = [1, 1]} : vector<8x384xf32> to vector<8x128xf32>
    %266 = vector.extract_strided_slice %248 {offsets = [0, 256], sizes = [8, 128], strides = [1, 1]} : vector<8x384xf32> to vector<8x128xf32>
    %267 = arith.addf %266, %21 : vector<8x128xf32>
    %268 = arith.mulf %256, %267 : vector<8x128xf32>
    %269 = arith.addf %265, %268 : vector<8x128xf32>
    %270 = math.tanh %269 : vector<8x128xf32>
    %cst_85 = arith.constant 1.000000e+00 : f32
    %271 = vector.broadcast %cst_85 : f32 to vector<8x128xf32>
    %272 = arith.subf %271, %264 : vector<8x128xf32>
    %273 = arith.mulf %272, %270 : vector<8x128xf32>
    %274 = arith.mulf %264, %194 : vector<8x128xf32>
    %275 = arith.addf %273, %274 : vector<8x128xf32>
    %276 = arith.addi %24, %199 : i32
    %277 = vector.broadcast %276 : i32 to vector<8x128xi32>
    %278 = arith.cmpi slt, %277, %17 : vector<8x128xi32>
    %cst_86 = arith.constant 0.000000e+00 : f32
    %279 = vector.broadcast %cst_86 : f32 to vector<8x128xf32>
    %280 = arith.select %278, %275, %279 : vector<8x128xi1>, vector<8x128xf32>
    %281 = arith.index_cast %199 : i32 to index
    %c0_87 = arith.constant 0 : index
    %c0_88 = arith.constant 0 : index
    %282 = vector.load %arg14[%281, %c0_87, %c0_88] : memref<4x8x128xf32, #tpu.memory_space<vmem>>, vector<1x8x128xf32>
    %283 = vector.shape_cast %282 : vector<1x8x128xf32> to vector<8x128xf32>
    %284 = vector.shape_cast %280 : vector<8x128xf32> to vector<1x8x128xf32>
    tpu.vector_store %arg14[%281, %c0_87, %c0_88], %284 {strides = array<i32>} : memref<4x8x128xf32, #tpu.memory_space<vmem>>, vector<1x8x128xf32>,
    %c3_i32_89 = arith.constant 3 : i32
    %c3_i32_90 = arith.constant 3 : i32
    %285 = arith.subi %c3_i32_90, %c3_i32_89 : i32
    %c8_i32_91 = arith.constant 8 : i32
    %286 = arith.muli %c3_i32_89, %c8_i32_91 : i32
    %287 = tpu.assume_multiple %286, 8 : i32
    %288 = arith.index_cast %287 : i32 to index
    %c0_92 = arith.constant 0 : index
    %289 = vector.load %arg19[%288, %c0_92] : memref<32x384xf32, #tpu.memory_space<vmem>>, vector<8x384xf32>
    %290 = arith.truncf %242 : vector<8x128xf32> to vector<8x128xbf16>
    %cst_93 = arith.constant dense<0.000000e+00> : vector<8x384xf32>
    %291 = tpu.matmul %290, %18, %cst_93 {dimension_numbers = #tpu.dot_dimension_numbers<[1], [0], [0], [1], [0, 0, 1, 1], [], []>} : vector<8x128xbf16>, vector<128x384xbf16>, vector<8x384xf32> -> vector<8x384xf32>
    %292 = vector.extract_strided_slice %289 {offsets = [0, 0], sizes = [8, 128], strides = [1, 1]} : vector<8x384xf32> to vector<8x128xf32>
    %293 = vector.extract_strided_slice %291 {offsets = [0, 0], sizes = [8, 128], strides = [1, 1]} : vector<8x384xf32> to vector<8x128xf32>
    %294 = arith.addf %292, %293 : vector<8x128xf32>
    %295 = arith.negf %294 : vector<8x128xf32>
    %296 = math.exp %295 : vector<8x128xf32>
    %cst_94 = arith.constant 1.000000e+00 : f32
    %297 = vector.broadcast %cst_94 : f32 to vector<8x128xf32>
    %298 = arith.addf %297, %296 : vector<8x128xf32>
    %299 = arith.divf %297, %298 : vector<8x128xf32>
    %300 = vector.extract_strided_slice %289 {offsets = [0, 128], sizes = [8, 128], strides = [1, 1]} : vector<8x384xf32> to vector<8x128xf32>
    %301 = vector.extract_strided_slice %291 {offsets = [0, 128], sizes = [8, 128], strides = [1, 1]} : vector<8x384xf32> to vector<8x128xf32>
    %302 = arith.addf %300, %301 : vector<8x128xf32>
    %303 = arith.negf %302 : vector<8x128xf32>
    %304 = math.exp %303 : vector<8x128xf32>
    %cst_95 = arith.constant 1.000000e+00 : f32
    %305 = vector.broadcast %cst_95 : f32 to vector<8x128xf32>
    %306 = arith.addf %305, %304 : vector<8x128xf32>
    %307 = arith.divf %305, %306 : vector<8x128xf32>
    %308 = vector.extract_strided_slice %289 {offsets = [0, 256], sizes = [8, 128], strides = [1, 1]} : vector<8x384xf32> to vector<8x128xf32>
    %309 = vector.extract_strided_slice %291 {offsets = [0, 256], sizes = [8, 128], strides = [1, 1]} : vector<8x384xf32> to vector<8x128xf32>
    %310 = arith.addf %309, %20 : vector<8x128xf32>
    %311 = arith.mulf %299, %310 : vector<8x128xf32>
    %312 = arith.addf %308, %311 : vector<8x128xf32>
    %313 = math.tanh %312 : vector<8x128xf32>
    %cst_96 = arith.constant 1.000000e+00 : f32
    %314 = vector.broadcast %cst_96 : f32 to vector<8x128xf32>
    %315 = arith.subf %314, %307 : vector<8x128xf32>
    %316 = arith.mulf %315, %313 : vector<8x128xf32>
    %317 = arith.mulf %307, %242 : vector<8x128xf32>
    %318 = arith.addf %316, %317 : vector<8x128xf32>
    %319 = arith.addi %22, %c3_i32_89 : i32
    %320 = vector.broadcast %319 : i32 to vector<8x128xi32>
    %321 = arith.cmpi slt, %320, %17 : vector<8x128xi32>
    %cst_97 = arith.constant 0.000000e+00 : f32
    %322 = vector.broadcast %cst_97 : f32 to vector<8x128xf32>
    %323 = arith.select %321, %318, %322 : vector<8x128xi1>, vector<8x128xf32>
    %324 = arith.index_cast %c3_i32_89 : i32 to index
    %c0_98 = arith.constant 0 : index
    %c0_99 = arith.constant 0 : index
    %325 = vector.load %arg13[%324, %c0_98, %c0_99] : memref<4x8x128xf32, #tpu.memory_space<vmem>>, vector<1x8x128xf32>
    %326 = vector.shape_cast %325 : vector<1x8x128xf32> to vector<8x128xf32>
    %327 = vector.shape_cast %323 : vector<8x128xf32> to vector<1x8x128xf32>
    tpu.vector_store %arg13[%324, %c0_98, %c0_99], %327 {strides = array<i32>} : memref<4x8x128xf32, #tpu.memory_space<vmem>>, vector<1x8x128xf32>,
    %328 = arith.select %321, %318, %242 : vector<8x128xi1>, vector<8x128xf32>
    %c8_i32_100 = arith.constant 8 : i32
    %329 = arith.muli %285, %c8_i32_100 : i32
    %330 = tpu.assume_multiple %329, 8 : i32
    %331 = arith.index_cast %330 : i32 to index
    %c0_101 = arith.constant 0 : index
    %332 = vector.load %arg20[%331, %c0_101] : memref<32x384xf32, #tpu.memory_space<vmem>>, vector<8x384xf32>
    %333 = arith.truncf %280 : vector<8x128xf32> to vector<8x128xbf16>
    %cst_102 = arith.constant dense<0.000000e+00> : vector<8x384xf32>
    %334 = tpu.matmul %333, %19, %cst_102 {dimension_numbers = #tpu.dot_dimension_numbers<[1], [0], [0], [1], [0, 0, 1, 1], [], []>} : vector<8x128xbf16>, vector<128x384xbf16>, vector<8x384xf32> -> vector<8x384xf32>
    %335 = vector.extract_strided_slice %332 {offsets = [0, 0], sizes = [8, 128], strides = [1, 1]} : vector<8x384xf32> to vector<8x128xf32>
    %336 = vector.extract_strided_slice %334 {offsets = [0, 0], sizes = [8, 128], strides = [1, 1]} : vector<8x384xf32> to vector<8x128xf32>
    %337 = arith.addf %335, %336 : vector<8x128xf32>
    %338 = arith.negf %337 : vector<8x128xf32>
    %339 = math.exp %338 : vector<8x128xf32>
    %cst_103 = arith.constant 1.000000e+00 : f32
    %340 = vector.broadcast %cst_103 : f32 to vector<8x128xf32>
    %341 = arith.addf %340, %339 : vector<8x128xf32>
    %342 = arith.divf %340, %341 : vector<8x128xf32>
    %343 = vector.extract_strided_slice %332 {offsets = [0, 128], sizes = [8, 128], strides = [1, 1]} : vector<8x384xf32> to vector<8x128xf32>
    %344 = vector.extract_strided_slice %334 {offsets = [0, 128], sizes = [8, 128], strides = [1, 1]} : vector<8x384xf32> to vector<8x128xf32>
    %345 = arith.addf %343, %344 : vector<8x128xf32>
    %346 = arith.negf %345 : vector<8x128xf32>
    %347 = math.exp %346 : vector<8x128xf32>
    %cst_104 = arith.constant 1.000000e+00 : f32
    %348 = vector.broadcast %cst_104 : f32 to vector<8x128xf32>
    %349 = arith.addf %348, %347 : vector<8x128xf32>
    %350 = arith.divf %348, %349 : vector<8x128xf32>
    %351 = vector.extract_strided_slice %332 {offsets = [0, 256], sizes = [8, 128], strides = [1, 1]} : vector<8x384xf32> to vector<8x128xf32>
    %352 = vector.extract_strided_slice %334 {offsets = [0, 256], sizes = [8, 128], strides = [1, 1]} : vector<8x384xf32> to vector<8x128xf32>
    %353 = arith.addf %352, %21 : vector<8x128xf32>
    %354 = arith.mulf %342, %353 : vector<8x128xf32>
    %355 = arith.addf %351, %354 : vector<8x128xf32>
    %356 = math.tanh %355 : vector<8x128xf32>
    %cst_105 = arith.constant 1.000000e+00 : f32
    %357 = vector.broadcast %cst_105 : f32 to vector<8x128xf32>
    %358 = arith.subf %357, %350 : vector<8x128xf32>
    %359 = arith.mulf %358, %356 : vector<8x128xf32>
    %360 = arith.mulf %350, %280 : vector<8x128xf32>
    %361 = arith.addf %359, %360 : vector<8x128xf32>
    %362 = arith.addi %24, %285 : i32
    %363 = vector.broadcast %362 : i32 to vector<8x128xi32>
    %364 = arith.cmpi slt, %363, %17 : vector<8x128xi32>
    %cst_106 = arith.constant 0.000000e+00 : f32
    %365 = vector.broadcast %cst_106 : f32 to vector<8x128xf32>
    %366 = arith.select %364, %361, %365 : vector<8x128xi1>, vector<8x128xf32>
    %367 = arith.index_cast %285 : i32 to index
    %c0_107 = arith.constant 0 : index
    %c0_108 = arith.constant 0 : index
    %368 = vector.load %arg14[%367, %c0_107, %c0_108] : memref<4x8x128xf32, #tpu.memory_space<vmem>>, vector<1x8x128xf32>
    %369 = vector.shape_cast %368 : vector<1x8x128xf32> to vector<8x128xf32>
    %370 = vector.shape_cast %366 : vector<8x128xf32> to vector<1x8x128xf32>
    tpu.vector_store %arg14[%367, %c0_107, %c0_108], %370 {strides = array<i32>} : memref<4x8x128xf32, #tpu.memory_space<vmem>>, vector<1x8x128xf32>,
    %c4_i32_109 = arith.constant 4 : i32
    %c0_110 = arith.constant 0 : index
    %c0_111 = arith.constant 0 : index
    %371 = vector.load %arg17[%c0_110, %c0_111] : memref<8x128xf32, #tpu.memory_space<vmem>>, vector<8x128xf32>
    tpu.vector_store %arg17[%c0_110, %c0_111], %328 {strides = array<i32>} : memref<8x128xf32, #tpu.memory_space<vmem>>, vector<8x128xf32>,
    %c0_112 = arith.constant 0 : index
    %c0_113 = arith.constant 0 : index
    %372 = vector.load %arg18[%c0_112, %c0_113] : memref<8x128xf32, #tpu.memory_space<vmem>>, vector<8x128xf32>
    tpu.vector_store %arg18[%c0_112, %c0_113], %366 {strides = array<i32>} : memref<8x128xf32, #tpu.memory_space<vmem>>, vector<8x128xf32>,
    %c0_114 = arith.constant 0 : index
    %c0_115 = arith.constant 0 : index
    %373 = vector.load %arg15[%c0_114, %c0_115] : memref<8x128xf32, #tpu.memory_space<vmem>>, vector<8x128xf32>
    tpu.vector_store %arg15[%c0_114, %c0_115], %328 {strides = array<i32>} : memref<8x128xf32, #tpu.memory_space<vmem>>, vector<8x128xf32>,
    %c0_116 = arith.constant 0 : index
    %c0_117 = arith.constant 0 : index
    %374 = vector.load %arg16[%c0_116, %c0_117] : memref<8x128xf32, #tpu.memory_space<vmem>>, vector<8x128xf32>
    tpu.vector_store %arg16[%c0_116, %c0_117], %366 {strides = array<i32>} : memref<8x128xf32, #tpu.memory_space<vmem>>, vector<8x128xf32>,
    return
  }
  func.func @transform_0(%arg0: i32, %arg1: i32) -> (i32, i32) {
    %c0_i32 = arith.constant 0 : i32
    %c0_i32_0 = arith.constant 0 : i32
    return %arg0, %c0_i32 : i32, i32
  }
  func.func @transform_1(%arg0: i32, %arg1: i32) -> (i32, i32) {
    %c2_i32 = arith.constant 2 : i32
    %0 = arith.muli %arg0, %c2_i32 : i32
    %1 = arith.addi %0, %arg1 : i32
    %c0_i32 = arith.constant 0 : i32
    %c0_i32_0 = arith.constant 0 : i32
    return %1, %c0_i32 : i32, i32
  }
  func.func @transform_2(%arg0: i32, %arg1: i32) -> (i32, i32) {
    %c2_i32 = arith.constant 2 : i32
    %0 = arith.muli %arg0, %c2_i32 : i32
    %c1_i32 = arith.constant 1 : i32
    %1 = arith.subi %c1_i32, %arg1 : i32
    %2 = arith.addi %0, %1 : i32
    %c0_i32 = arith.constant 0 : i32
    %c0_i32_0 = arith.constant 0 : i32
    return %2, %c0_i32 : i32, i32
  }
  func.func @transform_3(%arg0: i32, %arg1: i32) -> (i32, i32) {
    %c0_i32 = arith.constant 0 : i32
    %c0_i32_0 = arith.constant 0 : i32
    %c0_i32_1 = arith.constant 0 : i32
    return %c0_i32, %c0_i32_0 : i32, i32
  }
  func.func @transform_4(%arg0: i32, %arg1: i32) -> (i32, i32) {
    %c0_i32 = arith.constant 0 : i32
    %c0_i32_0 = arith.constant 0 : i32
    %c0_i32_1 = arith.constant 0 : i32
    return %c0_i32, %c0_i32_0 : i32, i32
  }
  func.func @transform_5(%arg0: i32, %arg1: i32) -> (i32, i32) {
    %c0_i32 = arith.constant 0 : i32
    %c0_i32_0 = arith.constant 0 : i32
    %c0_i32_1 = arith.constant 0 : i32
    return %c0_i32, %c0_i32_0 : i32, i32
  }
  func.func @transform_6(%arg0: i32, %arg1: i32) -> (i32, i32) {
    %c0_i32 = arith.constant 0 : i32
    %c0_i32_0 = arith.constant 0 : i32
    return %arg0, %c0_i32 : i32, i32
  }
  func.func @transform_7(%arg0: i32, %arg1: i32) -> (i32, i32) {
    %c0_i32 = arith.constant 0 : i32
    %c0_i32_0 = arith.constant 0 : i32
    %c0_i32_1 = arith.constant 0 : i32
    return %c0_i32, %c0_i32_0 : i32, i32
  }
  func.func @transform_8(%arg0: i32, %arg1: i32) -> (i32, i32) {
    %c0_i32 = arith.constant 0 : i32
    %c0_i32_0 = arith.constant 0 : i32
    %c0_i32_1 = arith.constant 0 : i32
    return %c0_i32, %c0_i32_0 : i32, i32
  }
  func.func @transform_9(%arg0: i32, %arg1: i32) -> (i32, i32) {
    %c0_i32 = arith.constant 0 : i32
    %c0_i32_0 = arith.constant 0 : i32
    %c0_i32_1 = arith.constant 0 : i32
    return %c0_i32, %c0_i32_0 : i32, i32
  }
  func.func @transform_10(%arg0: i32, %arg1: i32) -> (i32, i32) {
    %c0_i32 = arith.constant 0 : i32
    %c0_i32_0 = arith.constant 0 : i32
    return %arg0, %c0_i32 : i32, i32
  }
  func.func @transform_11(%arg0: i32, %arg1: i32) -> (i32, i32, i32) {
    %c0_i32 = arith.constant 0 : i32
    %c0_i32_0 = arith.constant 0 : i32
    return %arg1, %arg0, %c0_i32 : i32, i32, i32
  }
  func.func @transform_12(%arg0: i32, %arg1: i32) -> (i32, i32, i32) {
    %c1_i32 = arith.constant 1 : i32
    %0 = arith.subi %c1_i32, %arg1 : i32
    %c0_i32 = arith.constant 0 : i32
    %c0_i32_0 = arith.constant 0 : i32
    return %0, %arg0, %c0_i32 : i32, i32, i32
  }
  func.func @transform_13(%arg0: i32, %arg1: i32) -> (i32, i32) {
    %c0_i32 = arith.constant 0 : i32
    %c0_i32_0 = arith.constant 0 : i32
    return %arg0, %c0_i32 : i32, i32
  }
  func.func @transform_14(%arg0: i32, %arg1: i32) -> (i32, i32) {
    %c0_i32 = arith.constant 0 : i32
    %c0_i32_0 = arith.constant 0 : i32
    return %arg0, %c0_i32 : i32, i32
  }
}

</mosaic_0001>

<bundles_post_ra>
// kernel: tpu_custom_call.1
= control target key start
LH: loop header
LB: loop body
LE: loop exit
PB: predicated region body
PF: predicated region fallthrough
CT: control target
= control target key end

     0   :  { %s4516_s0 = inlined_call_operand.vmem [shape: s32[8,128], index: 0, kind: input, shape index: {}]   ;;  %s4517_s1 = inlined_call_operand.vmem [shape: bf16[64,16], index: 1, kind: input, shape index: {}]   ;;  %s4518_s2 = inlined_call_operand.vmem [shape: bf16[64,16], index: 2, kind: input, shape index: {}]   ;;  %s4519_s3 = inlined_call_operand.vmem [shape: bf16[16,384], index: 3, kind: input, shape index: {}]   ;;  %s4520_s4 = inlined_call_operand.vmem [shape: f32[1,384], index: 4, kind: input, shape index: {}]   ;;  %s4521_s5 = inlined_call_operand.hbm [shape: bf16[128,384], index: 5, kind: input, shape index: {}]   ;;  %s4522_s6 = inlined_call_operand.vmem [shape: f32[8,128], index: 6, kind: input, shape index: {}]   ;;  %s4523_s7 = inlined_call_operand.vmem [shape: bf16[16,384], index: 7, kind: input, shape index: {}]   ;;  %s4524_s8 = inlined_call_operand.vmem [shape: f32[1,384], index: 8, kind: input, shape index: {}]   ;;  %s4525_s9 = inlined_call_operand.hbm [shape: bf16[128,384], index: 9, kind: input, shape index: {}]   ;;  %s4526_s10 = inlined_call_operand.vmem [shape: f32[8,128], index: 10, kind: input, shape index: {}]   ;;  %s4527_s11 = inlined_call_operand.hbm [shape: f32[8,8,128], index: 11, kind: output, shape index: {0}]   ;;  %s4528_s12 = inlined_call_operand.hbm [shape: f32[8,8,128], index: 12, kind: output, shape index: {1}]   ;;  %s4529_s13 = inlined_call_operand.hbm [shape: f32[8,128], index: 13, kind: output, shape index: {2}]   ;;  %s4530_s14 = inlined_call_operand.hbm [shape: f32[8,128], index: 14, kind: output, shape index: {3}]  }
   0x1   :  { %4583 = sst [smem:[#allocation67_spill]] %s4521_s5 }
   0x2   :  { %4584 = sst [smem:[#allocation68_spill]] %s4527_s11 }
   0x3   :  { %4585 = sst [smem:[#allocation69_spill]] %s4528_s12 }
   0x4   :  { %4586 = sst [smem:[#allocation70_spill]] %s4529_s13 }
   0x5   :  { %4587 = sst [smem:[#allocation71_spill]] %s4530_s14 }
   0x6   :  { %20 = vsyncpa [#allocation7], 0 }
   0x7   :  { %21 = vsyncpa [#allocation10], 0 }
   0x8   :  { %22 = vsyncpa [#allocation8], 0 }
   0x9   :  { %24 = vsyncpa [#allocation8 + $0x1], 0 }
   0xa   :  { %25 = vsyncpa [#allocation13], 0 }
   0xb   :  { %27 = vsyncpa [#allocation13 + $0x1], 0 }
   0xc   :  { %28 = vsyncpa [#allocation16], 0  ;;  %s3579_s29 = smov 0   ;;  %s3581_s30 = smov 0  }
   0xd   :  { %s3583_s15 = smov 0   ;;  %s3585_s16 = smov 0  }
   0xe   :  { %s3587_s17 = smov 0   ;;  %s3589_s18 = smov 0  }
   0xf   :  { %s3591_s19 = smov 0   ;;  %s3593_s20 = smov 0  }
  0x10   :  { %s3595_s21 = smov 0  }
  0x11 LB: > { %4588 = sst [smem:[#allocation23_spill]] %s3464_s15  ;;  %s3625_s22 = sadd.s32 4294967295, %s3488_s21   ;;  %s3488_s21 = sphi %s3595_s21, %s34_s21   ;;  %s3484_s20 = sphi %s3593_s20, %s4711_s20   ;;  %s3480_s19 = sphi %s3591_s19, %s4710_s19   ;;  %s3476_s18 = sphi %s3589_s18, %s4709_s18   ;;  %s3472_s17 = sphi %s3587_s17, %s4715_s17   ;;  %s3468_s16 = sphi %s3585_s16, %s4714_s16   ;;  %s3464_s15 = sphi %s3583_s15, %s4707_s15   ;;  %s3460_s30 = sphi %s3581_s30, %s4713_s30   ;;  %s3456_s29 = sphi %s3579_s29, %s4712_s29  }
  0x12   : > { %4589 = sst [smem:[#allocation24_spill]] %s3468_s16  ;;  %s4536_s23 = sadd.s32 4294967294, %s3488_s21  }
  0x13   : > { %4590 = sst [smem:[#allocation25_spill]] %s3476_s18  ;;  %s43_s24 = sadd.s32 1, %s3484_s20 }
  0x14   : > { %4591 = sst [smem:[#allocation26_spill]] %s3484_s20  ;;  %s321_s25 = sadd.s32 1, %s3476_s18 }
  0x15   : > { %4592 = sst [smem:[#allocation27_spill]] %s3488_s21  ;;  %p44_p0 = scmp.ge.s32.totalorder %s43_s24, 2 }
  0x16   : > { %p331_p1 = scmp.ne.s32.totalorder %s3476_s18, %s3472_s17  ;;  %p4543_p2 = scmp.eq.s32.totalorder %s3625_s22, 1 }
  0x17   : > { %p337_p3 = scmp.ne.s32.totalorder %s3472_s17, %s3468_s16  ;;  %s4717_s24 = smov (%p44_p0, %s43_s24), 0 }
  0x18   : > { %4593 = sst [smem:[#allocation28_spill]] %s4717_s24  ;;  %p3639_p4 = por %p4543_p2, %p331_p1 }
  0x19   : > { %p3645_p5 = scmp.eq.s32.totalorder %s4536_s23, 1  ;;  %s316_s28 = ssub.s32 %s3484_s20, %s4717_s24 }
  0x1a   : > { %s4594_s26 = scalar_select %p3639_p4, 1, 0 }
  0x1b   : > { %s344_s16 = ssub.s32 1, %s3484_s20  ;;  %p319_p6 = scmp.eq.s32.totalorder %s316_s28, 0 }
  0x1c   : > { %4595 = sst [smem:[#allocation29_spill]] %s4594_s26  ;;  %p3654_p7 = por %p3645_p5, %p337_p3 }
  0x1d   : > { %s345_s13 = ssub.s32 1, %s4717_s24  ;;  %s351_s12 = sadd.s32 1, %s3464_s15 }
  0x1e   : > { %s4597_s14 = scalar_select %p3654_p7, 1, 0 }
  0x1f   : > { %s3661_s11 = scalar_select %p319_p6, %s3476_s18, %s321_s25  }
  0x20   : > { %4598 = sst [smem:[#allocation30_spill]] %s4597_s14  ;;  %s346_s23 = ssub.s32 %s344_s16, %s345_s13 }
  0x21   : > { %4599 = sst [smem:[#allocation31_spill]] %s3661_s11  ;;  %p361_p8 = scmp.ne.s32.totalorder %s3464_s15, %s3460_s30 }
  0x22   : > { %p349_p9 = scmp.eq.s32.totalorder %s346_s23, 0  ;;  %p367_p10 = scmp.ne.s32.totalorder %s3460_s30, %s3456_s29 }
  0x23   : > { %p3669_p11 = por %p361_p8, %p4543_p2  ;;  %p2531_p12 = scmp.ge.s32.totalorder %s3488_s21, 1 }
  0x24   : > { %s3675_s28 = scalar_select %p349_p9, %s3464_s15, %s351_s12  }
  0x25   : > { %s4600_s26 = scalar_select %p3669_p11, 1, 0 }
  0x26   : > { %4601 = sst [smem:[#allocation32_spill]] %s3675_s28  ;;  %p3679_p13 = por %p367_p10, %p3645_p5 }
  0x27   : > { %p427_p0 = scmp.lt.s32.totalorder %s3488_s21, 3  ;;  %p4544_p1 = scmp.eq.s32.totalorder %s3625_s22, 0 }
  0x28   : > { %s4602_s20 = scalar_select %p3679_p13, 1, 0 }
  0x29   : > { %p3685_p3 = pnand %p2531_p12, %p427_p0  ;;  %s3490_s29 = smov [#allocation6]  }
  0x2a   : > { %4603 = sst [smem:[#allocation33_spill]] %s4602_s20  ;;  %s452_s16 = sshll.u32 %s3490_s29, 4  ;;  %s453_s16 = int_to_ptr.vmem [resolvable:$true] %s452_s16 }
  0x2b   : > { %s4604_s13 = scalar_select %p3685_p3, 1, 0 }
  0x2c   : > { %p2940_p6 = pneg %p3685_p3  ;;  %s3491_s23 = smov [#allocation9]  }
  0x2d   : > { %s478_s25 = sshll.u32 %s3491_s23, 4  ;;  %s4606_s5 = sld [smem:[#allocation67_spill]]  ;;  %s3697_s25 = int_to_ptr.vmem [resolvable:$true] %s478_s25 }
  0x2e   : > { %p3693_p8 = pnand %p4544_p1, %p2940_p6 }
  0x30   : > { %p3232_p9 = pneg %p3693_p8 }
  0x33   : > { %s3230_s11 = scalar_lea.hbm %s4606_s5, 3072 }
  0x34   : > { %p3231_p5 = scmp.ne.s32.totalorder %s4606_s5, %s3230_s11  ;;  %p3237_p0 = scmp.lt.u32.totalorder %s3230_s11, %s4606_s5 }
  0x36   : > { %p3233_p10 = pnand %p3232_p9, %p3231_p5 }
  0x38   : > { %p3234_p12 = pneg %p3233_p10 }
  0x3a   : > { %p3239_p6 = pnand %p3237_p0, %p3234_p12 }
  0x3c   : > { %3242 = shalt.err (!%p3239_p6)
}
  0x3d   : > { %s3243_s23 = scalar_lea.vmem %s453_s16, 3072  ;;  %p3251_p7 = scmp.lt.s32.totalorder %s453_s16, %s453_s16 }
  0x3e   : > { %p3244_p2 = scmp.ne.s32.totalorder %s453_s16, %s3243_s23  ;;  %p3252_p11 = scmp.lt.s32.totalorder %s3243_s23, %s3243_s23 }
  0x40   : > { %p3246_p1 = pnand %p3244_p2, %p3232_p9  ;;  %p3253_p4 = por %p3252_p11, %p3251_p7 }
  0x42   : > { %p3247_p13 = pneg %p3246_p1 }
  0x44   : > { %p3254_p3 = pnand %p3253_p4, %p3247_p13 }
  0x46   : > { %3257 = shalt.err (!%p3254_p3)
}
  0x47   : > { %s3492_s18 = smov 192   ;;  %s3493_s24 = smov 12  }
  0x48   : > { %2943 = dma.hbm_to_vmem [thread:$0]  (!%p3693_p8), %s4606_s5, 3072, %s453_s16, [#allocation7], %s3492_s18, %s3492_s18, %s3493_s24  }
  0x49   : > { %s3258_s29 = scalar_lea.hbm %s4525_s9, 3072 }
  0x4a   : > { %p3259_p2 = scmp.ne.s32.totalorder %s4525_s9, %s3258_s29  ;;  %p3265_p11 = scmp.lt.u32.totalorder %s3258_s29, %s4525_s9 }
  0x4c   : > { %p3261_p4 = pnand %p3259_p2, %p3232_p9 }
  0x4e   : > { %p3262_p7 = pneg %p3261_p4 }
  0x50   : > { %p3267_p13 = pnand %p3265_p11, %p3262_p7 }
  0x52   : > { %3270 = shalt.err (!%p3267_p13)
}
  0x53   : > { %s3271_s16 = scalar_lea.vmem %s3697_s25, 3072  ;;  %p3279_p10 = scmp.lt.s32.totalorder %s3697_s25, %s3697_s25 }
  0x54   : > { %p3272_p1 = scmp.ne.s32.totalorder %s3697_s25, %s3271_s16  ;;  %p3280_p12 = scmp.lt.s32.totalorder %s3271_s16, %s3271_s16 }
  0x56   : > { %p3274_p3 = pnand %p3272_p1, %p3232_p9  ;;  %p3281_p0 = por %p3280_p12, %p3279_p10 }
  0x58   : > { %p3275_p5 = pneg %p3274_p3 }
  0x5a   : > { %p3282_p6 = pnand %p3281_p0, %p3275_p5 }
  0x5c   : > { %3285 = shalt.err (!%p3282_p6)
}
  0x5d   : > { %2946 = dma.hbm_to_vmem [thread:$0]  (!%p3693_p8), %s4525_s9, 3072, %s3697_s25, [#allocation10], %s3492_s18, %s3492_s18, %s3493_s24  }
  0x5e   : > { %p4607_p2 = scmp.ne.s32.totalorder %s4604_s13, 0 }
  0x60   : > { %529 = sbr.rel (%p4607_p2) target bundleno = 1332 (0x534), region = 64 }
  0x67   : > { %p4608_p4 = scmp.eq.s32.totalorder %s3625_s22, 0 }
  0x69   : > { %3431 = dma.done.wait (%p4608_p4), [#allocation7], 3072   ;;  %p4609_p9 = pmov %p4608_p4 }
  0x6a   : > { %p4610_p7 = pmov %p4608_p4 }
  0x6b   : > { %3433 = vsyncadd (%p4609_p9), [#allocation7], 4294964224 }
  0x6c   : > { %3435 = dma.done.wait (%p4610_p7), [#allocation10], 3072   ;;  %p4611_p11 = pmov %p4608_p4 }
  0x6d   : > { %s4552_s21 = sand.u32 1, %s3472_s17   ;;  %s599_s13 = sand.u32 1, %s3460_s30  }
  0x6e   : > { %3437 = vsyncadd (%p4611_p11), [#allocation10], 4294964224  ;;  %s2541_s12 = sshll.u32 %s4552_s21, 5  ;;  %s2542_s25 = sshll.u32 %s599_s13, 5 }
  0x6f   : > { %s3761_s18 = sshll.u32 %s3480_s19, 2  ;;  %s4553_s24 = ssub.s32 1, %s3480_s19 }
  0x70   : > { %p613_p8 = scmp.lt.s32.totalorder %s3761_s18, 7  ;;  %s3767_s11 = sshll.u32 %s4553_s24, 2 }
  0x71   : > { %p624_p13 = scmp.lt.s32.totalorder %s3767_s11, 7  ;;  %s3780_s5 = scalar_lea.vmem [#allocation11], %s2541_s12 }
  0x72   : > { %s614_s15 = scalar_select %p613_p8, %s3761_s18, 7 }
  0x73   : > { %s625_s28 = scalar_select %p624_p13, %s3767_s11, 7 }
  0x74   : > { %s2544_s27 = sshll.u32 %s614_s15, 2  ;;  %s3782_s24 = scalar_lea.vmem [#allocation12], %s2542_s25 }
  0x75   : > { %s616_s16 = scalar_lea.vmem %s4517_s1, %s2544_s27  ;;  %s2546_s14 = sshll.u32 %s625_s28, 2 }
  0x76   : > { %s3778_s21 = scalar_lea.vmem %s4518_s2, %s2546_s14  ;;  %p2547_p1 = scmp.ne.s32.totalorder %s3480_s19, 0 }
  0x77   : > { %v3494_v0 = vmov (!%p2547_p1), 0.0  }
  0x78   : > { %647 = sbr.rel (%p2547_p1) target bundleno = 127 (0x7f), region = 76  ;;  %648 = vst [vmem:[#allocation2] sm:$0xff] (!%p2547_p1), %v3494_v0  ;;  %649 = vst [vmem:[#allocation3] sm:$0xff] (!%p2547_p1), %v3494_v0 }
  0x7f PF: > { %v3047_v1 = vld [vmem:[%s4519_s3 + $0x8] ss:$12 sps:$4 sm:$0xff]   ;;  %v3048_v2 = vld [vmem:[%s616_s16] sm:$0xff]   ;;  %vm701_vm0 = vcmask 130048   ;;  %v4554_v6 = vmov 0   ;;  %v4556_v16 = vmov 0.0  }
  0x80   : > { %2748 = vmatprep.subr.bf16.mxu1 %v3047_v1  ;;  %v3049_v3 = vld [vmem:[%s616_s16 + $0x8] sm:$0xff]   ;;  %2750 = vmatprep.mubr.msk.bf16.mxu1 %vm701_vm0, %v3048_v2  ;;  %v3052_v5 = vld [vmem:[%s4523_s7 + $0x4] ss:$12 sps:$4 sm:$0xff]   ;;  %v3796_v7 = vld [vmem:[#allocation6 + $0x4] ss:$12 sps:$4 sm:$0xff]   ;;  %vm3497_vm1 = vmmov 0  }
  0x81   : > { %2749 = vmatpush3.bf16.msra.mxu1 %v3047_v1  ;;  %v3050_v4 = vld [vmem:[%s4523_s7] ss:$12 sps:$4 sm:$0xff]   ;;  %740 = vmatprep.mubr.bf16.mxu0 %v4554_v6  ;;  %v3059_v8 = vld [vmem:[%s4519_s3 + $0x4] ss:$12 sps:$4 sm:$0xff]   ;;  %v3066_v12 = vld [vmem:[%s4523_s7 + $0x8] ss:$12 sps:$4 sm:$0xff]   ;;  %v660_v1 = vlaneseq }
  0x82   : > { %879 = vmatprep.subr.bf16.mxu1 %v3052_v5  ;;  %v3062_v9 = vld [vmem:[%s4519_s3] ss:$12 sps:$4 sm:$0xff]   ;;  %v3808_v11 = vld [vmem:[#allocation6] ss:$12 sps:$4 sm:$0xff]   ;;  %708 = vmatprep.subr.bf16.mxu0 %v3059_v8  ;;  %v3818_v14 = vld [vmem:[#allocation6 + $0x18] ss:$12 sps:$4 sm:$0xff]  }
  0x83   : > { %v3055_v10 = vld [vmem:[%s3778_s21] sm:$0xff]   ;;  %709 = vmatpush1.bf16.msra.mxu0 %v3062_v9  ;;  %v3813_v13 = vld [vmem:[#allocation6 + $0x1c] ss:$12 sps:$4 sm:$0xff]   ;;  %v3831_v19 = vld [vmem:[#allocation6 + $0x4c] ss:$12 sps:$4 sm:$0xff]   ;;  %s1546_s13 = sadd.s32 3, %s3767_s11 }
  0x84   : > { %2751 = vmatmul.mubr.msk.bf16.vlgmr.msra.gmra.mrb[0].mxu1 %vm701_vm0, %v3049_v3  ;;  %2754 = vmatprep.subr.bf16.mxu0 %v3066_v12  ;;  %v3821_v15 = vld [vmem:[#allocation6 + $0x34] ss:$12 sps:$4 sm:$0xff]   ;;  %v3076_v17 = vld [vmem:[%s3778_s21 + $0x8] sm:$0xff]   ;;  %v3840_v21 = vld [vmem:[#allocation6 + $0x64] ss:$12 sps:$4 sm:$0xff]   ;;  %s1662_s15 = sadd.s32 1, %s3761_s18 }
  0x85   : > { %880 = vmatpush1.bf16.msra.mxu1 %v3050_v4  ;;  %911 = vmatprep.mubr.bf16.mxu1 %v4554_v6  ;;  %v3828_v18 = vld [vmem:[#allocation6 + $0x30] ss:$12 sps:$4 sm:$0xff]   ;;  %v3836_v20 = vld [vmem:[#allocation6 + $0x48] ss:$12 sps:$4 sm:$0xff]   ;;  %4613 = vst [vmem:[#allocation35_spill] sm:$0xff] %v3840_v21  ;;  %s1779_s21 = sadd.s32 2, %s3767_s11 }
  0x86   : > { %1200 = vmatprep.subr.bf16.mxu1 %v3796_v7  ;;  %2553 = vmatmul.mubr.msk.bf16.vlgmr.msra.gmra.mrb[0].mxu0 %vm701_vm0, %v3048_v2  ;;  %4612 = vst [vmem:[#allocation34_spill] sm:$0xff] %v3836_v20  ;;  %v3843_v22 = vld [vmem:[#allocation6 + $0x60] ss:$12 sps:$4 sm:$0xff]   ;;  %v3846_v23 = vld [vmem:[#allocation6 + $0x8] ss:$12 sps:$4 sm:$0xff]   ;;  %v3964_v58 = vld [vmem:[#allocation3] sm:$0xff] }
  0x87   : > { %2755 = vmatpush3.bf16.msra.mxu0 %v3066_v12  ;;  %750 = vmatprep.mubr.bf16.mxu0 %v4554_v6  ;;  %4614 = vst [vmem:[#allocation36_spill] sm:$0xff] %v3843_v22  ;;  %v3849_v24 = vld [vmem:[#allocation6 + $0x7c] ss:$12 sps:$4 sm:$0xff]   ;;  %v3851_v25 = vld [vmem:[#allocation6 + $0x78] ss:$12 sps:$4 sm:$0xff]   ;;  %v3876_v32 = vld [vmem:[#allocation2] sm:$0xff]  ;;  %v1314_v60 = vpack.c.bf16 %v3964_v58, %v3964_v58 }
  0x88   : > { %2760 = vmatprep.subr.bf16.mxu0 %v4556_v16  ;;  %4615 = vst [vmem:[#allocation37_spill] sm:$0xff] %v3849_v24  ;;  %4616 = vst [vmem:[#allocation38_spill] sm:$0xff] %v3851_v25  ;;  %v3856_v26 = vld [vmem:[#allocation6 + $0x20] ss:$12 sps:$4 sm:$0xff]   ;;  %v3865_v28 = vld [vmem:[#allocation6 + $0x90] ss:$12 sps:$4 sm:$0xff]   ;;  %v1071_v35 = vpack.c.bf16 %v3876_v32, %v3876_v32 }
  0x89   : > { %v3859_v27 = vld [vmem:[#allocation6 + $0x94] ss:$12 sps:$4 sm:$0xff]   ;;  %4618 = vst [vmem:[#allocation40_spill] sm:$0xff] %v3865_v28  ;;  %v3868_v29 = vld [vmem:[#allocation6 + $0x38] ss:$12 sps:$4 sm:$0xff]   ;;  %v661_v2 = vshrl.u32 %v660_v1, 7 }
  0x8a   : > { %4617 = vst [vmem:[#allocation39_spill] sm:$0xff] %v3859_v27  ;;  %v3871_v30 = vld [vmem:[#allocation6 + $0xac] ss:$12 sps:$4 sm:$0xff]   ;;  %v3874_v31 = vld [vmem:[#allocation6 + $0xa8] ss:$12 sps:$4 sm:$0xff]   ;;  %s1894_s29 = sadd.s32 2, %s3761_s18 }
  0x8b   : > { %4619 = vst [vmem:[#allocation41_spill] sm:$0xff] %v3871_v30  ;;  %4620 = vst [vmem:[#allocation42_spill] sm:$0xff] %v3874_v31  ;;  %v3880_v33 = vld [vmem:[#allocation6 + $0x50] ss:$12 sps:$4 sm:$0xff]   ;;  %v3888_v36 = vld [vmem:[#allocation9] ss:$12 sps:$4 sm:$0xff]  }
  0x8c   : > { %2562 = vmatmul.mubr.msk.bf16.vlgmr.msra.gmra.mrb[4].mxu1 %vm701_vm0, %v3055_v10  ;;  %4621 = vst [vmem:[#allocation43_spill] sm:$0xff] %v3880_v33  ;;  %v3883_v34 = vld [vmem:[#allocation9 + $0x4] ss:$12 sps:$4 sm:$0xff]   ;;  %v3892_v37 = vld [vmem:[#allocation6 + $0x68] ss:$12 sps:$4 sm:$0xff]   ;;  %v662_v12 = vsub.s32 0, %v661_v2 }
  0x8d   : > { %1201 = vmatpush1.bf16.msra.mxu1 %v3808_v11  ;;  %921 = vmatprep.mubr.bf16.mxu1 %v4554_v6  ;;  %4622 = vst [vmem:[#allocation44_spill] sm:$0xff] %v3883_v34  ;;  %4623 = vst [vmem:[#allocation45_spill] sm:$0xff] %v3892_v37  ;;  %v3895_v38 = vld [vmem:[#allocation9 + $0x1c] ss:$12 sps:$4 sm:$0xff]   ;;  %v3899_v39 = vld [vmem:[#allocation9 + $0x18] ss:$12 sps:$4 sm:$0xff]  }
  0x8e   : > { %1202 = vmatprep.subr.bf16.mxu1 %v3813_v13  ;;  %2554 = vmatmul.mubr.msk.bf16.gmra.mrb[4].mxu0 %vm701_vm0, %v3049_v3  ;;  %v3902_v40 = vld [vmem:[#allocation6 + $0x80] ss:$12 sps:$4 sm:$0xff]   ;;  %v3910_v42 = vld [vmem:[#allocation9 + $0x30] ss:$12 sps:$4 sm:$0xff]   ;;  %v3913_v43 = vld [vmem:[#allocation6 + $0x98] ss:$12 sps:$4 sm:$0xff]  }
  0x8f   : > { %2756 = vmatprep.mubr.msk.bf16.mxu0 %vm701_vm0, %v3055_v10  ;;  %4624 = vst [vmem:[#allocation46_spill] sm:$0xff] %v3902_v40  ;;  %v3905_v41 = vld [vmem:[#allocation9 + $0x34] ss:$12 sps:$4 sm:$0xff]   ;;  %4625 = vst [vmem:[#allocation47_spill] sm:$0xff] %v3913_v43  ;;  %v3916_v44 = vld [vmem:[#allocation9 + $0x4c] ss:$12 sps:$4 sm:$0xff]  }
  0x90   : > { %v3920_v45 = vld [vmem:[#allocation9 + $0x48] ss:$12 sps:$4 sm:$0xff]   ;;  %v3923_v46 = vld [vmem:[#allocation6 + $0xb0] ss:$12 sps:$4 sm:$0xff]   ;;  %v3930_v48 = vld [vmem:[#allocation9 + $0x60] ss:$12 sps:$4 sm:$0xff]  }
  0x91   : > { %1203 = vmatpush1.bf16.msra.mxu1 %v3818_v14  ;;  %4626 = vst [vmem:[#allocation48_spill] sm:$0xff] %v3923_v46  ;;  %v3926_v47 = vld [vmem:[#allocation9 + $0x64] ss:$12 sps:$4 sm:$0xff]   ;;  %v3933_v49 = vld [vmem:[#allocation9 + $0x8] ss:$12 sps:$4 sm:$0xff]   ;;  %v670_v3 = vsub.s32 2, %v661_v2 }
  0x92   : > { %1204 = vmatprep.subr.bf16.mxu1 %v3821_v15  ;;  %v3936_v50 = vld [vmem:[#allocation9 + $0x7c] ss:$12 sps:$4 sm:$0xff]   ;;  %v3940_v51 = vld [vmem:[#allocation9 + $0x78] ss:$12 sps:$4 sm:$0xff]   ;;  %v3943_v52 = vld [vmem:[#allocation9 + $0x20] ss:$12 sps:$4 sm:$0xff]  }
  0x93   : > { %v3946_v53 = vld [vmem:[#allocation9 + $0x94] ss:$12 sps:$4 sm:$0xff]   ;;  %v3952_v54 = vld [vmem:[#allocation9 + $0x90] ss:$12 sps:$4 sm:$0xff]   ;;  %v3955_v55 = vld [vmem:[#allocation9 + $0x38] ss:$12 sps:$4 sm:$0xff]  }
  0x94   : > { %2563 = vmatmul.mubr.msk.bf16.gmra.mrb[8].mxu1 %vm701_vm0, %v3076_v17  ;;  %v3958_v56 = vld [vmem:[#allocation9 + $0xac] ss:$12 sps:$4 sm:$0xff]   ;;  %v3962_v57 = vld [vmem:[#allocation9 + $0xa8] ss:$12 sps:$4 sm:$0xff]   ;;  %v3967_v59 = vld [vmem:[#allocation9 + $0x50] ss:$12 sps:$4 sm:$0xff]  }
  0x95   : > { %1205 = vmatpush1.bf16.msra.mxu1 %v3828_v18  ;;  %1232 = vmatprep.mubr.bf16.mxu1 %v4554_v6  ;;  %v3975_v61 = vld [vmem:[#allocation9 + $0x68] ss:$12 sps:$4 sm:$0xff]   ;;  %v3980_v62 = vld [vmem:[#allocation9 + $0x80] ss:$12 sps:$4 sm:$0xff]   ;;  %v3987_v63 = vld [vmem:[#allocation9 + $0x98] ss:$12 sps:$4 sm:$0xff]  }
  0x96   : > { %1206 = vmatprep.subr.bf16.mxu1 %v3831_v19  ;;  %2757 = vmatmul.mubr.msk.bf16.vlgmr.msra.gmra.mrb[8].mxu0 %vm701_vm0, %v3076_v17  ;;  %v3993_v0 = vld [vmem:[#allocation9 + $0xb0] ss:$12 sps:$4 sm:$0xff]   ;;  %s2010_s12 = sadd.s32 1, %s3767_s11  ;;  %s2125_s25 = sadd.s32 3, %s3761_s18 }
  0x97   : > { %2761 = vmatpush3.bf16.msra.mxu0 %v3846_v23  ;;  %2776 = vmatprep.mubr.msk.bf16.mxu0 %vm3497_vm1, %v4556_v16  ;;  %v658_v4 = vld [vmem:[%s4520_s4] sm:$0x7]  ;;  %s2668_s28 = sshll.u32 %s3480_s19, 9  ;;  %s2269_s27 = sshll.u32 %s3780_s5, 4  ;;  %s4345_s27 = int_to_ptr.vmem [resolvable:$true] %s2269_s27 }
  0x98   : > { %2762 = vmatprep.subr.bf16.mxu0 %v4556_v16  ;;  %v4031_v5 = vrot.slane %v658_v4, %v670_v3  ;;  %s4679_s23 = sld [smem:[#allocation29_spill]] }
  0x99   : > { %1207 = vmatpush1.bf16.msra.mxu1 %v3836_v20 }
  0x9a   : > { %1208 = vmatprep.subr.bf16.mxu1 %v3840_v21 }
  0x9b   : > { %2763 = vmatpush3.bf16.msra.mxu0 %v3856_v26 }
  0x9c   : > { %2764 = vmatprep.subr.bf16.mxu0 %v4556_v16 }
  0x9d   : > { %1209 = vmatpush1.bf16.msra.mxu1 %v3843_v22 }
  0x9e   : > { %1210 = vmatprep.subr.bf16.mxu1 %v3849_v24  ;;  %p4683_p5 = scmp.ne.s32.totalorder %s4679_s23, 0 }
  0x9f   : > { %2765 = vmatpush3.bf16.msra.mxu0 %v3868_v29 }
  0xa0   : > { %2766 = vmatprep.subr.bf16.mxu0 %v4556_v16 }
  0xa1   : > { %1211 = vmatpush1.bf16.msra.mxu1 %v3851_v25 }
  0xa2   : > { %1212 = vmatprep.subr.bf16.mxu1 %v3859_v27 }
  0xa3   : > { %2767 = vmatpush3.bf16.msra.mxu0 %v3880_v33 }
  0xa4   : > { %2768 = vmatprep.subr.bf16.mxu0 %v4556_v16 }
  0xa5   : > { %1213 = vmatpush1.bf16.msra.mxu1 %v3865_v28 }
  0xa6   : > { %1214 = vmatprep.subr.bf16.mxu1 %v3871_v30 }
  0xa7   : > { %2769 = vmatpush3.bf16.msra.mxu0 %v3892_v37 }
  0xa8   : > { %2770 = vmatprep.subr.bf16.mxu0 %v4556_v16 }
  0xa9   : > { %1215 = vmatpush1.bf16.msra.mxu1 %v3874_v31 }
  0xaa   : > { %1443 = vmatprep.subr.bf16.mxu1 %v3883_v34 }
  0xab   : > { %2771 = vmatpush3.bf16.msra.mxu0 %v3902_v40 }
  0xac   : > { %1233 = vmatmul.mubr.bf16.vlgmr.msra.gmra.mrb[12].mxu1 %v1071_v35  ;;  %2772 = vmatprep.subr.bf16.mxu0 %v4556_v16 }
  0xad   : > { %1444 = vmatpush1.bf16.msra.mxu1 %v3888_v36  ;;  %1475 = vmatprep.mubr.bf16.mxu1 %v4554_v6 }
  0xae   : > { %1445 = vmatprep.subr.bf16.mxu1 %v3895_v38 }
  0xaf   : > { %2773 = vmatpush3.bf16.msra.mxu0 %v3913_v43 }
  0xb0   : > { %2774 = vmatprep.subr.bf16.mxu0 %v4556_v16 }
  0xb1   : > { %1446 = vmatpush1.bf16.msra.mxu1 %v3899_v39 }
  0xb2   : > { %1447 = vmatprep.subr.bf16.mxu1 %v3905_v41 }
  0xb3   : > { %2775 = vmatpush3.bf16.msra.mxu0 %v3923_v46 }
  0xb4   : > { %2780 = vmatprep.subr.bf16.mxu0 %v4556_v16 }
  0xb5   : > { %1448 = vmatpush1.bf16.msra.mxu1 %v3910_v42 }
  0xb6   : > { %1449 = vmatprep.subr.bf16.mxu1 %v3916_v44  ;;  %2777 = vmatmul.mubr.bf16.vlgmr.msra.gmra.mrb[12].mxu0 %v1071_v35  ;;  %v830_v35 = vld [vmem:[%s4524_s8] sm:$0x7] }
  0xb7   : > { %2781 = vmatpush3.bf16.msra.mxu0 %v3933_v49  ;;  %2796 = vmatprep.mubr.msk.bf16.mxu0 %vm3497_vm1, %v4556_v16 }
  0xb8   : > { %2782 = vmatprep.subr.bf16.mxu0 %v4556_v16 }
  0xb9   : > { %1450 = vmatpush1.bf16.msra.mxu1 %v3920_v45 }
  0xba   : > { %1451 = vmatprep.subr.bf16.mxu1 %v3926_v47 }
  0xbb   : > { %2783 = vmatpush3.bf16.msra.mxu0 %v3943_v52 }
  0xbc   : > { %2784 = vmatprep.subr.bf16.mxu0 %v4556_v16 }
  0xbd   : > { %1452 = vmatpush1.bf16.msra.mxu1 %v3930_v48 }
  0xbe   : > { %1453 = vmatprep.subr.bf16.mxu1 %v3936_v50 }
  0xbf   : > { %2785 = vmatpush3.bf16.msra.mxu0 %v3955_v55 }
  0xc0   : > { %2786 = vmatprep.subr.bf16.mxu0 %v4556_v16 }
  0xc1   : > { %1454 = vmatpush1.bf16.msra.mxu1 %v3940_v51 }
  0xc2   : > { %1455 = vmatprep.subr.bf16.mxu1 %v3946_v53 }
  0xc3   : > { %2787 = vmatpush3.bf16.msra.mxu0 %v3967_v59 }
  0xc4   : > { %2788 = vmatprep.subr.bf16.mxu0 %v4556_v16 }
  0xc5   : > { %1456 = vmatpush1.bf16.msra.mxu1 %v3952_v54 }
  0xc6   : > { %1457 = vmatprep.subr.bf16.mxu1 %v3958_v56 }
  0xc7   : > { %2789 = vmatpush3.bf16.msra.mxu0 %v3975_v61 }
  0xc8   : > { %2790 = vmatprep.subr.bf16.mxu0 %v4556_v16 }
  0xc9   : > { %1458 = vmatpush1.bf16.msra.mxu1 %v3962_v57 }
  0xca   : > { %1559 = vmatprep.subr.bf16.mxu1 %v3796_v7 }
  0xcb   : > { %2791 = vmatpush3.bf16.msra.mxu0 %v3980_v62 }
  0xcc   : > { %1476 = vmatmul.mubr.bf16.vlgmr.msra.gmra.mrb[16].mxu1 %v1314_v60  ;;  %2792 = vmatprep.subr.bf16.mxu0 %v4556_v16 }
  0xcd   : > { %1560 = vmatpush1.bf16.msra.mxu1 %v3808_v11  ;;  %1591 = vmatprep.mubr.bf16.mxu1 %v4554_v6 }
  0xce   : > { %1561 = vmatprep.subr.bf16.mxu1 %v3813_v13 }
  0xcf   : > { %2793 = vmatpush3.bf16.msra.mxu0 %v3987_v63 }
  0xd0   : > { %2794 = vmatprep.subr.bf16.mxu0 %v4556_v16 }
  0xd1   : > { %1562 = vmatpush1.bf16.msra.mxu1 %v3818_v14 }
  0xd2   : > { %1563 = vmatprep.subr.bf16.mxu1 %v3821_v15 }
  0xd3   : > { %2795 = vmatpush3.bf16.msra.mxu0 %v3993_v0 }
  0xd4   : > { %2800 = vmatprep.subr.bf16.mxu0 %v4556_v16 }
  0xd5   : > { %1564 = vmatpush1.bf16.msra.mxu1 %v3828_v18 }
  0xd6   : > { %1565 = vmatprep.subr.bf16.mxu1 %v3831_v19  ;;  %2797 = vmatmul.mubr.bf16.vlgmr.msra.gmra.mrb[16].mxu0 %v1314_v60  ;;  %v666_v60 = vsub.s32 1, %v661_v2 }
  0xd7   : > { %2801 = vmatpush3.bf16.msra.mxu0 %v3846_v23  ;;  %2816 = vmatprep.mubr.msk.bf16.mxu0 %vm3497_vm1, %v4556_v16 }
  0xd8   : > { %2802 = vmatprep.subr.bf16.mxu0 %v4556_v16 }
  0xd9   : > { %1566 = vmatpush1.bf16.msra.mxu1 %v3836_v20 }
  0xda   : > { %1567 = vmatprep.subr.bf16.mxu1 %v3840_v21 }
  0xdb   : > { %2803 = vmatpush3.bf16.msra.mxu0 %v3856_v26 }
  0xdc   : > { %2804 = vmatprep.subr.bf16.mxu0 %v4556_v16 }
  0xdd   : > { %1568 = vmatpush1.bf16.msra.mxu1 %v3843_v22 }
  0xde   : > { %1569 = vmatprep.subr.bf16.mxu1 %v3849_v24 }
  0xdf   : > { %2805 = vmatpush3.bf16.msra.mxu0 %v3868_v29 }
  0xe0   : > { %2806 = vmatprep.subr.bf16.mxu0 %v4556_v16 }
  0xe1   : > { %1570 = vmatpush1.bf16.msra.mxu1 %v3851_v25 }
  0xe2   : > { %1571 = vmatprep.subr.bf16.mxu1 %v3859_v27 }
  0xe3   : > { %2807 = vmatpush3.bf16.msra.mxu0 %v3880_v33 }
  0xe4   : > { %2808 = vmatprep.subr.bf16.mxu0 %v4556_v16 }
  0xe5   : > { %1572 = vmatpush1.bf16.msra.mxu1 %v3865_v28 }
  0xe6   : > { %1573 = vmatprep.subr.bf16.mxu1 %v3871_v30  ;;  %v667_v30 = vrot.slane %v658_v4, %v666_v60 }
  0xe7   : > { %2809 = vmatpush3.bf16.msra.mxu0 %v3892_v37 }
  0xe8   : > { %2810 = vmatprep.subr.bf16.mxu0 %v4556_v16 }
  0xe9   : > { %1574 = vmatpush1.bf16.msra.mxu1 %v3874_v31 }
  0xea   : > { %1676 = vmatprep.subr.bf16.mxu1 %v3883_v34  ;;  %v4047_v34 = vrot.slane %v830_v35, %v662_v12 }
  0xeb   : > { %2811 = vmatpush3.bf16.msra.mxu0 %v3902_v40 }
  0xec   : > { %2812 = vmatprep.subr.bf16.mxu0 %v4556_v16 }
  0xef   : > { %2813 = vmatpush3.bf16.msra.mxu0 %v3913_v43 }
  0xf0   : > { %2814 = vmatprep.subr.bf16.mxu0 %v4556_v16 }
  0xf3   : > { %2815 = vmatpush3.bf16.msra.mxu0 %v3923_v46 }
  0xf4   : > { %2820 = vmatprep.subr.bf16.mxu0 %v4556_v16 }
 0x157   : > { %v2752_v8 = vpop.f32.mrb[0].mxu1 }
 0x158   : > { %v4034_v9 = vadd.f32 %v2752_v8, %v4031_v5  ;;  %v4036_v10 = vpop.f32.mrb[1].mxu1  ;;  %v4049_v8 = vrot.slane %v830_v35, %v666_v60 }
 0x159   : > { %v2753_v17 = vpop.f32.mrb[2].mxu1  ;;  %v742_v31 = vpop.f32.mrb[0].mxu0 }
 0x15a   : > { %4627 = vst [vmem:[#allocation49_spill] sm:$0xff] %v4034_v9  ;;  %v4042_v1 = vadd.f32 %v2753_v17, %v4031_v5  ;;  %v798_v6 = vpop.f32.mrb[3].mxu1  ;;  %v663_v9 = vrot.slane %v658_v4, %v662_v12  ;;  %v744_v2 = vpop.f32.mrb[1].mxu0 }
 0x15b   : > { %v4045_v16 = vadd.f32 %v798_v6, %v4031_v5  ;;  %v746_v27 = vpop.f32.mrb[2].mxu0 }
 0x15c   : > { %4628 = vst [vmem:[#allocation50_spill] sm:$0xff] %v4042_v1  ;;  %v4060_v40 = vadd.f32 %v746_v27, %v663_v9  ;;  %v748_v12 = vpop.f32.mrb[3].mxu0 }
 0x15d   : > { %4629 = vst [vmem:[#allocation51_spill] sm:$0xff] %v4045_v16  ;;  %v4065_v4 = vadd.f32 %v748_v12, %v667_v30 }
 0x15e   : > { %4633 = vst [vmem:[#allocation55_spill] sm:$0xff] %v4060_v40 }
 0x15f   : > { %v913_v46 = vpop.f32.mrb[4].mxu1  ;;  %4635 = vst [vmem:[#allocation57_spill] sm:$0xff] %v4065_v4 }
 0x160   : > { %v4052_v43 = vadd.f32 %v913_v46, %v4047_v34  ;;  %v915_v28 = vpop.f32.mrb[5].mxu1 }
 0x161   : > { %v4055_v17 = vadd.f32 %v915_v28, %v4049_v8  ;;  %v917_v1 = vpop.f32.mrb[6].mxu1  ;;  %v752_v46 = vpop.f32.mrb[4].mxu0 }
 0x162   : > { %4630 = vst [vmem:[#allocation52_spill] sm:$0xff] %v4052_v43  ;;  %v4058_v6 = vadd.f32 %v917_v1, %v4047_v34  ;;  %v919_v16 = vpop.f32.mrb[7].mxu1  ;;  %v4067_v43 = vadd.f32 %v752_v46, %v663_v9  ;;  %v754_v28 = vpop.f32.mrb[5].mxu0  ;;  %v4081_v46 = vrot.slane %v830_v35, %v670_v3 }
 0x163   : > { %4631 = vst [vmem:[#allocation53_spill] sm:$0xff] %v4055_v17  ;;  %v4063_v25 = vadd.f32 %v919_v16, %v4049_v8  ;;  %v4072_v1 = vadd.f32 %v754_v28, %v667_v30 }
 0x164   : > { %4632 = vst [vmem:[#allocation54_spill] sm:$0xff] %v4058_v6  ;;  %4636 = vst [vmem:[#allocation58_spill] sm:$0xff] %v4067_v43  ;;  %v756_v6 = vpop.f32.mrb[6].mxu0 }
 0x165   : > { %4634 = vst [vmem:[#allocation56_spill] sm:$0xff] %v4063_v25  ;;  %4638 = vst [vmem:[#allocation60_spill] sm:$0xff] %v4072_v1  ;;  %v4077_v16 = vadd.f32 %v756_v6, %v663_v9  ;;  %v758_v12 = vpop.f32.mrb[7].mxu0 }
 0x166   : > { %v4079_v4 = vadd.f32 %v758_v12, %v667_v30 }
 0x167   : > { %v923_v60 = vpop.f32.mrb[8].mxu1  ;;  %4640 = vst [vmem:[#allocation62_spill] sm:$0xff] %v4077_v16  ;;  %v743_v16 = vadd.f32 %v742_v31, %v663_v9 }
 0x168   : > { %v4070_v17 = vadd.f32 %v923_v60, %v4047_v34  ;;  %v925_v24 = vpop.f32.mrb[9].mxu1  ;;  %4641 = vst [vmem:[#allocation63_spill] sm:$0xff] %v4079_v4 }
 0x169   : > { %v4075_v27 = vadd.f32 %v925_v24, %v4049_v8  ;;  %v927_v40 = vpop.f32.mrb[10].mxu1  ;;  %v2758_v43 = vpop.f32.mrb[8].mxu0 }
 0x16a   : > { %4637 = vst [vmem:[#allocation59_spill] sm:$0xff] %v4070_v17  ;;  %v929_v25 = vpop.f32.mrb[11].mxu1  ;;  %v4084_v60 = vadd.f32 %v2758_v43, %v4081_v46  ;;  %v966_v17 = vpop.f32.mrb[9].mxu0 }
 0x16b   : > { %4639 = vst [vmem:[#allocation61_spill] sm:$0xff] %v4075_v27  ;;  %v4087_v28 = vadd.f32 %v966_v17, %v4081_v46  ;;  %v4089_v1 = vpop.f32.mrb[10].mxu0  ;;  %v745_v27 = vadd.f32 %v744_v2, %v667_v30  ;;  %v4097_v30 = vld [vmem:[%s4522_s6] sm:$0xff] }
 0x16c   : > { %4642 = vst [vmem:[#allocation64_spill] sm:$0xff] %v4084_v60  ;;  %v969_v24 = vpop.f32.mrb[11].mxu0 }
 0x16d   : > { %4643 = vst [vmem:[#allocation65_spill] sm:$0xff] %v4087_v28  ;;  %v4092_v6 = vadd.f32 %v969_v24, %v4081_v46 }
 0x16f   : > { %4644 = vst [vmem:[#allocation66_spill] sm:$0xff] %v4092_v6 }
 0x17f   : > { %v1234_v12 = vpop.f32.mrb[12].mxu1 }
 0x180   : > { %v1281_v4 = vadd.f32 %v1234_v12, %v743_v16  ;;  %v1236_v3 = vpop.f32.mrb[13].mxu1 }
 0x181   : > { %v1288_v35 = vadd.f32 %v1236_v3, %v745_v27  ;;  %v1238_v37 = vpop.f32.mrb[14].mxu1 }
 0x182   : > { %v2592_v22 = vmul.f32 -1.442695, %v1281_v4  ;;  %v1239_v43 = vpop.f32.mrb[15].mxu1  ;;  %v930_v4 = vadd.f32 %v929_v25, %v4049_v8 }
 0x183   : > { %v2593_v60 = vmul.f32 -1.442695, %v1288_v35 }
 0x184   : > { %3123 = vpow2.f32 %v2592_v22  ;;  %v796_v22 = vadd.f32 %v4036_v10, %v4031_v5 }
 0x185   : > { %3125 = vpow2.f32 %v2593_v60 }
 0x189   : > { %v1275_v21 = vpop.f32.mrb[12].mxu0 }
 0x18a   : > { %v2778_v33 = vpop.f32.mrb[13].mxu0  ;;  %v1295_v37 = vadd.f32 %v1275_v21, %v4097_v30 }
 0x18b   : > { %v1278_v20 = vpop.f32.mrb[14].mxu0  ;;  %v928_v33 = vadd.f32 %v927_v40, %v4047_v34  ;;  %v4107_v34 = vld [vmem:[%s4516_s0] sm:$0xff]  ;;  %v1303_v40 = vstv %s3761_s18  ;;  %s4680_s18 = sld [smem:[#allocation68_spill]] }
 0x18c   : > { %v2779_v24 = vpop.f32.mrb[15].mxu0  ;;  %vm1304_vm2 = vcmp.lt.s32.totalorder %v1303_v40, %v4107_v34 }
 0x18e   : > { %v3124_v17 = vpop.eup %3123 }
 0x18f   : > { %v1285_v28 = vadd.f32 1.0, %v3124_v17  ;;  %v3126_v6 = vpop.eup %3125 }
 0x190   : > { %v1292_v31 = vadd.f32 1.0, %v3126_v6 }
 0x191   : > { %3127 = vrcp.f32 %v1285_v28  ;;  %s4343_s20 = scalar_lea.hbm %s4680_s18, %s2668_s28 }
 0x192   : > { %3129 = vrcp.f32 %v1292_v31 }
 0x19b   : > { %v3128_v9 = vpop.eup %3127 }
 0x19c   : > { %v1296_v2 = vmul.f32 %v3128_v9, %v1295_v37  ;;  %v3130_v3 = vpop.eup %3129 }
 0x19d   : > { %v1299_v10 = vsub.f32 1.0, %v3130_v3  ;;  %v1301_v8 = vmul.f32 %v3130_v3, %v3876_v32 }
 0x19e   : > { %v1297_v20 = vadd.f32 %v1296_v2, %v796_v22 }
 0x19f   : > { %v1477_v27 = vpop.f32.mrb[16].mxu1 }
 0x1a0   : > { %3131 = vtanh.f32 %v1297_v20  ;;  %v1524_v16 = vadd.f32 %v1477_v27, %v928_v33  ;;  %v1479_v60 = vpop.f32.mrb[17].mxu1  ;;  %v4125_v27 = vld [vmem:[%s4526_s10] sm:$0xff] }
 0x1a1   : > { %v1531_v28 = vadd.f32 %v1479_v60, %v930_v4  ;;  %v1481_v6 = vpop.f32.mrb[18].mxu1  ;;  %v4645_v4 = vmov 0.0  }
 0x1a2   : > { %v2618_v12 = vmul.f32 -1.442695, %v1524_v16  ;;  %v1482_v21 = vpop.f32.mrb[19].mxu1  ;;  %v4646_v16 = vmov 0  }
 0x1a3   : > { %v2619_v5 = vmul.f32 -1.442695, %v1531_v28 }
 0x1a4   : > { %3133 = vpow2.f32 %v2618_v12  ;;  %v978_v12 = vadd.f32 %v4089_v1, %v4081_v46 }
 0x1a5   : > { %3135 = vpow2.f32 %v2619_v5  ;;  %v1547_v5 = vstv %s1546_s13  ;;  %s4681_s13 = smov %s4680_s18 }
 0x1a6   : > { %vm1548_vm3 = vcmp.lt.s32.totalorder %v1547_v5, %v4107_v34 }
 0x1a7   : > { %vm2624_vm4 = vmpackc.low %vm1548_vm3, %vm1548_vm3 }
 0x1a9   : > { %v1518_v9 = vpop.f32.mrb[16].mxu0 }
 0x1aa   : > { %v3132_v25 = vpop.eup %3131  ;;  %v2798_v2 = vpop.f32.mrb[17].mxu0  ;;  %v1538_v28 = vadd.f32 %v1518_v9, %v4125_v27  ;;  %v4658_v9 = vld [vmem:[#allocation41_spill] sm:$0xff] }
 0x1ab   : > { %v1300_v35 = vmul.f32 %v3132_v25, %v1299_v10  ;;  %v1521_v33 = vpop.f32.mrb[18].mxu0  ;;  %v4660_v2 = vld [vmem:[#allocation48_spill] sm:$0xff] }
 0x1ac   : > { %v2799_v20 = vpop.f32.mrb[19].mxu0  ;;  %v4661_v33 = vld [vmem:[#allocation44_spill] sm:$0xff] }
 0x1ad   : > { %v1302_v43 = vadd.f32 %v1301_v8, %v1300_v35 }
 0x1ae   : > { %v3134_v17 = vpop.eup %3133 }
 0x1af   : > { %v1528_v24 = vadd.f32 1.0, %v3134_v17  ;;  %v1305_v31 = vsel %vm1304_vm2, %v1302_v43, 0.0  ;;  %v4113_v37 = vsel %vm1304_vm2, %v1302_v43, %v3876_v32  ;;  %v3136_v32 = vpop.eup %3135  ;;  %v4655_v17 = vld [vmem:[#allocation39_spill] sm:$0xff] }
 0x1b0   : > { %1306 = vst [vmem:[%s3780_s5] sm:$0xff] %v1305_v31  ;;  %v1558_v22 = vpack.c.bf16 %v4113_v37, %v4113_v37  ;;  %v1535_v60 = vadd.f32 1.0, %v3136_v32  ;;  %v4657_v31 = vld [vmem:[#allocation47_spill] sm:$0xff] }
 0x1b1   : > { %3137 = vrcp.f32 %v1528_v24  ;;  %v4656_v24 = vld [vmem:[#allocation40_spill] sm:$0xff] }
 0x1b2   : > { %1592 = vmatmul.mubr.bf16.vlgmr.msra.gmra.mrb[20].mxu1 %v1558_v22  ;;  %2817 = vmatmul.mubr.bf16.vlgmr.msra.gmra.mrb[20].mxu0 %v1558_v22  ;;  %3139 = vrcp.f32 %v1535_v60  ;;  %v4659_v22 = vld [vmem:[#allocation42_spill] sm:$0xff]  ;;  %v4662_v60 = vld [vmem:[#allocation55_spill] sm:$0xff] }
 0x1b3   : > { %1677 = vmatpush1.bf16.msra.mxu1 %v3888_v36  ;;  %2821 = vmatpush3.bf16.msra.mxu0 %v3933_v49 }
 0x1b4   : > { %1678 = vmatprep.subr.bf16.mxu1 %v3895_v38  ;;  %2822 = vmatprep.subr.bf16.mxu0 %v4645_v4 }
 0x1b5   : > { %1708 = vmatprep.mubr.bf16.mxu1 %v4646_v16  ;;  %2836 = vmatprep.mubr.msk.bf16.mxu0 %vm3497_vm1, %v4645_v4 }
 0x1b7   : > { %1679 = vmatpush1.bf16.msra.mxu1 %v3899_v39  ;;  %2823 = vmatpush3.bf16.msra.mxu0 %v3943_v52 }
 0x1b8   : > { %1680 = vmatprep.subr.bf16.mxu1 %v3905_v41  ;;  %2824 = vmatprep.subr.bf16.mxu0 %v4645_v4 }
 0x1bb   : > { %v3138_v6 = vpop.eup %3137  ;;  %1681 = vmatpush1.bf16.msra.mxu1 %v3910_v42  ;;  %2825 = vmatpush3.bf16.msra.mxu0 %v3955_v55 }
 0x1bc   : > { %v1539_v21 = vmul.f32 %v3138_v6, %v1538_v28  ;;  %1682 = vmatprep.subr.bf16.mxu1 %v3916_v44  ;;  %2826 = vmatprep.subr.bf16.mxu0 %v4645_v4  ;;  %v3140_v1 = vpop.eup %3139 }
 0x1bd   : > { %v1542_v46 = vsub.f32 1.0, %v3140_v1  ;;  %v1544_v25 = vmul.f32 %v3140_v1, %v3964_v58  ;;  %v4652_v58 = vld [vmem:[#allocation37_spill] sm:$0xff] }
 0x1be   : > { %v1540_v3 = vadd.f32 %v1539_v21, %v978_v12  ;;  %v4663_v21 = vld [vmem:[#allocation57_spill] sm:$0xff] }
 0x1bf   : > { %1683 = vmatpush1.bf16.msra.mxu1 %v3920_v45  ;;  %2827 = vmatpush3.bf16.msra.mxu0 %v3967_v59 }
 0x1c0   : > { %3141 = vtanh.f32 %v1540_v3  ;;  %1684 = vmatprep.subr.bf16.mxu1 %v3926_v47  ;;  %2828 = vmatprep.subr.bf16.mxu0 %v4645_v4 }
 0x1c3   : > { %1685 = vmatpush1.bf16.msra.mxu1 %v3930_v48  ;;  %2829 = vmatpush3.bf16.msra.mxu0 %v3975_v61 }
 0x1c4   : > { %1686 = vmatprep.subr.bf16.mxu1 %v3936_v50  ;;  %2830 = vmatprep.subr.bf16.mxu0 %v4645_v4 }
 0x1c7   : > { %1687 = vmatpush1.bf16.msra.mxu1 %v3940_v51  ;;  %2831 = vmatpush3.bf16.msra.mxu0 %v3980_v62 }
 0x1c8   : > { %1688 = vmatprep.subr.bf16.mxu1 %v3946_v53  ;;  %2832 = vmatprep.subr.bf16.mxu0 %v4645_v4 }
 0x1ca   : > { %v3142_v10 = vpop.eup %3141 }
 0x1cb   : > { %1689 = vmatpush1.bf16.msra.mxu1 %v3952_v54  ;;  %2833 = vmatpush3.bf16.msra.mxu0 %v3987_v63  ;;  %v1543_v40 = vmul.f32 %v3142_v10, %v1542_v46 }
 0x1cc   : > { %1690 = vmatprep.subr.bf16.mxu1 %v3958_v56  ;;  %2834 = vmatprep.subr.bf16.mxu0 %v4645_v4 }
 0x1cd   : > { %v1545_v8 = vadd.f32 %v1544_v25, %v1543_v40 }
 0x1cf   : > { %1691 = vmatpush1.bf16.msra.mxu1 %v3962_v57  ;;  %2835 = vmatpush3.bf16.msra.mxu0 %v3993_v0  ;;  %v4162_v35 = vsel %vm1548_vm3, %v1545_v8, 0.0  ;;  %v2625_v43 = vpack.c.bf16 %v1545_v8, %v1545_v8 }
 0x1d0   : > { %2620 = vst [vmem:[%s3782_s24 + $0x18] sm:$0xff] %v4162_v35  ;;  %1791 = vmatprep.subr.bf16.mxu1 %v3796_v7  ;;  %2840 = vmatprep.subr.bf16.mxu0 %v4645_v4  ;;  %v4647_v7 = vld [vmem:[#allocation34_spill] sm:$0xff] }
 0x1d2   : > { %2626 = vmatmul.mubr.msk.bf16.vlgmr.msra.gmra.mrb[24].mxu1 %vm2624_vm4, %v2625_v43  ;;  %2837 = vmatmul.mubr.msk.bf16.vlgmr.msra.gmra.mrb[24].mxu0 %vm2624_vm4, %v2625_v43 }
 0x1d3   : > { %1792 = vmatpush1.bf16.msra.mxu1 %v3808_v11  ;;  %2841 = vmatpush3.bf16.msra.mxu0 %v3846_v23  ;;  %v4648_v11 = vld [vmem:[#allocation43_spill] sm:$0xff] }
 0x1d4   : > { %1793 = vmatprep.subr.bf16.mxu1 %v3813_v13  ;;  %2842 = vmatprep.subr.bf16.mxu0 %v4645_v4  ;;  %v4649_v13 = vld [vmem:[#allocation35_spill] sm:$0xff] }
 0x1d5   : > { %1823 = vmatprep.mubr.bf16.mxu1 %v4646_v16  ;;  %2856 = vmatprep.mubr.msk.bf16.mxu0 %vm3497_vm1, %v4645_v4 }
 0x1d7   : > { %1794 = vmatpush1.bf16.msra.mxu1 %v3818_v14  ;;  %2843 = vmatpush3.bf16.msra.mxu0 %v3856_v26  ;;  %v4650_v14 = vld [vmem:[#allocation36_spill] sm:$0xff] }
 0x1d8   : > { %1795 = vmatprep.subr.bf16.mxu1 %v3821_v15  ;;  %2844 = vmatprep.subr.bf16.mxu0 %v4645_v4  ;;  %v4651_v15 = vld [vmem:[#allocation45_spill] sm:$0xff] }
 0x1db   : > { %1796 = vmatpush1.bf16.msra.mxu1 %v3828_v18  ;;  %2845 = vmatpush3.bf16.msra.mxu0 %v3868_v29  ;;  %v4653_v18 = vld [vmem:[#allocation38_spill] sm:$0xff] }
 0x1dc   : > { %1797 = vmatprep.subr.bf16.mxu1 %v3831_v19  ;;  %2846 = vmatprep.subr.bf16.mxu0 %v4645_v4  ;;  %v4654_v19 = vld [vmem:[#allocation46_spill] sm:$0xff] }
 0x1df   : > { %1798 = vmatpush1.bf16.msra.mxu1 %v4647_v7  ;;  %2847 = vmatpush3.bf16.msra.mxu0 %v4648_v11 }
 0x1e0   : > { %1799 = vmatprep.subr.bf16.mxu1 %v4649_v13  ;;  %2848 = vmatprep.subr.bf16.mxu0 %v4645_v4 }
 0x1e3   : > { %1800 = vmatpush1.bf16.msra.mxu1 %v4650_v14  ;;  %2849 = vmatpush3.bf16.msra.mxu0 %v4651_v15 }
 0x1e4   : > { %1801 = vmatprep.subr.bf16.mxu1 %v4652_v58  ;;  %2850 = vmatprep.subr.bf16.mxu0 %v4645_v4 }
 0x1e7   : > { %1802 = vmatpush1.bf16.msra.mxu1 %v4653_v18  ;;  %2851 = vmatpush3.bf16.msra.mxu0 %v4654_v19 }
 0x1e8   : > { %1803 = vmatprep.subr.bf16.mxu1 %v4655_v17  ;;  %2852 = vmatprep.subr.bf16.mxu0 %v4645_v4 }
 0x1eb   : > { %1804 = vmatpush1.bf16.msra.mxu1 %v4656_v24  ;;  %2853 = vmatpush3.bf16.msra.mxu0 %v4657_v31 }
 0x1ec   : > { %1805 = vmatprep.subr.bf16.mxu1 %v4658_v9  ;;  %2854 = vmatprep.subr.bf16.mxu0 %v4645_v4 }
 0x1ef   : > { %1806 = vmatpush1.bf16.msra.mxu1 %v4659_v22  ;;  %2855 = vmatpush3.bf16.msra.mxu0 %v4660_v2 }
 0x1f0   : > { %1907 = vmatprep.subr.bf16.mxu1 %v4661_v33  ;;  %2860 = vmatprep.subr.bf16.mxu0 %v4645_v4 }
 0x285   : > { %v1593_v20 = vpop.f32.mrb[20].mxu1  ;;  %v1634_v32 = vpop.f32.mrb[20].mxu0 }
 0x286   : > { %v1640_v28 = vadd.f32 %v1593_v20, %v4662_v60  ;;  %v1595_v6 = vpop.f32.mrb[21].mxu1  ;;  %v2818_v12 = vpop.f32.mrb[21].mxu0  ;;  %v1654_v14 = vadd.f32 %v1634_v32, %v4097_v30  ;;  %v4664_v20 = vld [vmem:[#allocation51_spill] sm:$0xff] }
 0x287   : > { %v1647_v3 = vadd.f32 %v1595_v6, %v4663_v21  ;;  %v1597_v1 = vpop.f32.mrb[22].mxu1  ;;  %v1637_v46 = vpop.f32.mrb[22].mxu0  ;;  %v4665_v12 = vld [vmem:[#allocation59_spill] sm:$0xff] }
 0x288   : > { %v2621_v5 = vmul.f32 -1.442695, %v1640_v28  ;;  %v1598_v10 = vpop.f32.mrb[23].mxu1  ;;  %v2819_v40 = vpop.f32.mrb[23].mxu0  ;;  %v4666_v46 = vld [vmem:[#allocation61_spill] sm:$0xff] }
 0x289   : > { %v2622_v25 = vmul.f32 -1.442695, %v1647_v3 }
 0x28a   : > { %3143 = vpow2.f32 %v2621_v5 }
 0x28b   : > { %3145 = vpow2.f32 %v2622_v25 }
 0x294   : > { %v3144_v8 = vpop.eup %3143 }
 0x295   : > { %v1644_v43 = vadd.f32 1.0, %v3144_v8  ;;  %v3146_v7 = vpop.eup %3145 }
 0x296   : > { %v1651_v13 = vadd.f32 1.0, %v3146_v7 }
 0x297   : > { %3147 = vrcp.f32 %v1644_v43 }
 0x298   : > { %3149 = vrcp.f32 %v1651_v13 }
 0x2a1   : > { %v3148_v58 = vpop.eup %3147 }
 0x2a2   : > { %v1655_v18 = vmul.f32 %v3148_v58, %v1654_v14  ;;  %v3150_v43 = vpop.eup %3149  ;;  %v1663_v14 = vstv %s1662_s15  ;;  %s4682_s15 = sand.u32 1, %s3472_s17  }
 0x2a3   : > { %v1658_v13 = vsub.f32 1.0, %v3150_v43  ;;  %vm1664_vm5 = vcmp.lt.s32.totalorder %v1663_v14, %v4107_v34 }
 0x2a4   : > { %v1656_v60 = vadd.f32 %v1655_v18, %v4664_v20  ;;  %v1660_v18 = vmul.f32 %v3150_v43, %v4113_v37 }
 0x2a5   : > { %v1710_v6 = vpop.f32.mrb[24].mxu1  ;;  %v1751_v28 = vpop.f32.mrb[24].mxu0 }
 0x2a6   : > { %3151 = vtanh.f32 %v1656_v60  ;;  %v1757_v21 = vadd.f32 %v1710_v6, %v4665_v12  ;;  %v1712_v3 = vpop.f32.mrb[25].mxu1  ;;  %v2838_v1 = vpop.f32.mrb[25].mxu0 }
 0x2a7   : > { %v1764_v5 = vadd.f32 %v1712_v3, %v4666_v46  ;;  %v1714_v10 = vpop.f32.mrb[26].mxu1  ;;  %v1754_v40 = vpop.f32.mrb[26].mxu0 }
 0x2a8   : > { %v2630_v25 = vmul.f32 -1.442695, %v1757_v21  ;;  %v1715_v8 = vpop.f32.mrb[27].mxu1  ;;  %v2839_v32 = vpop.f32.mrb[27].mxu0  ;;  %v3208_v40 = vld [vmem:[#allocation6 + $0x30] ss:$12 sps:$4 sm:$0xff]  }
 0x2a9   : > { %v2631_v7 = vmul.f32 -1.442695, %v1764_v5  ;;  %v3211_v8 = vld [vmem:[#allocation6 + $0x64] ss:$12 sps:$4 sm:$0xff]   ;;  %v3213_v32 = vld [vmem:[#allocation6 + $0x7c] ss:$12 sps:$4 sm:$0xff]  }
 0x2aa   : > { %3153 = vpow2.f32 %v2630_v25  ;;  %v3210_v25 = vld [vmem:[#allocation6 + $0x48] ss:$12 sps:$4 sm:$0xff]  }
 0x2ab   : > { %3155 = vpow2.f32 %v2631_v7  ;;  %v4669_v7 = vld [vmem:[#allocation60_spill] sm:$0xff] }
 0x2b0   : > { %v3152_v58 = vpop.eup %3151 }
 0x2b1   : > { %v1659_v20 = vmul.f32 %v3152_v58, %v1658_v13 }
 0x2b3   : > { %v1661_v60 = vadd.f32 %v1660_v18, %v1659_v20 }
 0x2b4   : > { %v3154_v6 = vpop.eup %3153 }
 0x2b5   : > { %v1761_v12 = vadd.f32 1.0, %v3154_v6  ;;  %v1665_v21 = vsel %vm1664_vm5, %v1661_v60, 0.0  ;;  %v4213_v3 = vsel %vm1664_vm5, %v1661_v60, %v4113_v37  ;;  %v3156_v46 = vpop.eup %3155 }
 0x2b6   : > { %2623 = vst [vmem:[%s3780_s5 + $0x8] sm:$0xff] %v1665_v21  ;;  %v1790_v1 = vpack.c.bf16 %v4213_v3, %v4213_v3  ;;  %v1768_v37 = vadd.f32 1.0, %v3156_v46 }
 0x2b7   : > { %3157 = vrcp.f32 %v1761_v12 }
 0x2b8   : > { %1824 = vmatmul.mubr.bf16.vlgmr.msra.gmra.mrb[28].mxu1 %v1790_v1  ;;  %2857 = vmatmul.mubr.bf16.vlgmr.msra.gmra.mrb[28].mxu0 %v1790_v1  ;;  %3159 = vrcp.f32 %v1768_v37  ;;  %v4670_v1 = vld [vmem:[#allocation49_spill] sm:$0xff] }
 0x2b9   : > { %1908 = vmatpush1.bf16.msra.mxu1 %v3888_v36  ;;  %2861 = vmatpush3.bf16.msra.mxu0 %v3933_v49  ;;  %v1771_v36 = vadd.f32 %v1751_v28, %v4125_v27  ;;  %v3207_v28 = vld [vmem:[#allocation6 + $0x34] ss:$12 sps:$4 sm:$0xff]  }
 0x2ba   : > { %1909 = vmatprep.subr.bf16.mxu1 %v3895_v38  ;;  %2862 = vmatprep.subr.bf16.mxu0 %v4645_v4 }
 0x2bb   : > { %1939 = vmatprep.mubr.bf16.mxu1 %v4646_v16  ;;  %2876 = vmatprep.mubr.msk.bf16.mxu0 %vm3497_vm1, %v4645_v4 }
 0x2bd   : > { %1910 = vmatpush1.bf16.msra.mxu1 %v3899_v39  ;;  %2863 = vmatpush3.bf16.msra.mxu0 %v3943_v52  ;;  %v4667_v39 = vld [vmem:[#allocation64_spill] sm:$0xff] }
 0x2be   : > { %1911 = vmatprep.subr.bf16.mxu1 %v3905_v41  ;;  %2864 = vmatprep.subr.bf16.mxu0 %v4645_v4 }
 0x2c1   : > { %v3158_v38 = vpop.eup %3157  ;;  %1912 = vmatpush1.bf16.msra.mxu1 %v3910_v42  ;;  %2865 = vmatpush3.bf16.msra.mxu0 %v3955_v55 }
 0x2c2   : > { %v1772_v5 = vmul.f32 %v3158_v38, %v1771_v36  ;;  %1913 = vmatprep.subr.bf16.mxu1 %v3916_v44  ;;  %2866 = vmatprep.subr.bf16.mxu0 %v4645_v4  ;;  %v3160_v41 = vpop.eup %3159  ;;  %v1780_v44 = vstv %s1779_s21  ;;  %v4671_v38 = vld [vmem:[#allocation54_spill] sm:$0xff]  ;;  %s4351_s21 = scalar_lea.sflag [#allocation8], %s4682_s15 }
 0x2c3   : > { %v1775_v42 = vsub.f32 1.0, %v3160_v41  ;;  %vm1781_vm6 = vcmp.lt.s32.totalorder %v1780_v44, %v4107_v34 }
 0x2c4   : > { %v1773_v10 = vadd.f32 %v1772_v5, %v4667_v39  ;;  %vm2636_vm7 = vmpackc.low %vm1781_vm6, %vm1781_vm6 }
 0x2c5   : > { %1914 = vmatpush1.bf16.msra.mxu1 %v3920_v45  ;;  %2867 = vmatpush3.bf16.msra.mxu0 %v3967_v59 }
 0x2c6   : > { %3161 = vtanh.f32 %v1773_v10  ;;  %1915 = vmatprep.subr.bf16.mxu1 %v3926_v47  ;;  %2868 = vmatprep.subr.bf16.mxu0 %v4645_v4 }
 0x2c9   : > { %1916 = vmatpush1.bf16.msra.mxu1 %v3930_v48  ;;  %2869 = vmatpush3.bf16.msra.mxu0 %v3975_v61  ;;  %v1777_v48 = vmul.f32 %v3160_v41, %v4162_v35  ;;  %v3205_v35 = vld [vmem:[#allocation6 + $0x1c] ss:$12 sps:$4 sm:$0xff]   ;;  %v4672_v41 = vld [vmem:[#allocation56_spill] sm:$0xff] }
 0x2ca   : > { %1917 = vmatprep.subr.bf16.mxu1 %v3936_v50  ;;  %2870 = vmatprep.subr.bf16.mxu0 %v4645_v4 }
 0x2cd   : > { %1918 = vmatpush1.bf16.msra.mxu1 %v3940_v51  ;;  %2871 = vmatpush3.bf16.msra.mxu0 %v3980_v62 }
 0x2ce   : > { %1919 = vmatprep.subr.bf16.mxu1 %v3946_v53  ;;  %2872 = vmatprep.subr.bf16.mxu0 %v4645_v4 }
 0x2d0   : > { %v3162_v45 = vpop.eup %3161 }
 0x2d1   : > { %1920 = vmatpush1.bf16.msra.mxu1 %v3952_v54  ;;  %2873 = vmatpush3.bf16.msra.mxu0 %v3987_v63  ;;  %v1776_v47 = vmul.f32 %v3162_v45, %v1775_v42  ;;  %v3203_v54 = vld [vmem:[#allocation6 + $0x4] ss:$12 sps:$4 sm:$0xff]  }
 0x2d2   : > { %1921 = vmatprep.subr.bf16.mxu1 %v3958_v56  ;;  %2874 = vmatprep.subr.bf16.mxu0 %v4645_v4  ;;  %v3204_v56 = vld [vmem:[#allocation6] ss:$12 sps:$4 sm:$0xff]  }
 0x2d3   : > { %v1778_v50 = vadd.f32 %v1777_v48, %v1776_v47 }
 0x2d5   : > { %1922 = vmatpush1.bf16.msra.mxu1 %v3962_v57  ;;  %2875 = vmatpush3.bf16.msra.mxu0 %v3993_v0  ;;  %v4256_v51 = vsel %vm1781_vm6, %v1778_v50, 0.0  ;;  %v2637_v53 = vpack.c.bf16 %v1778_v50, %v1778_v50  ;;  %v3206_v57 = vld [vmem:[#allocation6 + $0x18] ss:$12 sps:$4 sm:$0xff]  }
 0x2d6   : > { %2632 = vst [vmem:[%s3782_s24 + $0x10] sm:$0xff] %v4256_v51  ;;  %2022 = vmatprep.subr.bf16.mxu1 %v3203_v54  ;;  %2880 = vmatprep.subr.bf16.mxu0 %v4645_v4 }
 0x2d8   : > { %2638 = vmatmul.mubr.msk.bf16.vlgmr.msra.gmra.mrb[32].mxu1 %vm2636_vm7, %v2637_v53  ;;  %2877 = vmatmul.mubr.msk.bf16.vlgmr.msra.gmra.mrb[32].mxu0 %vm2636_vm7, %v2637_v53 }
 0x2d9   : > { %2023 = vmatpush1.bf16.msra.mxu1 %v3204_v56  ;;  %2881 = vmatpush3.bf16.msra.mxu0 %v3846_v23  ;;  %v3209_v23 = vld [vmem:[#allocation6 + $0x4c] ss:$12 sps:$4 sm:$0xff]  }
 0x2da   : > { %2024 = vmatprep.subr.bf16.mxu1 %v3205_v35  ;;  %2882 = vmatprep.subr.bf16.mxu0 %v4645_v4  ;;  %v1895_v35 = vstv %s1894_s29  ;;  %s3286_s29 = scalar_lea.vmem %s4345_s27, 512 }
 0x2db   : > { %2054 = vmatprep.mubr.bf16.mxu1 %v4646_v16  ;;  %2896 = vmatprep.mubr.msk.bf16.mxu0 %vm3497_vm1, %v4645_v4  ;;  %vm1896_vm8 = vcmp.lt.s32.totalorder %v1895_v35, %v4107_v34  ;;  %p3287_p3 = scmp.ne.s32.totalorder %s4345_s27, %s3286_s29 }
 0x2dd   : > { %2025 = vmatpush1.bf16.msra.mxu1 %v3206_v57  ;;  %2883 = vmatpush3.bf16.msra.mxu0 %v3856_v26  ;;  %v3212_v26 = vld [vmem:[#allocation6 + $0x60] ss:$12 sps:$4 sm:$0xff]   ;;  %p3288_p10 = pnand %p3287_p3, %p4683_p5 }
 0x2de   : > { %2026 = vmatprep.subr.bf16.mxu1 %v3207_v28  ;;  %2884 = vmatprep.subr.bf16.mxu0 %v4645_v4 }
 0x2df   : > { %p3289_p12 = pneg %p3288_p10 }
 0x2e1   : > { %2027 = vmatpush1.bf16.msra.mxu1 %v3208_v40  ;;  %2885 = vmatpush3.bf16.msra.mxu0 %v3868_v29  ;;  %v3214_v29 = vld [vmem:[#allocation6 + $0x78] ss:$12 sps:$4 sm:$0xff]  }
 0x2e2   : > { %2028 = vmatprep.subr.bf16.mxu1 %v3209_v23  ;;  %2886 = vmatprep.subr.bf16.mxu0 %v4645_v4 }
 0x2e5   : > { %2029 = vmatpush1.bf16.msra.mxu1 %v3210_v25  ;;  %2887 = vmatpush3.bf16.msra.mxu0 %v4648_v11 }
 0x2e6   : > { %2030 = vmatprep.subr.bf16.mxu1 %v3211_v8  ;;  %2888 = vmatprep.subr.bf16.mxu0 %v4645_v4 }
 0x2e9   : > { %2031 = vmatpush1.bf16.msra.mxu1 %v3212_v26  ;;  %2889 = vmatpush3.bf16.msra.mxu0 %v4651_v15 }
 0x2ea   : > { %2032 = vmatprep.subr.bf16.mxu1 %v3213_v32  ;;  %2890 = vmatprep.subr.bf16.mxu0 %v4645_v4 }
 0x2ed   : > { %2033 = vmatpush1.bf16.msra.mxu1 %v3214_v29  ;;  %2891 = vmatpush3.bf16.msra.mxu0 %v4654_v19  ;;  %v4668_v19 = vld [vmem:[#allocation58_spill] sm:$0xff] }
 0x2ee   : > { %2034 = vmatprep.subr.bf16.mxu1 %v4655_v17  ;;  %2892 = vmatprep.subr.bf16.mxu0 %v4645_v4 }
 0x2f1   : > { %2035 = vmatpush1.bf16.msra.mxu1 %v4656_v24  ;;  %2893 = vmatpush3.bf16.msra.mxu0 %v4657_v31 }
 0x2f2   : > { %2036 = vmatprep.subr.bf16.mxu1 %v4658_v9  ;;  %2894 = vmatprep.subr.bf16.mxu0 %v4645_v4 }
 0x2f5   : > { %2037 = vmatpush1.bf16.msra.mxu1 %v4659_v22  ;;  %2895 = vmatpush3.bf16.msra.mxu0 %v4660_v2 }
 0x2f6   : > { %2138 = vmatprep.subr.bf16.mxu1 %v4661_v33  ;;  %2900 = vmatprep.subr.bf16.mxu0 %v4645_v4 }
 0x38b   : > { %v1825_v11 = vpop.f32.mrb[28].mxu1  ;;  %v1866_v15 = vpop.f32.mrb[28].mxu0 }
 0x38c   : > { %v1872_v17 = vadd.f32 %v1825_v11, %v4668_v19  ;;  %v1827_v43 = vpop.f32.mrb[29].mxu1  ;;  %v2858_v24 = vpop.f32.mrb[29].mxu0  ;;  %v1886_v6 = vadd.f32 %v1866_v15, %v4097_v30  ;;  %v3215_v11 = vld [vmem:[#allocation9] ss:$12 sps:$4 sm:$0xff]   ;;  %v3216_v15 = vld [vmem:[#allocation9 + $0x1c] ss:$12 sps:$4 sm:$0xff]  }
 0x38d   : > { %v1879_v31 = vadd.f32 %v1827_v43, %v4669_v7  ;;  %v1829_v13 = vpop.f32.mrb[30].mxu1  ;;  %v1869_v9 = vpop.f32.mrb[30].mxu0  ;;  %v3218_v43 = vld [vmem:[#allocation9 + $0x34] ss:$12 sps:$4 sm:$0xff]   ;;  %v3219_v7 = vld [vmem:[#allocation9 + $0x30] ss:$12 sps:$4 sm:$0xff]  }
 0x38e   : > { %v2633_v14 = vmul.f32 -1.442695, %v1872_v17  ;;  %v1830_v58 = vpop.f32.mrb[31].mxu1  ;;  %v2859_v18 = vpop.f32.mrb[31].mxu0  ;;  %v4673_v13 = vld [vmem:[#allocation66_spill] sm:$0xff] }
 0x38f   : > { %v2634_v22 = vmul.f32 -1.442695, %v1879_v31  ;;  %v3220_v31 = vld [vmem:[#allocation9 + $0x4c] ss:$12 sps:$4 sm:$0xff]   ;;  %v3221_v9 = vld [vmem:[#allocation9 + $0x48] ss:$12 sps:$4 sm:$0xff]  }
 0x390   : > { %3163 = vpow2.f32 %v2633_v14  ;;  %v3222_v14 = vld [vmem:[#allocation9 + $0x64] ss:$12 sps:$4 sm:$0xff]   ;;  %v3223_v58 = vld [vmem:[#allocation9 + $0x60] ss:$12 sps:$4 sm:$0xff]  }
 0x391   : > { %3165 = vpow2.f32 %v2634_v22  ;;  %v3225_v22 = vld [vmem:[#allocation9 + $0x78] ss:$12 sps:$4 sm:$0xff]  }
 0x39a   : > { %v3164_v2 = vpop.eup %3163 }
 0x39b   : > { %v1876_v33 = vadd.f32 1.0, %v3164_v2  ;;  %v3166_v20 = vpop.eup %3165 }
 0x39c   : > { %v1883_v60 = vadd.f32 1.0, %v3166_v20 }
 0x39d   : > { %3167 = vrcp.f32 %v1876_v33  ;;  %v2011_v33 = vstv %s2010_s12  ;;  %s3498_s12 = smov [#allocation11]  }
 0x39e   : > { %3169 = vrcp.f32 %v1883_v60  ;;  %v3227_v60 = vld [vmem:[#allocation9 + $0x90] ss:$12 sps:$4 sm:$0xff]   ;;  %vm2012_vm9 = vcmp.lt.s32.totalorder %v2011_v33, %v4107_v34 }
 0x39f   : > { %vm2648_vm10 = vmpackc.low %vm2012_vm9, %vm2012_vm9 }
 0x3a7   : > { %v3168_v12 = vpop.eup %3167 }
 0x3a8   : > { %v1887_v21 = vmul.f32 %v3168_v12, %v1886_v6  ;;  %v3170_v53 = vpop.eup %3169  ;;  %v3228_v12 = vld [vmem:[#allocation9 + $0xac] ss:$12 sps:$4 sm:$0xff]  }
 0x3a9   : > { %v1890_v56 = vsub.f32 1.0, %v3170_v53  ;;  %v1892_v28 = vmul.f32 %v3170_v53, %v4213_v3 }
 0x3aa   : > { %v1888_v46 = vadd.f32 %v1887_v21, %v4670_v1  ;;  %v3229_v21 = vld [vmem:[#allocation9 + $0xa8] ss:$12 sps:$4 sm:$0xff]  }
 0x3ab   : > { %v1941_v37 = vpop.f32.mrb[32].mxu1  ;;  %v1982_v36 = vpop.f32.mrb[32].mxu0 }
 0x3ac   : > { %3171 = vtanh.f32 %v1888_v46  ;;  %v1988_v5 = vadd.f32 %v1941_v37, %v4671_v38  ;;  %v1943_v39 = vpop.f32.mrb[33].mxu1  ;;  %v2878_v10 = vpop.f32.mrb[33].mxu0  ;;  %v4674_v37 = vld [vmem:[#allocation62_spill] sm:$0xff] }
 0x3ad   : > { %v1995_v42 = vadd.f32 %v1943_v39, %v4672_v41  ;;  %v1945_v44 = vpop.f32.mrb[34].mxu1  ;;  %v1985_v45 = vpop.f32.mrb[34].mxu0 }
 0x3ae   : > { %v2642_v47 = vmul.f32 -1.442695, %v1988_v5  ;;  %v1946_v48 = vpop.f32.mrb[35].mxu1  ;;  %v2879_v50 = vpop.f32.mrb[35].mxu0  ;;  %v4675_v5 = vld [vmem:[#allocation63_spill] sm:$0xff] }
 0x3af   : > { %v2643_v54 = vmul.f32 -1.442695, %v1995_v42 }
 0x3b0   : > { %3173 = vpow2.f32 %v2642_v47 }
 0x3b1   : > { %3175 = vpow2.f32 %v2643_v54 }
 0x3b6   : > { %v3172_v57 = vpop.eup %3171 }
 0x3b7   : > { %v1891_v40 = vmul.f32 %v3172_v57, %v1890_v56  ;;  %v4676_v57 = vld [vmem:[#allocation50_spill] sm:$0xff] }
 0x3b9   : > { %v1893_v23 = vadd.f32 %v1892_v28, %v1891_v40 }
 0x3ba   : > { %v3174_v25 = vpop.eup %3173 }
 0x3bb   : > { %v1992_v8 = vadd.f32 1.0, %v3174_v25  ;;  %v1897_v26 = vsel %vm1896_vm8, %v1893_v23, 0.0  ;;  %v4295_v32 = vsel %vm1896_vm8, %v1893_v23, %v4213_v3  ;;  %v3176_v19 = vpop.eup %3175  ;;  %v3217_v3 = vld [vmem:[#allocation9 + $0x18] ss:$12 sps:$4 sm:$0xff]  }
 0x3bc   : > { %2635 = vst [vmem:[%s3780_s5 + $0x10] sm:$0xff] %v1897_v26  ;;  %v2021_v29 = vpack.c.bf16 %v4295_v32, %v4295_v32  ;;  %v1999_v17 = vadd.f32 1.0, %v3176_v19  ;;  %v4677_v25 = vld [vmem:[#allocation52_spill] sm:$0xff] }
 0x3bd   : > { %3177 = vrcp.f32 %v1992_v8 }
 0x3be   : > { %2055 = vmatmul.mubr.bf16.vlgmr.msra.gmra.mrb[36].mxu1 %v2021_v29  ;;  %2897 = vmatmul.mubr.bf16.vlgmr.msra.gmra.mrb[36].mxu0 %v2021_v29  ;;  %3179 = vrcp.f32 %v1999_v17 }
 0x3bf   : > { %2139 = vmatpush1.bf16.msra.mxu1 %v3215_v11  ;;  %2901 = vmatpush3.bf16.msra.mxu0 %v3933_v49  ;;  %v2002_v49 = vadd.f32 %v1982_v36, %v4125_v27  ;;  %v4678_v11 = vld [vmem:[#allocation53_spill] sm:$0xff] }
 0x3c0   : > { %2140 = vmatprep.subr.bf16.mxu1 %v3216_v15  ;;  %2902 = vmatprep.subr.bf16.mxu0 %v4645_v4 }
 0x3c1   : > { %2170 = vmatprep.mubr.bf16.mxu1 %v4646_v16  ;;  %2916 = vmatprep.mubr.msk.bf16.mxu0 %vm3497_vm1, %v4645_v4 }
 0x3c3   : > { %2141 = vmatpush1.bf16.msra.mxu1 %v3217_v3  ;;  %2903 = vmatpush3.bf16.msra.mxu0 %v3943_v52 }
 0x3c4   : > { %2142 = vmatprep.subr.bf16.mxu1 %v3218_v43  ;;  %2904 = vmatprep.subr.bf16.mxu0 %v4645_v4 }
 0x3c7   : > { %v3178_v24 = vpop.eup %3177  ;;  %2143 = vmatpush1.bf16.msra.mxu1 %v3219_v7  ;;  %2905 = vmatpush3.bf16.msra.mxu0 %v3955_v55  ;;  %v3224_v55 = vld [vmem:[#allocation9 + $0x7c] ss:$12 sps:$4 sm:$0xff]  }
 0x3c8   : > { %v2003_v16 = vmul.f32 %v3178_v24, %v2002_v49  ;;  %2144 = vmatprep.subr.bf16.mxu1 %v3220_v31  ;;  %2906 = vmatprep.subr.bf16.mxu0 %v4645_v4  ;;  %v3180_v18 = vpop.eup %3179 }
 0x3c9   : > { %v2006_v2 = vsub.f32 1.0, %v3180_v18  ;;  %v2008_v6 = vmul.f32 %v3180_v18, %v4256_v51 }
 0x3ca   : > { %v2004_v52 = vadd.f32 %v2003_v16, %v4673_v13  ;;  %v2126_v16 = vstv %s2125_s25  ;;  %s3290_s25 = sshll.u32 %s3498_s12, 4  ;;  %s3291_s25 = int_to_ptr.vmem [resolvable:$false] %s3290_s25 }
 0x3cb   : > { %2145 = vmatpush1.bf16.msra.mxu1 %v3221_v9  ;;  %2907 = vmatpush3.bf16.msra.mxu0 %v3967_v59  ;;  %v3226_v59 = vld [vmem:[#allocation9 + $0x94] ss:$12 sps:$4 sm:$0xff]   ;;  %vm2127_vm11 = vcmp.lt.s32.totalorder %v2126_v16, %v4107_v34  ;;  %s3292_s28 = scalar_lea.vmem %s3291_s25, 1024  ;;  %p3293_p0 = scmp.lt.s32.totalorder %s4345_s27, %s3291_s25 }
 0x3cc   : > { %3181 = vtanh.f32 %v2004_v52  ;;  %2146 = vmatprep.subr.bf16.mxu1 %v3222_v14  ;;  %2908 = vmatprep.subr.bf16.mxu0 %v4645_v4  ;;  %p3294_p6 = scmp.lt.s32.totalorder %s3292_s28, %s3286_s29 }
 0x3ce   : > { %p3295_p2 = por %p3294_p6, %p3293_p0 }
 0x3cf   : > { %2147 = vmatpush1.bf16.msra.mxu1 %v3223_v58  ;;  %2909 = vmatpush3.bf16.msra.mxu0 %v3975_v61 }
 0x3d0   : > { %2148 = vmatprep.subr.bf16.mxu1 %v3224_v55  ;;  %2910 = vmatprep.subr.bf16.mxu0 %v4645_v4  ;;  %p3296_p4 = pnand %p3295_p2, %p3289_p12 }
 0x3d3   : > { %2149 = vmatpush1.bf16.msra.mxu1 %v3225_v22  ;;  %2911 = vmatpush3.bf16.msra.mxu0 %v3980_v62 }
 0x3d4   : > { %2150 = vmatprep.subr.bf16.mxu1 %v3226_v59  ;;  %2912 = vmatprep.subr.bf16.mxu0 %v4645_v4 }
 0x3d6   : > { %v3182_v20 = vpop.eup %3181 }
 0x3d7   : > { %2151 = vmatpush1.bf16.msra.mxu1 %v3227_v60  ;;  %2913 = vmatpush3.bf16.msra.mxu0 %v3987_v63  ;;  %v2007_v61 = vmul.f32 %v3182_v20, %v2006_v2 }
 0x3d8   : > { %2152 = vmatprep.subr.bf16.mxu1 %v3228_v12  ;;  %2914 = vmatprep.subr.bf16.mxu0 %v4645_v4 }
 0x3d9   : > { %v2009_v62 = vadd.f32 %v2008_v6, %v2007_v61 }
 0x3db   : > { %2153 = vmatpush1.bf16.msra.mxu1 %v3229_v21  ;;  %2915 = vmatpush3.bf16.msra.mxu0 %v3993_v0  ;;  %v4323_v1 = vsel %vm2012_vm9, %v2009_v62, 0.0  ;;  %v2649_v46 = vpack.c.bf16 %v2009_v62, %v2009_v62 }
 0x3dc   : > { %2644 = vst [vmem:[%s3782_s24 + $0x8] sm:$0xff] %v4323_v1 }
 0x3de   : > { %2650 = vmatmul.mubr.msk.bf16.vlgmr.msra.gmra.mrb[40].mxu1 %vm2648_vm10, %v2649_v46  ;;  %2917 = vmatmul.mubr.msk.bf16.vlgmr.msra.gmra.mrb[40].mxu0 %vm2648_vm10, %v2649_v46 }
 0x491   : > { %v2056_v63 = vpop.f32.mrb[36].mxu1  ;;  %v2097_v51 = vpop.f32.mrb[36].mxu0 }
 0x492   : > { %v2103_v36 = vadd.f32 %v2056_v63, %v4674_v37  ;;  %v2058_v4 = vpop.f32.mrb[37].mxu1  ;;  %v2898_v38 = vpop.f32.mrb[37].mxu0  ;;  %v2117_v54 = vadd.f32 %v2097_v51, %v4097_v30 }
 0x493   : > { %v2110_v39 = vadd.f32 %v2058_v4, %v4675_v5  ;;  %v2060_v10 = vpop.f32.mrb[38].mxu1  ;;  %v2100_v41 = vpop.f32.mrb[38].mxu0 }
 0x494   : > { %v2645_v42 = vmul.f32 -1.442695, %v2103_v36  ;;  %v2061_v0 = vpop.f32.mrb[39].mxu1  ;;  %v2899_v44 = vpop.f32.mrb[39].mxu0 }
 0x495   : > { %v2646_v45 = vmul.f32 -1.442695, %v2110_v39 }
 0x496   : > { %3183 = vpow2.f32 %v2645_v42 }
 0x497   : > { %3185 = vpow2.f32 %v2646_v45 }
 0x4a0   : > { %v3184_v47 = vpop.eup %3183 }
 0x4a1   : > { %v2107_v48 = vadd.f32 1.0, %v3184_v47  ;;  %v3186_v50 = vpop.eup %3185 }
 0x4a2   : > { %v2114_v53 = vadd.f32 1.0, %v3186_v50 }
 0x4a3   : > { %3187 = vrcp.f32 %v2107_v48 }
 0x4a4   : > { %3189 = vrcp.f32 %v2114_v53 }
 0x4ad   : > { %v3188_v56 = vpop.eup %3187 }
 0x4ae   : > { %v2118_v35 = vmul.f32 %v3188_v56, %v2117_v54  ;;  %v3190_v49 = vpop.eup %3189 }
 0x4af   : > { %v2121_v7 = vsub.f32 1.0, %v3190_v49  ;;  %v2123_v52 = vmul.f32 %v3190_v49, %v4295_v32 }
 0x4b0   : > { %v2119_v28 = vadd.f32 %v2118_v35, %v4676_v57 }
 0x4b1   : > { %v2172_v40 = vpop.f32.mrb[40].mxu1  ;;  %v4331_v23 = vpop.f32.mrb[40].mxu0 }
 0x4b2   : > { %3191 = vtanh.f32 %v2119_v28  ;;  %v2219_v8 = vadd.f32 %v2172_v40, %v4677_v25  ;;  %v2174_v26 = vpop.f32.mrb[41].mxu1  ;;  %v2918_v29 = vpop.f32.mrb[41].mxu0 }
 0x4b3   : > { %v2226_v15 = vadd.f32 %v2174_v26, %v4678_v11  ;;  %v2176_v19 = vpop.f32.mrb[42].mxu1  ;;  %v2216_v30 = vpop.f32.mrb[42].mxu0 }
 0x4b4   : > { %v2654_v3 = vmul.f32 -1.442695, %v2219_v8  ;;  %v2177_v17 = vpop.f32.mrb[43].mxu1  ;;  %v2919_v43 = vpop.f32.mrb[43].mxu0 }
 0x4b5   : > { %v2655_v24 = vmul.f32 -1.442695, %v2226_v15 }
 0x4b6   : > { %3193 = vpow2.f32 %v2654_v3 }
 0x4b7   : > { %3195 = vpow2.f32 %v2655_v24 }
 0x4bc   : > { %v3192_v31 = vpop.eup %3191 }
 0x4bd   : > { %v2122_v13 = vmul.f32 %v3192_v31, %v2121_v7 }
 0x4bf   : > { %v2124_v9 = vadd.f32 %v2123_v52, %v2122_v13 }
 0x4c0   : > { %v3194_v14 = vpop.eup %3193 }
 0x4c1   : > { %v2128_v58 = vsel %vm2127_vm11, %v2124_v9, 0.0  ;;  %v2223_v55 = vadd.f32 1.0, %v3194_v14  ;;  %v2131_v18 = vsel %vm2127_vm11, %v2124_v9, %v4295_v32 }
 0x4c2   : > { %2647 = vst [vmem:[%s3780_s5 + $0x18] sm:$0xff] %v2128_v58  ;;  %2245 = vst [vmem:[#allocation2] sm:$0xff] %v2131_v18 }
 0x4c3   : > { %2247 = vst [vmem:[#allocation14] sm:$0xff] %v2131_v18  ;;  %3197 = vrcp.f32 %v2223_v55 }
 0x4c4   : > { %3299 = shalt.err (!%p3296_p4)
}
 0x4c5   : > { %s3300_s5 = scalar_lea.hbm %s4343_s20, 512  ;;  %s3304_s18 = scalar_lea.hbm %s4681_s13, 1024 }
 0x4c6   : > { %p3301_p9 = scmp.ne.s32.totalorder %s4343_s20, %s3300_s5  ;;  %p3305_p8 = scmp.lt.u32.totalorder %s4343_s20, %s4681_s13 }
 0x4c7   : > { %p3306_p13 = scmp.lt.u32.totalorder %s3304_s18, %s3300_s5  ;;  %p3308_p3 = scmp.lt.u32.totalorder %s3300_s5, %s4343_s20 }
 0x4c8   : > { %p3302_p7 = pnand %p3301_p9, %p4683_p5 }
 0x4c9   : > { %p3307_p1 = por %p3306_p13, %p3305_p8 }
 0x4ca   : > { %p3303_p11 = pneg %p3302_p7 }
 0x4cb   : > { %p3309_p10 = por %p3308_p3, %p3307_p1 }
 0x4cd   : > { %p3310_p12 = pnand %p3309_p10, %p3303_p11 }
 0x4cf   : > { %3313 = shalt.err (!%p3310_p12)
}
 0x4d0   : > { %s3499_s29 = smov 128   ;;  %s3500_s25 = smov 8   ;;  %v3196_v32 = vpop.eup %3195  ;;  %v2233_v59 = vadd.f32 %v4331_v23, %v4125_v27  ;;  %v4684_v20 = vld [vmem:[#allocation65_spill] sm:$0xff]  ;;  %v2241_v12 = vstv %s3767_s11 }
 0x4d1   : > { %2928 = dma.vmem_to_hbm [thread:$0]  (%p4683_p5), %s4345_s27, 512, %s4343_s20, %s4351_s21, %s3499_s29, %s3499_s29, %s3500_s25   ;;  %v2230_v22 = vadd.f32 1.0, %v3196_v32  ;;  %v3198_v2 = vpop.eup %3197  ;;  %vm2242_vm12 = vcmp.lt.s32.totalorder %v2241_v12, %v4107_v34 }
 0x4d2   : > { %v2234_v33 = vmul.f32 %v3198_v2, %v2233_v59  ;;  %s2254_s23 = sand.u32 1, %s3625_s22   ;;  %s4685_s27 = ssub.s32 1, %s3480_s19 }
 0x4d3   : > { %3199 = vrcp.f32 %v2230_v22  ;;  %s2669_s20 = sshll.u32 %s4685_s27, 9  ;;  %s2287_s21 = sshll.u32 %s3782_s24, 4  ;;  %s4393_s21 = int_to_ptr.vmem [resolvable:$true] %s2287_s21 }
 0x4d4   : > { %v2235_v60 = vadd.f32 %v2234_v33, %v4684_v20  ;;  %s3501_s28 = smov [#allocation14]   ;;  %s3502_s16 = smov [#allocation15]  }
 0x4d5   : > { %s2303_s5 = sshll.u32 %s3501_s28, 4  ;;  %s2316_s14 = sshll.u32 %s3502_s16, 4  ;;  %s4395_s5 = int_to_ptr.vmem [resolvable:$true] %s2303_s5  ;;  %s4398_s14 = int_to_ptr.vmem [resolvable:$true] %s2316_s14 }
 0x4d6   : > { %3201 = vtanh.f32 %v2235_v60  ;;  %s4686_s11 = sld [smem:[#allocation69_spill]]  ;;  %s4400_s19 = scalar_lea.sflag [#allocation13], %s2254_s23 }
 0x4d7   : > { %s3314_s27 = scalar_lea.vmem %s4393_s21, 512  ;;  %p4687_p0 = scmp.ne.s32.totalorder %s4600_s26, 0 }
 0x4d8   : > { %p3315_p5 = scmp.ne.s32.totalorder %s4393_s21, %s3314_s27 }
 0x4da   : > { %p3316_p6 = pnand %p3315_p5, %p4687_p0 }
 0x4dc   : > { %s4391_s12 = scalar_lea.hbm %s4686_s11, %s2669_s20  ;;  %p3317_p2 = pneg %p3316_p6 }
 0x4dd   : > { %v3200_v61 = vpop.eup %3199  ;;  %s3503_s20 = smov [#allocation12]  }
 0x4de   : > { %v2237_v6 = vsub.f32 1.0, %v3200_v61  ;;  %v2239_v46 = vmul.f32 %v3200_v61, %v4323_v1  ;;  %s3318_s28 = sshll.u32 %s3503_s20, 4  ;;  %s3319_s28 = int_to_ptr.vmem [resolvable:$false] %s3318_s28 }
 0x4df   : > { %s3320_s16 = scalar_lea.vmem %s3319_s28, 1024  ;;  %p3321_p4 = scmp.lt.s32.totalorder %s4393_s21, %s3319_s28 }
 0x4e0   : > { %v3202_v62 = vpop.eup %3201  ;;  %p3322_p9 = scmp.lt.s32.totalorder %s3320_s16, %s3314_s27 }
 0x4e1   : > { %v2238_v21 = vmul.f32 %v3202_v62, %v2237_v6 }
 0x4e2   : > { %p3323_p7 = por %p3322_p9, %p3321_p4 }
 0x4e3   : > { %v2240_v27 = vadd.f32 %v2239_v46, %v2238_v21 }
 0x4e4   : > { %p3324_p11 = pnand %p3323_p7, %p3317_p2 }
 0x4e5   : > { %v2243_v1 = vsel %vm2242_vm12, %v2240_v27, 0.0 }
 0x4e6   : > { %2246 = vst [vmem:[#allocation3] sm:$0xff] %v2243_v1  ;;  %2244 = vst [vmem:[%s3782_s24] sm:$0xff] %v2243_v1 }
 0x4e7   : > { %2248 = vst [vmem:[#allocation15] sm:$0xff] %v2243_v1 }
 0x4e8   : > { %3327 = shalt.err (!%p3324_p11)
}
 0x4e9   : > { %s3328_s24 = scalar_lea.hbm %s4391_s12, 512  ;;  %s3332_s15 = scalar_lea.hbm %s4686_s11, 1024 }
 0x4ea   : > { %p3329_p8 = scmp.ne.s32.totalorder %s4391_s12, %s3328_s24  ;;  %p3333_p3 = scmp.lt.u32.totalorder %s4391_s12, %s4686_s11 }
 0x4eb   : > { %p3334_p10 = scmp.lt.u32.totalorder %s3332_s15, %s3328_s24  ;;  %p3336_p5 = scmp.lt.u32.totalorder %s3328_s24, %s4391_s12 }
 0x4ec   : > { %p3330_p13 = pnand %p3329_p8, %p4687_p0 }
 0x4ed   : > { %p3335_p12 = por %p3334_p10, %p3333_p3 }
 0x4ee   : > { %p3331_p1 = pneg %p3330_p13 }
 0x4ef   : > { %p3337_p6 = por %p3336_p5, %p3335_p12 }
 0x4f1   : > { %p3338_p2 = pnand %p3337_p6, %p3331_p1 }
 0x4f3   : > { %3341 = shalt.err (!%p3338_p2)
}
 0x4f4   : > { %2929 = dma.vmem_to_hbm [thread:$0]  (%p4687_p0), %s4393_s21, 512, %s4391_s12, %s4400_s19, %s3499_s29, %s3499_s29, %s3500_s25  }
 0x4f5   : > { %s3342_s27 = scalar_lea.vmem %s4395_s5, 128  ;;  %p4688_p9 = scmp.eq.s32.totalorder %s3625_s22, 1 }
 0x4f6   : > { %p3343_p4 = scmp.ne.s32.totalorder %s4395_s5, %s3342_s27  ;;  %p3349_p8 = scmp.lt.s32.totalorder %s4395_s5, %s4395_s5 }
 0x4f7   : > { %p3350_p13 = scmp.lt.s32.totalorder %s3342_s27, %s3342_s27 }
 0x4f8   : > { %p3344_p7 = pnand %p3343_p4, %p4688_p9 }
 0x4f9   : > { %p3351_p1 = por %p3350_p13, %p3349_p8 }
 0x4fa   : > { %p3345_p11 = pneg %p3344_p7 }
 0x4fc   : > { %p3352_p3 = pnand %p3351_p1, %p3345_p11 }
 0x4fe   : > { %3355 = shalt.err (!%p3352_p3)
}
 0x4ff   : > { %s4689_s24 = sld [smem:[#allocation70_spill]]  ;;  %p4690_p10 = pmov %p4688_p9 }
 0x505   : > { %s3356_s23 = scalar_lea.hbm %s4689_s24, 128 }
 0x506   : > { %p3357_p0 = scmp.ne.s32.totalorder %s4689_s24, %s3356_s23  ;;  %p3362_p6 = scmp.lt.u32.totalorder %s3356_s23, %s4689_s24 }
 0x508   : > { %p3358_p12 = pnand %p3357_p0, %p4690_p10 }
 0x50a   : > { %p3359_p5 = pneg %p3358_p12 }
 0x50c   : > { %p3364_p2 = pnand %p3362_p6, %p3359_p5 }
 0x50e   : > { %3367 = shalt.err (!%p3364_p2)
}
 0x50f   : > { %p4691_p4 = pmov %p4688_p9  ;;  %s3368_s19 = scalar_lea.vmem %s4398_s14, 128 }
 0x510   : > { %p3369_p9 = scmp.ne.s32.totalorder %s4398_s14, %s3368_s19  ;;  %p3375_p13 = scmp.lt.s32.totalorder %s4398_s14, %s4398_s14 }
 0x511   : > { %2931 = dma.vmem_to_hbm [thread:$0]  (%p4691_p4), %s4395_s5, 128, %s4689_s24, [#allocation13]  }
 0x512   : > { %p4692_p7 = pmov %p4691_p4  ;;  %p3376_p1 = scmp.lt.s32.totalorder %s3368_s19, %s3368_s19 }
 0x514   : > { %p3370_p11 = pnand %p3369_p9, %p4692_p7  ;;  %p3377_p3 = por %p3376_p1, %p3375_p13 }
 0x516   : > { %p3371_p8 = pneg %p3370_p11 }
 0x518   : > { %p3378_p0 = pnand %p3377_p3, %p3371_p8 }
 0x51a   : > { %3381 = shalt.err (!%p3378_p0)
}
 0x51b   : > { %s4693_s27 = sld [smem:[#allocation71_spill]]  ;;  %p4694_p12 = pmov %p4691_p4 }
 0x521   : > { %s3382_s26 = scalar_lea.hbm %s4693_s27, 128 }
 0x522   : > { %p3383_p10 = scmp.ne.s32.totalorder %s4693_s27, %s3382_s26  ;;  %p3388_p2 = scmp.lt.u32.totalorder %s3382_s26, %s4693_s27 }
 0x524   : > { %p3384_p5 = pnand %p3383_p10, %p4694_p12 }
 0x526   : > { %p3385_p6 = pneg %p3384_p5 }
 0x528   : > { %p3390_p4 = pnand %p3388_p2, %p3385_p6 }
 0x52a   : > { %3393 = shalt.err (!%p3390_p4)
}
 0x52b   : > { %p4695_p9 = pmov %p4692_p7 }
 0x52d   : > { %2933 = dma.vmem_to_hbm [thread:$0]  (%p4695_p9), %s4398_s14, 128, %s4693_s27, [#allocation16]  }
 0x52e   : > { %3439 = dma.done.wait (%p4692_p7), [#allocation13], 128   ;;  %p4696_p11 = pmov %p4692_p7 }
 0x52f   : > { %p4697_p8 = pmov %p4692_p7 }
 0x530   : > { %3441 = vsyncadd (%p4696_p11), [#allocation13], 4294967168 }
 0x531   : > { %3443 = dma.done.wait (%p4697_p8), [#allocation16], 128   ;;  %p4698_p13 = pmov %p4692_p7 }
 0x533   : > { %3445 = vsyncadd (%p4698_p13), [#allocation16], 4294967168 }
 0x534 PF: > { %s4699_s25 = sld [smem:[#allocation27_spill]]  ;;  %s4700_s21 = sld [smem:[#allocation24_spill]] }
 0x535   : > { %s4701_s12 = sld [smem:[#allocation30_spill]] }
 0x53a   : > { %p2962_p1 = scmp.ge.s32.totalorder %s4699_s25, 2  ;;  %s2336_s19 = sand.u32 1, %s4700_s21  }
 0x53b   : > { %p4702_p3 = scmp.ne.s32.totalorder %s4701_s12, 0  ;;  %s2337_s14 = scalar_lea.sflag [#allocation8], %s2336_s19 }
 0x53d   : > { %p2948_p0 = pnand %p2962_p1, %p4702_p3 }
 0x53f   : > { %3447 = dma.done.wait (!%p2948_p0), %s2337_s14, 512  }
 0x540   : > { %3449 = vsyncadd (!%p2948_p0), %s2337_s14, 4294966784  ;;  %s4703_s20 = sadd.s32 4294967294, %s4699_s25   ;;  %s4704_s28 = sld [smem:[#allocation33_spill]] }
 0x541   : > { %s2345_s26 = sand.u32 1, %s4703_s20  }
 0x542   : > { %s2346_s16 = scalar_lea.sflag [#allocation13], %s2345_s26 }
 0x546   : > { %p4705_p10 = scmp.ne.s32.totalorder %s4704_s28, 0 }
 0x548   : > { %p2951_p12 = pnand %p2962_p1, %p4705_p10 }
 0x54a   : > { %3451 = dma.done.wait (!%p2951_p12), %s2346_s16, 512  }
 0x54b   : > { %3453 = vsyncadd (!%p2951_p12), %s2346_s16, 4294966784  ;;  %s34_s21 = sadd.s32 1, %s4699_s25   ;;  %s4706_s22 = sld [smem:[#allocation23_spill]] }
 0x54c   : > { %p31_p5 = scmp.ge.s32.totalorder %s34_s21, 4   ;;  %s4707_s15 = sld [smem:[#allocation32_spill]] }
 0x54d   : > { %s4708_s23 = sld [smem:[#allocation25_spill]]  ;;  %s4709_s18 = sld [smem:[#allocation31_spill]] }
 0x54e   : > { %s4710_s19 = sld [smem:[#allocation26_spill]]  ;;  %s4711_s20 = sld [smem:[#allocation28_spill]] }
 0x54f   : > { %s4712_s29 = smov %s3460_s30  ;;  %s4714_s16 = smov %s3472_s17 }
 0x550   :  { %33 = sbr.rel (!%p31_p5) target bundleno = 17 (0x11), region = 173 }
 0x551   : > { %s4713_s30 = smov %s4706_s22 }
 0x553   : > { %s4715_s17 = smov %s4708_s23 }
 0x557   :  { %2351 = vsyncpa [#allocation7], 1 }
 0x558   :  { %2353 = vsyncpa [#allocation7 + $0x1], 1 }
 0x559   :  { %2354 = vsyncpa [#allocation10], 1 }
 0x55a   :  { %2355 = vsyncpa [#allocation8], 1 }
 0x55b   :  { %2357 = vsyncpa [#allocation8 + $0x1], 1 }
 0x55c   :  { %2358 = vsyncpa [#allocation13], 1 }
 0x55d   :  { %2360 = vsyncpa [#allocation13 + $0x1], 1 }
 0x55e   :  { %2361 = vsyncpa [#allocation16], 1 }

// kernel: tpu_custom_call.1
= control target key start
LH: loop header
LB: loop body
LE: loop exit
PB: predicated region body
PF: predicated region fallthrough
CT: control target
= control target key end

     0   :  { %s4516_s0 = inlined_call_operand.vmem [shape: s32[8,128], index: 0, kind: input, shape index: {}]   ;;  %s4517_s1 = inlined_call_operand.vmem [shape: bf16[64,16], index: 1, kind: input, shape index: {}]   ;;  %s4518_s2 = inlined_call_operand.vmem [shape: bf16[64,16], index: 2, kind: input, shape index: {}]   ;;  %s4519_s3 = inlined_call_operand.vmem [shape: bf16[16,384], index: 3, kind: input, shape index: {}]   ;;  %s4520_s4 = inlined_call_operand.vmem [shape: f32[1,384], index: 4, kind: input, shape index: {}]   ;;  %s4521_s5 = inlined_call_operand.hbm [shape: bf16[128,384], index: 5, kind: input, shape index: {}]   ;;  %s4522_s6 = inlined_call_operand.vmem [shape: f32[8,128], index: 6, kind: input, shape index: {}]   ;;  %s4523_s7 = inlined_call_operand.vmem [shape: bf16[16,384], index: 7, kind: input, shape index: {}]   ;;  %s4524_s8 = inlined_call_operand.vmem [shape: f32[1,384], index: 8, kind: input, shape index: {}]   ;;  %s4525_s9 = inlined_call_operand.hbm [shape: bf16[128,384], index: 9, kind: input, shape index: {}]   ;;  %s4526_s10 = inlined_call_operand.vmem [shape: f32[8,128], index: 10, kind: input, shape index: {}]   ;;  %s4527_s11 = inlined_call_operand.hbm [shape: f32[8,8,128], index: 11, kind: output, shape index: {0}]   ;;  %s4528_s12 = inlined_call_operand.hbm [shape: f32[8,8,128], index: 12, kind: output, shape index: {1}]   ;;  %s4529_s13 = inlined_call_operand.hbm [shape: f32[8,128], index: 13, kind: output, shape index: {2}]   ;;  %s4530_s14 = inlined_call_operand.hbm [shape: f32[8,128], index: 14, kind: output, shape index: {3}]  }
   0x1   :  { %4583 = sst [smem:[#allocation67_spill]] %s4521_s5 }
   0x2   :  { %4584 = sst [smem:[#allocation68_spill]] %s4527_s11 }
   0x3   :  { %4585 = sst [smem:[#allocation69_spill]] %s4528_s12 }
   0x4   :  { %4586 = sst [smem:[#allocation70_spill]] %s4529_s13 }
   0x5   :  { %4587 = sst [smem:[#allocation71_spill]] %s4530_s14 }
   0x6   :  { %20 = vsyncpa [#allocation7], 0 }
   0x7   :  { %21 = vsyncpa [#allocation10], 0 }
   0x8   :  { %22 = vsyncpa [#allocation8], 0 }
   0x9   :  { %24 = vsyncpa [#allocation8 + $0x1], 0 }
   0xa   :  { %25 = vsyncpa [#allocation13], 0 }
   0xb   :  { %27 = vsyncpa [#allocation13 + $0x1], 0 }
   0xc   :  { %28 = vsyncpa [#allocation16], 0  ;;  %s3579_s29 = smov 0   ;;  %s3581_s30 = smov 0  }
   0xd   :  { %s3583_s15 = smov 0   ;;  %s3585_s16 = smov 0  }
   0xe   :  { %s3587_s17 = smov 0   ;;  %s3589_s18 = smov 0  }
   0xf   :  { %s3591_s19 = smov 0   ;;  %s3593_s20 = smov 0  }
  0x10   :  { %s3595_s21 = smov 0  }
  0x11 LB: > { %4588 = sst [smem:[#allocation23_spill]] %s3464_s15  ;;  %s3625_s22 = sadd.s32 4294967295, %s3488_s21   ;;  %s3488_s21 = sphi %s3595_s21, %s34_s21   ;;  %s3484_s20 = sphi %s3593_s20, %s4711_s20   ;;  %s3480_s19 = sphi %s3591_s19, %s4710_s19   ;;  %s3476_s18 = sphi %s3589_s18, %s4709_s18   ;;  %s3472_s17 = sphi %s3587_s17, %s4715_s17   ;;  %s3468_s16 = sphi %s3585_s16, %s4714_s16   ;;  %s3464_s15 = sphi %s3583_s15, %s4707_s15   ;;  %s3460_s30 = sphi %s3581_s30, %s4713_s30   ;;  %s3456_s29 = sphi %s3579_s29, %s4712_s29  }
  0x12   : > { %4589 = sst [smem:[#allocation24_spill]] %s3468_s16  ;;  %s4536_s23 = sadd.s32 4294967294, %s3488_s21  }
  0x13   : > { %4590 = sst [smem:[#allocation25_spill]] %s3476_s18  ;;  %s43_s24 = sadd.s32 1, %s3484_s20 }
  0x14   : > { %4591 = sst [smem:[#allocation26_spill]] %s3484_s20  ;;  %s321_s25 = sadd.s32 1, %s3476_s18 }
  0x15   : > { %4592 = sst [smem:[#allocation27_spill]] %s3488_s21  ;;  %p44_p0 = scmp.ge.s32.totalorder %s43_s24, 2 }
  0x16   : > { %p331_p1 = scmp.ne.s32.totalorder %s3476_s18, %s3472_s17  ;;  %p4543_p2 = scmp.eq.s32.totalorder %s3625_s22, 1 }
  0x17   : > { %p337_p3 = scmp.ne.s32.totalorder %s3472_s17, %s3468_s16  ;;  %s4717_s24 = smov (%p44_p0, %s43_s24), 0 }
  0x18   : > { %4593 = sst [smem:[#allocation28_spill]] %s4717_s24  ;;  %p3639_p4 = por %p4543_p2, %p331_p1 }
  0x19   : > { %p3645_p5 = scmp.eq.s32.totalorder %s4536_s23, 1  ;;  %s316_s28 = ssub.s32 %s3484_s20, %s4717_s24 }
  0x1a   : > { %s4594_s26 = scalar_select %p3639_p4, 1, 0 }
  0x1b   : > { %s344_s16 = ssub.s32 1, %s3484_s20  ;;  %p319_p6 = scmp.eq.s32.totalorder %s316_s28, 0 }
  0x1c   : > { %4595 = sst [smem:[#allocation29_spill]] %s4594_s26  ;;  %p3654_p7 = por %p3645_p5, %p337_p3 }
  0x1d   : > { %s345_s13 = ssub.s32 1, %s4717_s24  ;;  %s351_s12 = sadd.s32 1, %s3464_s15 }
  0x1e   : > { %s4597_s14 = scalar_select %p3654_p7, 1, 0 }
  0x1f   : > { %s3661_s11 = scalar_select %p319_p6, %s3476_s18, %s321_s25  }
  0x20   : > { %4598 = sst [smem:[#allocation30_spill]] %s4597_s14  ;;  %s346_s23 = ssub.s32 %s344_s16, %s345_s13 }
  0x21   : > { %4599 = sst [smem:[#allocation31_spill]] %s3661_s11  ;;  %p361_p8 = scmp.ne.s32.totalorder %s3464_s15, %s3460_s30 }
  0x22   : > { %p349_p9 = scmp.eq.s32.totalorder %s346_s23, 0  ;;  %p367_p10 = scmp.ne.s32.totalorder %s3460_s30, %s3456_s29 }
  0x23   : > { %p3669_p11 = por %p361_p8, %p4543_p2  ;;  %p2531_p12 = scmp.ge.s32.totalorder %s3488_s21, 1 }
  0x24   : > { %s3675_s28 = scalar_select %p349_p9, %s3464_s15, %s351_s12  }
  0x25   : > { %s4600_s26 = scalar_select %p3669_p11, 1, 0 }
  0x26   : > { %4601 = sst [smem:[#allocation32_spill]] %s3675_s28  ;;  %p3679_p13 = por %p367_p10, %p3645_p5 }
  0x27   : > { %p427_p0 = scmp.lt.s32.totalorder %s3488_s21, 3  ;;  %p4544_p1 = scmp.eq.s32.totalorder %s3625_s22, 0 }
  0x28   : > { %s4602_s20 = scalar_select %p3679_p13, 1, 0 }
  0x29   : > { %p3685_p3 = pnand %p2531_p12, %p427_p0  ;;  %s3490_s29 = smov [#allocation6]  }
  0x2a   : > { %4603 = sst [smem:[#allocation33_spill]] %s4602_s20  ;;  %s452_s16 = sshll.u32 %s3490_s29, 4  ;;  %s453_s16 = int_to_ptr.vmem [resolvable:$true] %s452_s16 }
  0x2b   : > { %s4604_s13 = scalar_select %p3685_p3, 1, 0 }
  0x2c   : > { %p2940_p6 = pneg %p3685_p3  ;;  %s3491_s23 = smov [#allocation9]  }
  0x2d   : > { %s478_s25 = sshll.u32 %s3491_s23, 4  ;;  %s4606_s5 = sld [smem:[#allocation67_spill]]  ;;  %s3697_s25 = int_to_ptr.vmem [resolvable:$true] %s478_s25 }
  0x2e   : > { %p3693_p8 = pnand %p4544_p1, %p2940_p6 }
  0x30   : > { %p3232_p9 = pneg %p3693_p8 }
  0x33   : > { %s3230_s11 = scalar_lea.hbm %s4606_s5, 3072 }
  0x34   : > { %p3231_p5 = scmp.ne.s32.totalorder %s4606_s5, %s3230_s11  ;;  %p3237_p0 = scmp.lt.u32.totalorder %s3230_s11, %s4606_s5 }
  0x36   : > { %p3233_p10 = pnand %p3232_p9, %p3231_p5 }
  0x38   : > { %p3234_p12 = pneg %p3233_p10 }
  0x3a   : > { %p3239_p6 = pnand %p3237_p0, %p3234_p12 }
  0x3c   : > { %3242 = shalt.err (!%p3239_p6)
}
  0x3d   : > { %s3243_s23 = scalar_lea.vmem %s453_s16, 3072  ;;  %p3251_p7 = scmp.lt.s32.totalorder %s453_s16, %s453_s16 }
  0x3e   : > { %p3244_p2 = scmp.ne.s32.totalorder %s453_s16, %s3243_s23  ;;  %p3252_p11 = scmp.lt.s32.totalorder %s3243_s23, %s3243_s23 }
  0x40   : > { %p3246_p1 = pnand %p3244_p2, %p3232_p9  ;;  %p3253_p4 = por %p3252_p11, %p3251_p7 }
  0x42   : > { %p3247_p13 = pneg %p3246_p1 }
  0x44   : > { %p3254_p3 = pnand %p3253_p4, %p3247_p13 }
  0x46   : > { %3257 = shalt.err (!%p3254_p3)
}
  0x47   : > { %s3492_s18 = smov 192   ;;  %s3493_s24 = smov 12  }
  0x48   : > { %2943 = dma.hbm_to_vmem [thread:$0]  (!%p3693_p8), %s4606_s5, 3072, %s453_s16, [#allocation7], %s3492_s18, %s3492_s18, %s3493_s24  }
  0x49   : > { %s3258_s29 = scalar_lea.hbm %s4525_s9, 3072 }
  0x4a   : > { %p3259_p2 = scmp.ne.s32.totalorder %s4525_s9, %s3258_s29  ;;  %p3265_p11 = scmp.lt.u32.totalorder %s3258_s29, %s4525_s9 }
  0x4c   : > { %p3261_p4 = pnand %p3259_p2, %p3232_p9 }
  0x4e   : > { %p3262_p7 = pneg %p3261_p4 }
  0x50   : > { %p3267_p13 = pnand %p3265_p11, %p3262_p7 }
  0x52   : > { %3270 = shalt.err (!%p3267_p13)
}
  0x53   : > { %s3271_s16 = scalar_lea.vmem %s3697_s25, 3072  ;;  %p3279_p10 = scmp.lt.s32.totalorder %s3697_s25, %s3697_s25 }
  0x54   : > { %p3272_p1 = scmp.ne.s32.totalorder %s3697_s25, %s3271_s16  ;;  %p3280_p12 = scmp.lt.s32.totalorder %s3271_s16, %s3271_s16 }
  0x56   : > { %p3274_p3 = pnand %p3272_p1, %p3232_p9  ;;  %p3281_p0 = por %p3280_p12, %p3279_p10 }
  0x58   : > { %p3275_p5 = pneg %p3274_p3 }
  0x5a   : > { %p3282_p6 = pnand %p3281_p0, %p3275_p5 }
  0x5c   : > { %3285 = shalt.err (!%p3282_p6)
}
  0x5d   : > { %2946 = dma.hbm_to_vmem [thread:$0]  (!%p3693_p8), %s4525_s9, 3072, %s3697_s25, [#allocation10], %s3492_s18, %s3492_s18, %s3493_s24  }
  0x5e   : > { %p4607_p2 = scmp.ne.s32.totalorder %s4604_s13, 0 }
  0x60   : > { %529 = sbr.rel (%p4607_p2) target bundleno = 1332 (0x534), region = 64 }
  0x67   : > { %p4608_p4 = scmp.eq.s32.totalorder %s3625_s22, 0 }
  0x69   : > { %3431 = dma.done.wait (%p4608_p4), [#allocation7], 3072   ;;  %p4609_p9 = pmov %p4608_p4 }
  0x6a   : > { %p4610_p7 = pmov %p4608_p4 }
  0x6b   : > { %3433 = vsyncadd (%p4609_p9), [#allocation7], 4294964224 }
  0x6c   : > { %3435 = dma.done.wait (%p4610_p7), [#allocation10], 3072   ;;  %p4611_p11 = pmov %p4608_p4 }
  0x6d   : > { %s4552_s21 = sand.u32 1, %s3472_s17   ;;  %s599_s13 = sand.u32 1, %s3460_s30  }
  0x6e   : > { %3437 = vsyncadd (%p4611_p11), [#allocation10], 4294964224  ;;  %s2541_s12 = sshll.u32 %s4552_s21, 5  ;;  %s2542_s25 = sshll.u32 %s599_s13, 5 }
  0x6f   : > { %s3761_s18 = sshll.u32 %s3480_s19, 2  ;;  %s4553_s24 = ssub.s32 1, %s3480_s19 }
  0x70   : > { %p613_p8 = scmp.lt.s32.totalorder %s3761_s18, 7  ;;  %s3767_s11 = sshll.u32 %s4553_s24, 2 }
  0x71   : > { %p624_p13 = scmp.lt.s32.totalorder %s3767_s11, 7  ;;  %s3780_s5 = scalar_lea.vmem [#allocation11], %s2541_s12 }
  0x72   : > { %s614_s15 = scalar_select %p613_p8, %s3761_s18, 7 }
  0x73   : > { %s625_s28 = scalar_select %p624_p13, %s3767_s11, 7 }
  0x74   : > { %s2544_s27 = sshll.u32 %s614_s15, 2  ;;  %s3782_s24 = scalar_lea.vmem [#allocation12], %s2542_s25 }
  0x75   : > { %s616_s16 = scalar_lea.vmem %s4517_s1, %s2544_s27  ;;  %s2546_s14 = sshll.u32 %s625_s28, 2 }
  0x76   : > { %s3778_s21 = scalar_lea.vmem %s4518_s2, %s2546_s14  ;;  %p2547_p1 = scmp.ne.s32.totalorder %s3480_s19, 0 }
  0x77   : > { %v3494_v0 = vmov (!%p2547_p1), 0.0  }
  0x78   : > { %647 = sbr.rel (%p2547_p1) target bundleno = 127 (0x7f), region = 76  ;;  %648 = vst [vmem:[#allocation2] sm:$0xff] (!%p2547_p1), %v3494_v0  ;;  %649 = vst [vmem:[#allocation3] sm:$0xff] (!%p2547_p1), %v3494_v0 }
  0x7f PF: > { %v3047_v1 = vld [vmem:[%s4519_s3 + $0x8] ss:$12 sps:$4 sm:$0xff]   ;;  %v3048_v2 = vld [vmem:[%s616_s16] sm:$0xff]   ;;  %vm701_vm0 = vcmask 130048   ;;  %v4554_v6 = vmov 0   ;;  %v4556_v16 = vmov 0.0  }
  0x80   : > { %2748 = vmatprep.subr.bf16.mxu1 %v3047_v1  ;;  %v3049_v3 = vld [vmem:[%s616_s16 + $0x8] sm:$0xff]   ;;  %2750 = vmatprep.mubr.msk.bf16.mxu1 %vm701_vm0, %v3048_v2  ;;  %v3052_v5 = vld [vmem:[%s4523_s7 + $0x4] ss:$12 sps:$4 sm:$0xff]   ;;  %v3796_v7 = vld [vmem:[#allocation6 + $0x4] ss:$12 sps:$4 sm:$0xff]   ;;  %vm3497_vm1 = vmmov 0  }
  0x81   : > { %2749 = vmatpush3.bf16.msra.mxu1 %v3047_v1  ;;  %v3050_v4 = vld [vmem:[%s4523_s7] ss:$12 sps:$4 sm:$0xff]   ;;  %740 = vmatprep.mubr.bf16.mxu0 %v4554_v6  ;;  %v3059_v8 = vld [vmem:[%s4519_s3 + $0x4] ss:$12 sps:$4 sm:$0xff]   ;;  %v3066_v12 = vld [vmem:[%s4523_s7 + $0x8] ss:$12 sps:$4 sm:$0xff]   ;;  %v660_v1 = vlaneseq }
  0x82   : > { %879 = vmatprep.subr.bf16.mxu1 %v3052_v5  ;;  %v3062_v9 = vld [vmem:[%s4519_s3] ss:$12 sps:$4 sm:$0xff]   ;;  %v3808_v11 = vld [vmem:[#allocation6] ss:$12 sps:$4 sm:$0xff]   ;;  %708 = vmatprep.subr.bf16.mxu0 %v3059_v8  ;;  %v3818_v14 = vld [vmem:[#allocation6 + $0x18] ss:$12 sps:$4 sm:$0xff]  }
  0x83   : > { %v3055_v10 = vld [vmem:[%s3778_s21] sm:$0xff]   ;;  %709 = vmatpush1.bf16.msra.mxu0 %v3062_v9  ;;  %v3813_v13 = vld [vmem:[#allocation6 + $0x1c] ss:$12 sps:$4 sm:$0xff]   ;;  %v3831_v19 = vld [vmem:[#allocation6 + $0x4c] ss:$12 sps:$4 sm:$0xff]   ;;  %s1546_s13 = sadd.s32 3, %s3767_s11 }
  0x84   : > { %2751 = vmatmul.mubr.msk.bf16.vlgmr.msra.gmra.mrb[0].mxu1 %vm701_vm0, %v3049_v3  ;;  %2754 = vmatprep.subr.bf16.mxu0 %v3066_v12  ;;  %v3821_v15 = vld [vmem:[#allocation6 + $0x34] ss:$12 sps:$4 sm:$0xff]   ;;  %v3076_v17 = vld [vmem:[%s3778_s21 + $0x8] sm:$0xff]   ;;  %v3840_v21 = vld [vmem:[#allocation6 + $0x64] ss:$12 sps:$4 sm:$0xff]   ;;  %s1662_s15 = sadd.s32 1, %s3761_s18 }
  0x85   : > { %880 = vmatpush1.bf16.msra.mxu1 %v3050_v4  ;;  %911 = vmatprep.mubr.bf16.mxu1 %v4554_v6  ;;  %v3828_v18 = vld [vmem:[#allocation6 + $0x30] ss:$12 sps:$4 sm:$0xff]   ;;  %v3836_v20 = vld [vmem:[#allocation6 + $0x48] ss:$12 sps:$4 sm:$0xff]   ;;  %4613 = vst [vmem:[#allocation35_spill] sm:$0xff] %v3840_v21  ;;  %s1779_s21 = sadd.s32 2, %s3767_s11 }
  0x86   : > { %1200 = vmatprep.subr.bf16.mxu1 %v3796_v7  ;;  %2553 = vmatmul.mubr.msk.bf16.vlgmr.msra.gmra.mrb[0].mxu0 %vm701_vm0, %v3048_v2  ;;  %4612 = vst [vmem:[#allocation34_spill] sm:$0xff] %v3836_v20  ;;  %v3843_v22 = vld [vmem:[#allocation6 + $0x60] ss:$12 sps:$4 sm:$0xff]   ;;  %v3846_v23 = vld [vmem:[#allocation6 + $0x8] ss:$12 sps:$4 sm:$0xff]   ;;  %v3964_v58 = vld [vmem:[#allocation3] sm:$0xff] }
  0x87   : > { %2755 = vmatpush3.bf16.msra.mxu0 %v3066_v12  ;;  %750 = vmatprep.mubr.bf16.mxu0 %v4554_v6  ;;  %4614 = vst [vmem:[#allocation36_spill] sm:$0xff] %v3843_v22  ;;  %v3849_v24 = vld [vmem:[#allocation6 + $0x7c] ss:$12 sps:$4 sm:$0xff]   ;;  %v3851_v25 = vld [vmem:[#allocation6 + $0x78] ss:$12 sps:$4 sm:$0xff]   ;;  %v3876_v32 = vld [vmem:[#allocation2] sm:$0xff]  ;;  %v1314_v60 = vpack.c.bf16 %v3964_v58, %v3964_v58 }
  0x88   : > { %2760 = vmatprep.subr.bf16.mxu0 %v4556_v16  ;;  %4615 = vst [vmem:[#allocation37_spill] sm:$0xff] %v3849_v24  ;;  %4616 = vst [vmem:[#allocation38_spill] sm:$0xff] %v3851_v25  ;;  %v3856_v26 = vld [vmem:[#allocation6 + $0x20] ss:$12 sps:$4 sm:$0xff]   ;;  %v3865_v28 = vld [vmem:[#allocation6 + $0x90] ss:$12 sps:$4 sm:$0xff]   ;;  %v1071_v35 = vpack.c.bf16 %v3876_v32, %v3876_v32 }
  0x89   : > { %v3859_v27 = vld [vmem:[#allocation6 + $0x94] ss:$12 sps:$4 sm:$0xff]   ;;  %4618 = vst [vmem:[#allocation40_spill] sm:$0xff] %v3865_v28  ;;  %v3868_v29 = vld [vmem:[#allocation6 + $0x38] ss:$12 sps:$4 sm:$0xff]   ;;  %v661_v2 = vshrl.u32 %v660_v1, 7 }
  0x8a   : > { %4617 = vst [vmem:[#allocation39_spill] sm:$0xff] %v3859_v27  ;;  %v3871_v30 = vld [vmem:[#allocation6 + $0xac] ss:$12 sps:$4 sm:$0xff]   ;;  %v3874_v31 = vld [vmem:[#allocation6 + $0xa8] ss:$12 sps:$4 sm:$0xff]   ;;  %s1894_s29 = sadd.s32 2, %s3761_s18 }
  0x8b   : > { %4619 = vst [vmem:[#allocation41_spill] sm:$0xff] %v3871_v30  ;;  %4620 = vst [vmem:[#allocation42_spill] sm:$0xff] %v3874_v31  ;;  %v3880_v33 = vld [vmem:[#allocation6 + $0x50] ss:$12 sps:$4 sm:$0xff]   ;;  %v3888_v36 = vld [vmem:[#allocation9] ss:$12 sps:$4 sm:$0xff]  }
  0x8c   : > { %2562 = vmatmul.mubr.msk.bf16.vlgmr.msra.gmra.mrb[4].mxu1 %vm701_vm0, %v3055_v10  ;;  %4621 = vst [vmem:[#allocation43_spill] sm:$0xff] %v3880_v33  ;;  %v3883_v34 = vld [vmem:[#allocation9 + $0x4] ss:$12 sps:$4 sm:$0xff]   ;;  %v3892_v37 = vld [vmem:[#allocation6 + $0x68] ss:$12 sps:$4 sm:$0xff]   ;;  %v662_v12 = vsub.s32 0, %v661_v2 }
  0x8d   : > { %1201 = vmatpush1.bf16.msra.mxu1 %v3808_v11  ;;  %921 = vmatprep.mubr.bf16.mxu1 %v4554_v6  ;;  %4622 = vst [vmem:[#allocation44_spill] sm:$0xff] %v3883_v34  ;;  %4623 = vst [vmem:[#allocation45_spill] sm:$0xff] %v3892_v37  ;;  %v3895_v38 = vld [vmem:[#allocation9 + $0x1c] ss:$12 sps:$4 sm:$0xff]   ;;  %v3899_v39 = vld [vmem:[#allocation9 + $0x18] ss:$12 sps:$4 sm:$0xff]  }
  0x8e   : > { %1202 = vmatprep.subr.bf16.mxu1 %v3813_v13  ;;  %2554 = vmatmul.mubr.msk.bf16.gmra.mrb[4].mxu0 %vm701_vm0, %v3049_v3  ;;  %v3902_v40 = vld [vmem:[#allocation6 + $0x80] ss:$12 sps:$4 sm:$0xff]   ;;  %v3910_v42 = vld [vmem:[#allocation9 + $0x30] ss:$12 sps:$4 sm:$0xff]   ;;  %v3913_v43 = vld [vmem:[#allocation6 + $0x98] ss:$12 sps:$4 sm:$0xff]  }
  0x8f   : > { %2756 = vmatprep.mubr.msk.bf16.mxu0 %vm701_vm0, %v3055_v10  ;;  %4624 = vst [vmem:[#allocation46_spill] sm:$0xff] %v3902_v40  ;;  %v3905_v41 = vld [vmem:[#allocation9 + $0x34] ss:$12 sps:$4 sm:$0xff]   ;;  %4625 = vst [vmem:[#allocation47_spill] sm:$0xff] %v3913_v43  ;;  %v3916_v44 = vld [vmem:[#allocation9 + $0x4c] ss:$12 sps:$4 sm:$0xff]  }
  0x90   : > { %v3920_v45 = vld [vmem:[#allocation9 + $0x48] ss:$12 sps:$4 sm:$0xff]   ;;  %v3923_v46 = vld [vmem:[#allocation6 + $0xb0] ss:$12 sps:$4 sm:$0xff]   ;;  %v3930_v48 = vld [vmem:[#allocation9 + $0x60] ss:$12 sps:$4 sm:$0xff]  }
  0x91   : > { %1203 = vmatpush1.bf16.msra.mxu1 %v3818_v14  ;;  %4626 = vst [vmem:[#allocation48_spill] sm:$0xff] %v3923_v46  ;;  %v3926_v47 = vld [vmem:[#allocation9 + $0x64] ss:$12 sps:$4 sm:$0xff]   ;;  %v3933_v49 = vld [vmem:[#allocation9 + $0x8] ss:$12 sps:$4 sm:$0xff]   ;;  %v670_v3 = vsub.s32 2, %v661_v2 }
  0x92   : > { %1204 = vmatprep.subr.bf16.mxu1 %v3821_v15  ;;  %v3936_v50 = vld [vmem:[#allocation9 + $0x7c] ss:$12 sps:$4 sm:$0xff]   ;;  %v3940_v51 = vld [vmem:[#allocation9 + $0x78] ss:$12 sps:$4 sm:$0xff]   ;;  %v3943_v52 = vld [vmem:[#allocation9 + $0x20] ss:$12 sps:$4 sm:$0xff]  }
  0x93   : > { %v3946_v53 = vld [vmem:[#allocation9 + $0x94] ss:$12 sps:$4 sm:$0xff]   ;;  %v3952_v54 = vld [vmem:[#allocation9 + $0x90] ss:$12 sps:$4 sm:$0xff]   ;;  %v3955_v55 = vld [vmem:[#allocation9 + $0x38] ss:$12 sps:$4 sm:$0xff]  }
  0x94   : > { %2563 = vmatmul.mubr.msk.bf16.gmra.mrb[8].mxu1 %vm701_vm0, %v3076_v17  ;;  %v3958_v56 = vld [vmem:[#allocation9 + $0xac] ss:$12 sps:$4 sm:$0xff]   ;;  %v3962_v57 = vld [vmem:[#allocation9 + $0xa8] ss:$12 sps:$4 sm:$0xff]   ;;  %v3967_v59 = vld [vmem:[#allocation9 + $0x50] ss:$12 sps:$4 sm:$0xff]  }
  0x95   : > { %1205 = vmatpush1.bf16.msra.mxu1 %v3828_v18  ;;  %1232 = vmatprep.mubr.bf16.mxu1 %v4554_v6  ;;  %v3975_v61 = vld [vmem:[#allocation9 + $0x68] ss:$12 sps:$4 sm:$0xff]   ;;  %v3980_v62 = vld [vmem:[#allocation9 + $0x80] ss:$12 sps:$4 sm:$0xff]   ;;  %v3987_v63 = vld [vmem:[#allocation9 + $0x98] ss:$12 sps:$4 sm:$0xff]  }
  0x96   : > { %1206 = vmatprep.subr.bf16.mxu1 %v3831_v19  ;;  %2757 = vmatmul.mubr.msk.bf16.vlgmr.msra.gmra.mrb[8].mxu0 %vm701_vm0, %v3076_v17  ;;  %v3993_v0 = vld [vmem:[#allocation9 + $0xb0] ss:$12 sps:$4 sm:$0xff]   ;;  %s2010_s12 = sadd.s32 1, %s3767_s11  ;;  %s2125_s25 = sadd.s32 3, %s3761_s18 }
  0x97   : > { %2761 = vmatpush3.bf16.msra.mxu0 %v3846_v23  ;;  %2776 = vmatprep.mubr.msk.bf16.mxu0 %vm3497_vm1, %v4556_v16  ;;  %v658_v4 = vld [vmem:[%s4520_s4] sm:$0x7]  ;;  %s2668_s28 = sshll.u32 %s3480_s19, 9  ;;  %s2269_s27 = sshll.u32 %s3780_s5, 4  ;;  %s4345_s27 = int_to_ptr.vmem [resolvable:$true] %s2269_s27 }
  0x98   : > { %2762 = vmatprep.subr.bf16.mxu0 %v4556_v16  ;;  %v4031_v5 = vrot.slane %v658_v4, %v670_v3  ;;  %s4679_s23 = sld [smem:[#allocation29_spill]] }
  0x99   : > { %1207 = vmatpush1.bf16.msra.mxu1 %v3836_v20 }
  0x9a   : > { %1208 = vmatprep.subr.bf16.mxu1 %v3840_v21 }
  0x9b   : > { %2763 = vmatpush3.bf16.msra.mxu0 %v3856_v26 }
  0x9c   : > { %2764 = vmatprep.subr.bf16.mxu0 %v4556_v16 }
  0x9d   : > { %1209 = vmatpush1.bf16.msra.mxu1 %v3843_v22 }
  0x9e   : > { %1210 = vmatprep.subr.bf16.mxu1 %v3849_v24  ;;  %p4683_p5 = scmp.ne.s32.totalorder %s4679_s23, 0 }
  0x9f   : > { %2765 = vmatpush3.bf16.msra.mxu0 %v3868_v29 }
  0xa0   : > { %2766 = vmatprep.subr.bf16.mxu0 %v4556_v16 }
  0xa1   : > { %1211 = vmatpush1.bf16.msra.mxu1 %v3851_v25 }
  0xa2   : > { %1212 = vmatprep.subr.bf16.mxu1 %v3859_v27 }
  0xa3   : > { %2767 = vmatpush3.bf16.msra.mxu0 %v3880_v33 }
  0xa4   : > { %2768 = vmatprep.subr.bf16.mxu0 %v4556_v16 }
  0xa5   : > { %1213 = vmatpush1.bf16.msra.mxu1 %v3865_v28 }
  0xa6   : > { %1214 = vmatprep.subr.bf16.mxu1 %v3871_v30 }
  0xa7   : > { %2769 = vmatpush3.bf16.msra.mxu0 %v3892_v37 }
  0xa8   : > { %2770 = vmatprep.subr.bf16.mxu0 %v4556_v16 }
  0xa9   : > { %1215 = vmatpush1.bf16.msra.mxu1 %v3874_v31 }
  0xaa   : > { %1443 = vmatprep.subr.bf16.mxu1 %v3883_v34 }
  0xab   : > { %2771 = vmatpush3.bf16.msra.mxu0 %v3902_v40 }
  0xac   : > { %1233 = vmatmul.mubr.bf16.vlgmr.msra.gmra.mrb[12].mxu1 %v1071_v35  ;;  %2772 = vmatprep.subr.bf16.mxu0 %v4556_v16 }
  0xad   : > { %1444 = vmatpush1.bf16.msra.mxu1 %v3888_v36  ;;  %1475 = vmatprep.mubr.bf16.mxu1 %v4554_v6 }
  0xae   : > { %1445 = vmatprep.subr.bf16.mxu1 %v3895_v38 }
  0xaf   : > { %2773 = vmatpush3.bf16.msra.mxu0 %v3913_v43 }
  0xb0   : > { %2774 = vmatprep.subr.bf16.mxu0 %v4556_v16 }
  0xb1   : > { %1446 = vmatpush1.bf16.msra.mxu1 %v3899_v39 }
  0xb2   : > { %1447 = vmatprep.subr.bf16.mxu1 %v3905_v41 }
  0xb3   : > { %2775 = vmatpush3.bf16.msra.mxu0 %v3923_v46 }
  0xb4   : > { %2780 = vmatprep.subr.bf16.mxu0 %v4556_v16 }
  0xb5   : > { %1448 = vmatpush1.bf16.msra.mxu1 %v3910_v42 }
  0xb6   : > { %1449 = vmatprep.subr.bf16.mxu1 %v3916_v44  ;;  %2777 = vmatmul.mubr.bf16.vlgmr.msra.gmra.mrb[12].mxu0 %v1071_v35  ;;  %v830_v35 = vld [vmem:[%s4524_s8] sm:$0x7] }
  0xb7   : > { %2781 = vmatpush3.bf16.msra.mxu0 %v3933_v49  ;;  %2796 = vmatprep.mubr.msk.bf16.mxu0 %vm3497_vm1, %v4556_v16 }
  0xb8   : > { %2782 = vmatprep.subr.bf16.mxu0 %v4556_v16 }
  0xb9   : > { %1450 = vmatpush1.bf16.msra.mxu1 %v3920_v45 }
  0xba   : > { %1451 = vmatprep.subr.bf16.mxu1 %v3926_v47 }
  0xbb   : > { %2783 = vmatpush3.bf16.msra.mxu0 %v3943_v52 }
  0xbc   : > { %2784 = vmatprep.subr.bf16.mxu0 %v4556_v16 }
  0xbd   : > { %1452 = vmatpush1.bf16.msra.mxu1 %v3930_v48 }
  0xbe   : > { %1453 = vmatprep.subr.bf16.mxu1 %v3936_v50 }
  0xbf   : > { %2785 = vmatpush3.bf16.msra.mxu0 %v3955_v55 }
  0xc0   : > { %2786 = vmatprep.subr.bf16.mxu0 %v4556_v16 }
  0xc1   : > { %1454 = vmatpush1.bf16.msra.mxu1 %v3940_v51 }
  0xc2   : > { %1455 = vmatprep.subr.bf16.mxu1 %v3946_v53 }
  0xc3   : > { %2787 = vmatpush3.bf16.msra.mxu0 %v3967_v59 }
  0xc4   : > { %2788 = vmatprep.subr.bf16.mxu0 %v4556_v16 }
  0xc5   : > { %1456 = vmatpush1.bf16.msra.mxu1 %v3952_v54 }
  0xc6   : > { %1457 = vmatprep.subr.bf16.mxu1 %v3958_v56 }
  0xc7   : > { %2789 = vmatpush3.bf16.msra.mxu0 %v3975_v61 }
  0xc8   : > { %2790 = vmatprep.subr.bf16.mxu0 %v4556_v16 }
  0xc9   : > { %1458 = vmatpush1.bf16.msra.mxu1 %v3962_v57 }
  0xca   : > { %1559 = vmatprep.subr.bf16.mxu1 %v3796_v7 }
  0xcb   : > { %2791 = vmatpush3.bf16.msra.mxu0 %v3980_v62 }
  0xcc   : > { %1476 = vmatmul.mubr.bf16.vlgmr.msra.gmra.mrb[16].mxu1 %v1314_v60  ;;  %2792 = vmatprep.subr.bf16.mxu0 %v4556_v16 }
  0xcd   : > { %1560 = vmatpush1.bf16.msra.mxu1 %v3808_v11  ;;  %1591 = vmatprep.mubr.bf16.mxu1 %v4554_v6 }
  0xce   : > { %1561 = vmatprep.subr.bf16.mxu1 %v3813_v13 }
  0xcf   : > { %2793 = vmatpush3.bf16.msra.mxu0 %v3987_v63 }
  0xd0   : > { %2794 = vmatprep.subr.bf16.mxu0 %v4556_v16 }
  0xd1   : > { %1562 = vmatpush1.bf16.msra.mxu1 %v3818_v14 }
  0xd2   : > { %1563 = vmatprep.subr.bf16.mxu1 %v3821_v15 }
  0xd3   : > { %2795 = vmatpush3.bf16.msra.mxu0 %v3993_v0 }
  0xd4   : > { %2800 = vmatprep.subr.bf16.mxu0 %v4556_v16 }
  0xd5   : > { %1564 = vmatpush1.bf16.msra.mxu1 %v3828_v18 }
  0xd6   : > { %1565 = vmatprep.subr.bf16.mxu1 %v3831_v19  ;;  %2797 = vmatmul.mubr.bf16.vlgmr.msra.gmra.mrb[16].mxu0 %v1314_v60  ;;  %v666_v60 = vsub.s32 1, %v661_v2 }
  0xd7   : > { %2801 = vmatpush3.bf16.msra.mxu0 %v3846_v23  ;;  %2816 = vmatprep.mubr.msk.bf16.mxu0 %vm3497_vm1, %v4556_v16 }
  0xd8   : > { %2802 = vmatprep.subr.bf16.mxu0 %v4556_v16 }
  0xd9   : > { %1566 = vmatpush1.bf16.msra.mxu1 %v3836_v20 }
  0xda   : > { %1567 = vmatprep.subr.bf16.mxu1 %v3840_v21 }
  0xdb   : > { %2803 = vmatpush3.bf16.msra.mxu0 %v3856_v26 }
  0xdc   : > { %2804 = vmatprep.subr.bf16.mxu0 %v4556_v16 }
  0xdd   : > { %1568 = vmatpush1.bf16.msra.mxu1 %v3843_v22 }
  0xde   : > { %1569 = vmatprep.subr.bf16.mxu1 %v3849_v24 }
  0xdf   : > { %2805 = vmatpush3.bf16.msra.mxu0 %v3868_v29 }
  0xe0   : > { %2806 = vmatprep.subr.bf16.mxu0 %v4556_v16 }
  0xe1   : > { %1570 = vmatpush1.bf16.msra.mxu1 %v3851_v25 }
  0xe2   : > { %1571 = vmatprep.subr.bf16.mxu1 %v3859_v27 }
  0xe3   : > { %2807 = vmatpush3.bf16.msra.mxu0 %v3880_v33 }
  0xe4   : > { %2808 = vmatprep.subr.bf16.mxu0 %v4556_v16 }
  0xe5   : > { %1572 = vmatpush1.bf16.msra.mxu1 %v3865_v28 }
  0xe6   : > { %1573 = vmatprep.subr.bf16.mxu1 %v3871_v30  ;;  %v667_v30 = vrot.slane %v658_v4, %v666_v60 }
  0xe7   : > { %2809 = vmatpush3.bf16.msra.mxu0 %v3892_v37 }
  0xe8   : > { %2810 = vmatprep.subr.bf16.mxu0 %v4556_v16 }
  0xe9   : > { %1574 = vmatpush1.bf16.msra.mxu1 %v3874_v31 }
  0xea   : > { %1676 = vmatprep.subr.bf16.mxu1 %v3883_v34  ;;  %v4047_v34 = vrot.slane %v830_v35, %v662_v12 }
  0xeb   : > { %2811 = vmatpush3.bf16.msra.mxu0 %v3902_v40 }
  0xec   : > { %2812 = vmatprep.subr.bf16.mxu0 %v4556_v16 }
  0xef   : > { %2813 = vmatpush3.bf16.msra.mxu0 %v3913_v43 }
  0xf0   : > { %2814 = vmatprep.subr.bf16.mxu0 %v4556_v16 }
  0xf3   : > { %2815 = vmatpush3.bf16.msra.mxu0 %v3923_v46 }
  0xf4   : > { %2820 = vmatprep.subr.bf16.mxu0 %v4556_v16 }
 0x157   : > { %v2752_v8 = vpop.f32.mrb[0].mxu1 }
 0x158   : > { %v4034_v9 = vadd.f32 %v2752_v8, %v4031_v5  ;;  %v4036_v10 = vpop.f32.mrb[1].mxu1  ;;  %v4049_v8 = vrot.slane %v830_v35, %v666_v60 }
 0x159   : > { %v2753_v17 = vpop.f32.mrb[2].mxu1  ;;  %v742_v31 = vpop.f32.mrb[0].mxu0 }
 0x15a   : > { %4627 = vst [vmem:[#allocation49_spill] sm:$0xff] %v4034_v9  ;;  %v4042_v1 = vadd.f32 %v2753_v17, %v4031_v5  ;;  %v798_v6 = vpop.f32.mrb[3].mxu1  ;;  %v663_v9 = vrot.slane %v658_v4, %v662_v12  ;;  %v744_v2 = vpop.f32.mrb[1].mxu0 }
 0x15b   : > { %v4045_v16 = vadd.f32 %v798_v6, %v4031_v5  ;;  %v746_v27 = vpop.f32.mrb[2].mxu0 }
 0x15c   : > { %4628 = vst [vmem:[#allocation50_spill] sm:$0xff] %v4042_v1  ;;  %v4060_v40 = vadd.f32 %v746_v27, %v663_v9  ;;  %v748_v12 = vpop.f32.mrb[3].mxu0 }
 0x15d   : > { %4629 = vst [vmem:[#allocation51_spill] sm:$0xff] %v4045_v16  ;;  %v4065_v4 = vadd.f32 %v748_v12, %v667_v30 }
 0x15e   : > { %4633 = vst [vmem:[#allocation55_spill] sm:$0xff] %v4060_v40 }
 0x15f   : > { %v913_v46 = vpop.f32.mrb[4].mxu1  ;;  %4635 = vst [vmem:[#allocation57_spill] sm:$0xff] %v4065_v4 }
 0x160   : > { %v4052_v43 = vadd.f32 %v913_v46, %v4047_v34  ;;  %v915_v28 = vpop.f32.mrb[5].mxu1 }
 0x161   : > { %v4055_v17 = vadd.f32 %v915_v28, %v4049_v8  ;;  %v917_v1 = vpop.f32.mrb[6].mxu1  ;;  %v752_v46 = vpop.f32.mrb[4].mxu0 }
 0x162   : > { %4630 = vst [vmem:[#allocation52_spill] sm:$0xff] %v4052_v43  ;;  %v4058_v6 = vadd.f32 %v917_v1, %v4047_v34  ;;  %v919_v16 = vpop.f32.mrb[7].mxu1  ;;  %v4067_v43 = vadd.f32 %v752_v46, %v663_v9  ;;  %v754_v28 = vpop.f32.mrb[5].mxu0  ;;  %v4081_v46 = vrot.slane %v830_v35, %v670_v3 }
 0x163   : > { %4631 = vst [vmem:[#allocation53_spill] sm:$0xff] %v4055_v17  ;;  %v4063_v25 = vadd.f32 %v919_v16, %v4049_v8  ;;  %v4072_v1 = vadd.f32 %v754_v28, %v667_v30 }
 0x164   : > { %4632 = vst [vmem:[#allocation54_spill] sm:$0xff] %v4058_v6  ;;  %4636 = vst [vmem:[#allocation58_spill] sm:$0xff] %v4067_v43  ;;  %v756_v6 = vpop.f32.mrb[6].mxu0 }
 0x165   : > { %4634 = vst [vmem:[#allocation56_spill] sm:$0xff] %v4063_v25  ;;  %4638 = vst [vmem:[#allocation60_spill] sm:$0xff] %v4072_v1  ;;  %v4077_v16 = vadd.f32 %v756_v6, %v663_v9  ;;  %v758_v12 = vpop.f32.mrb[7].mxu0 }
 0x166   : > { %v4079_v4 = vadd.f32 %v758_v12, %v667_v30 }
 0x167   : > { %v923_v60 = vpop.f32.mrb[8].mxu1  ;;  %4640 = vst [vmem:[#allocation62_spill] sm:$0xff] %v4077_v16  ;;  %v743_v16 = vadd.f32 %v742_v31, %v663_v9 }
 0x168   : > { %v4070_v17 = vadd.f32 %v923_v60, %v4047_v34  ;;  %v925_v24 = vpop.f32.mrb[9].mxu1  ;;  %4641 = vst [vmem:[#allocation63_spill] sm:$0xff] %v4079_v4 }
 0x169   : > { %v4075_v27 = vadd.f32 %v925_v24, %v4049_v8  ;;  %v927_v40 = vpop.f32.mrb[10].mxu1  ;;  %v2758_v43 = vpop.f32.mrb[8].mxu0 }
 0x16a   : > { %4637 = vst [vmem:[#allocation59_spill] sm:$0xff] %v4070_v17  ;;  %v929_v25 = vpop.f32.mrb[11].mxu1  ;;  %v4084_v60 = vadd.f32 %v2758_v43, %v4081_v46  ;;  %v966_v17 = vpop.f32.mrb[9].mxu0 }
 0x16b   : > { %4639 = vst [vmem:[#allocation61_spill] sm:$0xff] %v4075_v27  ;;  %v4087_v28 = vadd.f32 %v966_v17, %v4081_v46  ;;  %v4089_v1 = vpop.f32.mrb[10].mxu0  ;;  %v745_v27 = vadd.f32 %v744_v2, %v667_v30  ;;  %v4097_v30 = vld [vmem:[%s4522_s6] sm:$0xff] }
 0x16c   : > { %4642 = vst [vmem:[#allocation64_spill] sm:$0xff] %v4084_v60  ;;  %v969_v24 = vpop.f32.mrb[11].mxu0 }
 0x16d   : > { %4643 = vst [vmem:[#allocation65_spill] sm:$0xff] %v4087_v28  ;;  %v4092_v6 = vadd.f32 %v969_v24, %v4081_v46 }
 0x16f   : > { %4644 = vst [vmem:[#allocation66_spill] sm:$0xff] %v4092_v6 }
 0x17f   : > { %v1234_v12 = vpop.f32.mrb[12].mxu1 }
 0x180   : > { %v1281_v4 = vadd.f32 %v1234_v12, %v743_v16  ;;  %v1236_v3 = vpop.f32.mrb[13].mxu1 }
 0x181   : > { %v1288_v35 = vadd.f32 %v1236_v3, %v745_v27  ;;  %v1238_v37 = vpop.f32.mrb[14].mxu1 }
 0x182   : > { %v2592_v22 = vmul.f32 -1.442695, %v1281_v4  ;;  %v1239_v43 = vpop.f32.mrb[15].mxu1  ;;  %v930_v4 = vadd.f32 %v929_v25, %v4049_v8 }
 0x183   : > { %v2593_v60 = vmul.f32 -1.442695, %v1288_v35 }
 0x184   : > { %3123 = vpow2.f32 %v2592_v22  ;;  %v796_v22 = vadd.f32 %v4036_v10, %v4031_v5 }
 0x185   : > { %3125 = vpow2.f32 %v2593_v60 }
 0x189   : > { %v1275_v21 = vpop.f32.mrb[12].mxu0 }
 0x18a   : > { %v2778_v33 = vpop.f32.mrb[13].mxu0  ;;  %v1295_v37 = vadd.f32 %v1275_v21, %v4097_v30 }
 0x18b   : > { %v1278_v20 = vpop.f32.mrb[14].mxu0  ;;  %v928_v33 = vadd.f32 %v927_v40, %v4047_v34  ;;  %v4107_v34 = vld [vmem:[%s4516_s0] sm:$0xff]  ;;  %v1303_v40 = vstv %s3761_s18  ;;  %s4680_s18 = sld [smem:[#allocation68_spill]] }
 0x18c   : > { %v2779_v24 = vpop.f32.mrb[15].mxu0  ;;  %vm1304_vm2 = vcmp.lt.s32.totalorder %v1303_v40, %v4107_v34 }
 0x18e   : > { %v3124_v17 = vpop.eup %3123 }
 0x18f   : > { %v1285_v28 = vadd.f32 1.0, %v3124_v17  ;;  %v3126_v6 = vpop.eup %3125 }
 0x190   : > { %v1292_v31 = vadd.f32 1.0, %v3126_v6 }
 0x191   : > { %3127 = vrcp.f32 %v1285_v28  ;;  %s4343_s20 = scalar_lea.hbm %s4680_s18, %s2668_s28 }
 0x192   : > { %3129 = vrcp.f32 %v1292_v31 }
 0x19b   : > { %v3128_v9 = vpop.eup %3127 }
 0x19c   : > { %v1296_v2 = vmul.f32 %v3128_v9, %v1295_v37  ;;  %v3130_v3 = vpop.eup %3129 }
 0x19d   : > { %v1299_v10 = vsub.f32 1.0, %v3130_v3  ;;  %v1301_v8 = vmul.f32 %v3130_v3, %v3876_v32 }
 0x19e   : > { %v1297_v20 = vadd.f32 %v1296_v2, %v796_v22 }
 0x19f   : > { %v1477_v27 = vpop.f32.mrb[16].mxu1 }
 0x1a0   : > { %3131 = vtanh.f32 %v1297_v20  ;;  %v1524_v16 = vadd.f32 %v1477_v27, %v928_v33  ;;  %v1479_v60 = vpop.f32.mrb[17].mxu1  ;;  %v4125_v27 = vld [vmem:[%s4526_s10] sm:$0xff] }
 0x1a1   : > { %v1531_v28 = vadd.f32 %v1479_v60, %v930_v4  ;;  %v1481_v6 = vpop.f32.mrb[18].mxu1  ;;  %v4645_v4 = vmov 0.0  }
 0x1a2   : > { %v2618_v12 = vmul.f32 -1.442695, %v1524_v16  ;;  %v1482_v21 = vpop.f32.mrb[19].mxu1  ;;  %v4646_v16 = vmov 0  }
 0x1a3   : > { %v2619_v5 = vmul.f32 -1.442695, %v1531_v28 }
 0x1a4   : > { %3133 = vpow2.f32 %v2618_v12  ;;  %v978_v12 = vadd.f32 %v4089_v1, %v4081_v46 }
 0x1a5   : > { %3135 = vpow2.f32 %v2619_v5  ;;  %v1547_v5 = vstv %s1546_s13  ;;  %s4681_s13 = smov %s4680_s18 }
 0x1a6   : > { %vm1548_vm3 = vcmp.lt.s32.totalorder %v1547_v5, %v4107_v34 }
 0x1a7   : > { %vm2624_vm4 = vmpackc.low %vm1548_vm3, %vm1548_vm3 }
 0x1a9   : > { %v1518_v9 = vpop.f32.mrb[16].mxu0 }
 0x1aa   : > { %v3132_v25 = vpop.eup %3131  ;;  %v2798_v2 = vpop.f32.mrb[17].mxu0  ;;  %v1538_v28 = vadd.f32 %v1518_v9, %v4125_v27  ;;  %v4658_v9 = vld [vmem:[#allocation41_spill] sm:$0xff] }
 0x1ab   : > { %v1300_v35 = vmul.f32 %v3132_v25, %v1299_v10  ;;  %v1521_v33 = vpop.f32.mrb[18].mxu0  ;;  %v4660_v2 = vld [vmem:[#allocation48_spill] sm:$0xff] }
 0x1ac   : > { %v2799_v20 = vpop.f32.mrb[19].mxu0  ;;  %v4661_v33 = vld [vmem:[#allocation44_spill] sm:$0xff] }
 0x1ad   : > { %v1302_v43 = vadd.f32 %v1301_v8, %v1300_v35 }
 0x1ae   : > { %v3134_v17 = vpop.eup %3133 }
 0x1af   : > { %v1528_v24 = vadd.f32 1.0, %v3134_v17  ;;  %v1305_v31 = vsel %vm1304_vm2, %v1302_v43, 0.0  ;;  %v4113_v37 = vsel %vm1304_vm2, %v1302_v43, %v3876_v32  ;;  %v3136_v32 = vpop.eup %3135  ;;  %v4655_v17 = vld [vmem:[#allocation39_spill] sm:$0xff] }
 0x1b0   : > { %1306 = vst [vmem:[%s3780_s5] sm:$0xff] %v1305_v31  ;;  %v1558_v22 = vpack.c.bf16 %v4113_v37, %v4113_v37  ;;  %v1535_v60 = vadd.f32 1.0, %v3136_v32  ;;  %v4657_v31 = vld [vmem:[#allocation47_spill] sm:$0xff] }
 0x1b1   : > { %3137 = vrcp.f32 %v1528_v24  ;;  %v4656_v24 = vld [vmem:[#allocation40_spill] sm:$0xff] }
 0x1b2   : > { %1592 = vmatmul.mubr.bf16.vlgmr.msra.gmra.mrb[20].mxu1 %v1558_v22  ;;  %2817 = vmatmul.mubr.bf16.vlgmr.msra.gmra.mrb[20].mxu0 %v1558_v22  ;;  %3139 = vrcp.f32 %v1535_v60  ;;  %v4659_v22 = vld [vmem:[#allocation42_spill] sm:$0xff]  ;;  %v4662_v60 = vld [vmem:[#allocation55_spill] sm:$0xff] }
 0x1b3   : > { %1677 = vmatpush1.bf16.msra.mxu1 %v3888_v36  ;;  %2821 = vmatpush3.bf16.msra.mxu0 %v3933_v49 }
 0x1b4   : > { %1678 = vmatprep.subr.bf16.mxu1 %v3895_v38  ;;  %2822 = vmatprep.subr.bf16.mxu0 %v4645_v4 }
 0x1b5   : > { %1708 = vmatprep.mubr.bf16.mxu1 %v4646_v16  ;;  %2836 = vmatprep.mubr.msk.bf16.mxu0 %vm3497_vm1, %v4645_v4 }
 0x1b7   : > { %1679 = vmatpush1.bf16.msra.mxu1 %v3899_v39  ;;  %2823 = vmatpush3.bf16.msra.mxu0 %v3943_v52 }
 0x1b8   : > { %1680 = vmatprep.subr.bf16.mxu1 %v3905_v41  ;;  %2824 = vmatprep.subr.bf16.mxu0 %v4645_v4 }
 0x1bb   : > { %v3138_v6 = vpop.eup %3137  ;;  %1681 = vmatpush1.bf16.msra.mxu1 %v3910_v42  ;;  %2825 = vmatpush3.bf16.msra.mxu0 %v3955_v55 }
 0x1bc   : > { %v1539_v21 = vmul.f32 %v3138_v6, %v1538_v28  ;;  %1682 = vmatprep.subr.bf16.mxu1 %v3916_v44  ;;  %2826 = vmatprep.subr.bf16.mxu0 %v4645_v4  ;;  %v3140_v1 = vpop.eup %3139 }
 0x1bd   : > { %v1542_v46 = vsub.f32 1.0, %v3140_v1  ;;  %v1544_v25 = vmul.f32 %v3140_v1, %v3964_v58  ;;  %v4652_v58 = vld [vmem:[#allocation37_spill] sm:$0xff] }
 0x1be   : > { %v1540_v3 = vadd.f32 %v1539_v21, %v978_v12  ;;  %v4663_v21 = vld [vmem:[#allocation57_spill] sm:$0xff] }
 0x1bf   : > { %1683 = vmatpush1.bf16.msra.mxu1 %v3920_v45  ;;  %2827 = vmatpush3.bf16.msra.mxu0 %v3967_v59 }
 0x1c0   : > { %3141 = vtanh.f32 %v1540_v3  ;;  %1684 = vmatprep.subr.bf16.mxu1 %v3926_v47  ;;  %2828 = vmatprep.subr.bf16.mxu0 %v4645_v4 }
 0x1c3   : > { %1685 = vmatpush1.bf16.msra.mxu1 %v3930_v48  ;;  %2829 = vmatpush3.bf16.msra.mxu0 %v3975_v61 }
 0x1c4   : > { %1686 = vmatprep.subr.bf16.mxu1 %v3936_v50  ;;  %2830 = vmatprep.subr.bf16.mxu0 %v4645_v4 }
 0x1c7   : > { %1687 = vmatpush1.bf16.msra.mxu1 %v3940_v51  ;;  %2831 = vmatpush3.bf16.msra.mxu0 %v3980_v62 }
 0x1c8   : > { %1688 = vmatprep.subr.bf16.mxu1 %v3946_v53  ;;  %2832 = vmatprep.subr.bf16.mxu0 %v4645_v4 }
 0x1ca   : > { %v3142_v10 = vpop.eup %3141 }
 0x1cb   : > { %1689 = vmatpush1.bf16.msra.mxu1 %v3952_v54  ;;  %2833 = vmatpush3.bf16.msra.mxu0 %v3987_v63  ;;  %v1543_v40 = vmul.f32 %v3142_v10, %v1542_v46 }
 0x1cc   : > { %1690 = vmatprep.subr.bf16.mxu1 %v3958_v56  ;;  %2834 = vmatprep.subr.bf16.mxu0 %v4645_v4 }
 0x1cd   : > { %v1545_v8 = vadd.f32 %v1544_v25, %v1543_v40 }
 0x1cf   : > { %1691 = vmatpush1.bf16.msra.mxu1 %v3962_v57  ;;  %2835 = vmatpush3.bf16.msra.mxu0 %v3993_v0  ;;  %v4162_v35 = vsel %vm1548_vm3, %v1545_v8, 0.0  ;;  %v2625_v43 = vpack.c.bf16 %v1545_v8, %v1545_v8 }
 0x1d0   : > { %2620 = vst [vmem:[%s3782_s24 + $0x18] sm:$0xff] %v4162_v35  ;;  %1791 = vmatprep.subr.bf16.mxu1 %v3796_v7  ;;  %2840 = vmatprep.subr.bf16.mxu0 %v4645_v4  ;;  %v4647_v7 = vld [vmem:[#allocation34_spill] sm:$0xff] }
 0x1d2   : > { %2626 = vmatmul.mubr.msk.bf16.vlgmr.msra.gmra.mrb[24].mxu1 %vm2624_vm4, %v2625_v43  ;;  %2837 = vmatmul.mubr.msk.bf16.vlgmr.msra.gmra.mrb[24].mxu0 %vm2624_vm4, %v2625_v43 }
 0x1d3   : > { %1792 = vmatpush1.bf16.msra.mxu1 %v3808_v11  ;;  %2841 = vmatpush3.bf16.msra.mxu0 %v3846_v23  ;;  %v4648_v11 = vld [vmem:[#allocation43_spill] sm:$0xff] }
 0x1d4   : > { %1793 = vmatprep.subr.bf16.mxu1 %v3813_v13  ;;  %2842 = vmatprep.subr.bf16.mxu0 %v4645_v4  ;;  %v4649_v13 = vld [vmem:[#allocation35_spill] sm:$0xff] }
 0x1d5   : > { %1823 = vmatprep.mubr.bf16.mxu1 %v4646_v16  ;;  %2856 = vmatprep.mubr.msk.bf16.mxu0 %vm3497_vm1, %v4645_v4 }
 0x1d7   : > { %1794 = vmatpush1.bf16.msra.mxu1 %v3818_v14  ;;  %2843 = vmatpush3.bf16.msra.mxu0 %v3856_v26  ;;  %v4650_v14 = vld [vmem:[#allocation36_spill] sm:$0xff] }
 0x1d8   : > { %1795 = vmatprep.subr.bf16.mxu1 %v3821_v15  ;;  %2844 = vmatprep.subr.bf16.mxu0 %v4645_v4  ;;  %v4651_v15 = vld [vmem:[#allocation45_spill] sm:$0xff] }
 0x1db   : > { %1796 = vmatpush1.bf16.msra.mxu1 %v3828_v18  ;;  %2845 = vmatpush3.bf16.msra.mxu0 %v3868_v29  ;;  %v4653_v18 = vld [vmem:[#allocation38_spill] sm:$0xff] }
 0x1dc   : > { %1797 = vmatprep.subr.bf16.mxu1 %v3831_v19  ;;  %2846 = vmatprep.subr.bf16.mxu0 %v4645_v4  ;;  %v4654_v19 = vld [vmem:[#allocation46_spill] sm:$0xff] }
 0x1df   : > { %1798 = vmatpush1.bf16.msra.mxu1 %v4647_v7  ;;  %2847 = vmatpush3.bf16.msra.mxu0 %v4648_v11 }
 0x1e0   : > { %1799 = vmatprep.subr.bf16.mxu1 %v4649_v13  ;;  %2848 = vmatprep.subr.bf16.mxu0 %v4645_v4 }
 0x1e3   : > { %1800 = vmatpush1.bf16.msra.mxu1 %v4650_v14  ;;  %2849 = vmatpush3.bf16.msra.mxu0 %v4651_v15 }
 0x1e4   : > { %1801 = vmatprep.subr.bf16.mxu1 %v4652_v58  ;;  %2850 = vmatprep.subr.bf16.mxu0 %v4645_v4 }
 0x1e7   : > { %1802 = vmatpush1.bf16.msra.mxu1 %v4653_v18  ;;  %2851 = vmatpush3.bf16.msra.mxu0 %v4654_v19 }
 0x1e8   : > { %1803 = vmatprep.subr.bf16.mxu1 %v4655_v17  ;;  %2852 = vmatprep.subr.bf16.mxu0 %v4645_v4 }
 0x1eb   : > { %1804 = vmatpush1.bf16.msra.mxu1 %v4656_v24  ;;  %2853 = vmatpush3.bf16.msra.mxu0 %v4657_v31 }
 0x1ec   : > { %1805 = vmatprep.subr.bf16.mxu1 %v4658_v9  ;;  %2854 = vmatprep.subr.bf16.mxu0 %v4645_v4 }
 0x1ef   : > { %1806 = vmatpush1.bf16.msra.mxu1 %v4659_v22  ;;  %2855 = vmatpush3.bf16.msra.mxu0 %v4660_v2 }
 0x1f0   : > { %1907 = vmatprep.subr.bf16.mxu1 %v4661_v33  ;;  %2860 = vmatprep.subr.bf16.mxu0 %v4645_v4 }
 0x285   : > { %v1593_v20 = vpop.f32.mrb[20].mxu1  ;;  %v1634_v32 = vpop.f32.mrb[20].mxu0 }
 0x286   : > { %v1640_v28 = vadd.f32 %v1593_v20, %v4662_v60  ;;  %v1595_v6 = vpop.f32.mrb[21].mxu1  ;;  %v2818_v12 = vpop.f32.mrb[21].mxu0  ;;  %v1654_v14 = vadd.f32 %v1634_v32, %v4097_v30  ;;  %v4664_v20 = vld [vmem:[#allocation51_spill] sm:$0xff] }
 0x287   : > { %v1647_v3 = vadd.f32 %v1595_v6, %v4663_v21  ;;  %v1597_v1 = vpop.f32.mrb[22].mxu1  ;;  %v1637_v46 = vpop.f32.mrb[22].mxu0  ;;  %v4665_v12 = vld [vmem:[#allocation59_spill] sm:$0xff] }
 0x288   : > { %v2621_v5 = vmul.f32 -1.442695, %v1640_v28  ;;  %v1598_v10 = vpop.f32.mrb[23].mxu1  ;;  %v2819_v40 = vpop.f32.mrb[23].mxu0  ;;  %v4666_v46 = vld [vmem:[#allocation61_spill] sm:$0xff] }
 0x289   : > { %v2622_v25 = vmul.f32 -1.442695, %v1647_v3 }
 0x28a   : > { %3143 = vpow2.f32 %v2621_v5 }
 0x28b   : > { %3145 = vpow2.f32 %v2622_v25 }
 0x294   : > { %v3144_v8 = vpop.eup %3143 }
 0x295   : > { %v1644_v43 = vadd.f32 1.0, %v3144_v8  ;;  %v3146_v7 = vpop.eup %3145 }
 0x296   : > { %v1651_v13 = vadd.f32 1.0, %v3146_v7 }
 0x297   : > { %3147 = vrcp.f32 %v1644_v43 }
 0x298   : > { %3149 = vrcp.f32 %v1651_v13 }
 0x2a1   : > { %v3148_v58 = vpop.eup %3147 }
 0x2a2   : > { %v1655_v18 = vmul.f32 %v3148_v58, %v1654_v14  ;;  %v3150_v43 = vpop.eup %3149  ;;  %v1663_v14 = vstv %s1662_s15  ;;  %s4682_s15 = sand.u32 1, %s3472_s17  }
 0x2a3   : > { %v1658_v13 = vsub.f32 1.0, %v3150_v43  ;;  %vm1664_vm5 = vcmp.lt.s32.totalorder %v1663_v14, %v4107_v34 }
 0x2a4   : > { %v1656_v60 = vadd.f32 %v1655_v18, %v4664_v20  ;;  %v1660_v18 = vmul.f32 %v3150_v43, %v4113_v37 }
 0x2a5   : > { %v1710_v6 = vpop.f32.mrb[24].mxu1  ;;  %v1751_v28 = vpop.f32.mrb[24].mxu0 }
 0x2a6   : > { %3151 = vtanh.f32 %v1656_v60  ;;  %v1757_v21 = vadd.f32 %v1710_v6, %v4665_v12  ;;  %v1712_v3 = vpop.f32.mrb[25].mxu1  ;;  %v2838_v1 = vpop.f32.mrb[25].mxu0 }
 0x2a7   : > { %v1764_v5 = vadd.f32 %v1712_v3, %v4666_v46  ;;  %v1714_v10 = vpop.f32.mrb[26].mxu1  ;;  %v1754_v40 = vpop.f32.mrb[26].mxu0 }
 0x2a8   : > { %v2630_v25 = vmul.f32 -1.442695, %v1757_v21  ;;  %v1715_v8 = vpop.f32.mrb[27].mxu1  ;;  %v2839_v32 = vpop.f32.mrb[27].mxu0  ;;  %v3208_v40 = vld [vmem:[#allocation6 + $0x30] ss:$12 sps:$4 sm:$0xff]  }
 0x2a9   : > { %v2631_v7 = vmul.f32 -1.442695, %v1764_v5  ;;  %v3211_v8 = vld [vmem:[#allocation6 + $0x64] ss:$12 sps:$4 sm:$0xff]   ;;  %v3213_v32 = vld [vmem:[#allocation6 + $0x7c] ss:$12 sps:$4 sm:$0xff]  }
 0x2aa   : > { %3153 = vpow2.f32 %v2630_v25  ;;  %v3210_v25 = vld [vmem:[#allocation6 + $0x48] ss:$12 sps:$4 sm:$0xff]  }
 0x2ab   : > { %3155 = vpow2.f32 %v2631_v7  ;;  %v4669_v7 = vld [vmem:[#allocation60_spill] sm:$0xff] }
 0x2b0   : > { %v3152_v58 = vpop.eup %3151 }
 0x2b1   : > { %v1659_v20 = vmul.f32 %v3152_v58, %v1658_v13 }
 0x2b3   : > { %v1661_v60 = vadd.f32 %v1660_v18, %v1659_v20 }
 0x2b4   : > { %v3154_v6 = vpop.eup %3153 }
 0x2b5   : > { %v1761_v12 = vadd.f32 1.0, %v3154_v6  ;;  %v1665_v21 = vsel %vm1664_vm5, %v1661_v60, 0.0  ;;  %v4213_v3 = vsel %vm1664_vm5, %v1661_v60, %v4113_v37  ;;  %v3156_v46 = vpop.eup %3155 }
 0x2b6   : > { %2623 = vst [vmem:[%s3780_s5 + $0x8] sm:$0xff] %v1665_v21  ;;  %v1790_v1 = vpack.c.bf16 %v4213_v3, %v4213_v3  ;;  %v1768_v37 = vadd.f32 1.0, %v3156_v46 }
 0x2b7   : > { %3157 = vrcp.f32 %v1761_v12 }
 0x2b8   : > { %1824 = vmatmul.mubr.bf16.vlgmr.msra.gmra.mrb[28].mxu1 %v1790_v1  ;;  %2857 = vmatmul.mubr.bf16.vlgmr.msra.gmra.mrb[28].mxu0 %v1790_v1  ;;  %3159 = vrcp.f32 %v1768_v37  ;;  %v4670_v1 = vld [vmem:[#allocation49_spill] sm:$0xff] }
 0x2b9   : > { %1908 = vmatpush1.bf16.msra.mxu1 %v3888_v36  ;;  %2861 = vmatpush3.bf16.msra.mxu0 %v3933_v49  ;;  %v1771_v36 = vadd.f32 %v1751_v28, %v4125_v27  ;;  %v3207_v28 = vld [vmem:[#allocation6 + $0x34] ss:$12 sps:$4 sm:$0xff]  }
 0x2ba   : > { %1909 = vmatprep.subr.bf16.mxu1 %v3895_v38  ;;  %2862 = vmatprep.subr.bf16.mxu0 %v4645_v4 }
 0x2bb   : > { %1939 = vmatprep.mubr.bf16.mxu1 %v4646_v16  ;;  %2876 = vmatprep.mubr.msk.bf16.mxu0 %vm3497_vm1, %v4645_v4 }
 0x2bd   : > { %1910 = vmatpush1.bf16.msra.mxu1 %v3899_v39  ;;  %2863 = vmatpush3.bf16.msra.mxu0 %v3943_v52  ;;  %v4667_v39 = vld [vmem:[#allocation64_spill] sm:$0xff] }
 0x2be   : > { %1911 = vmatprep.subr.bf16.mxu1 %v3905_v41  ;;  %2864 = vmatprep.subr.bf16.mxu0 %v4645_v4 }
 0x2c1   : > { %v3158_v38 = vpop.eup %3157  ;;  %1912 = vmatpush1.bf16.msra.mxu1 %v3910_v42  ;;  %2865 = vmatpush3.bf16.msra.mxu0 %v3955_v55 }
 0x2c2   : > { %v1772_v5 = vmul.f32 %v3158_v38, %v1771_v36  ;;  %1913 = vmatprep.subr.bf16.mxu1 %v3916_v44  ;;  %2866 = vmatprep.subr.bf16.mxu0 %v4645_v4  ;;  %v3160_v41 = vpop.eup %3159  ;;  %v1780_v44 = vstv %s1779_s21  ;;  %v4671_v38 = vld [vmem:[#allocation54_spill] sm:$0xff]  ;;  %s4351_s21 = scalar_lea.sflag [#allocation8], %s4682_s15 }
 0x2c3   : > { %v1775_v42 = vsub.f32 1.0, %v3160_v41  ;;  %vm1781_vm6 = vcmp.lt.s32.totalorder %v1780_v44, %v4107_v34 }
 0x2c4   : > { %v1773_v10 = vadd.f32 %v1772_v5, %v4667_v39  ;;  %vm2636_vm7 = vmpackc.low %vm1781_vm6, %vm1781_vm6 }
 0x2c5   : > { %1914 = vmatpush1.bf16.msra.mxu1 %v3920_v45  ;;  %2867 = vmatpush3.bf16.msra.mxu0 %v3967_v59 }
 0x2c6   : > { %3161 = vtanh.f32 %v1773_v10  ;;  %1915 = vmatprep.subr.bf16.mxu1 %v3926_v47  ;;  %2868 = vmatprep.subr.bf16.mxu0 %v4645_v4 }
 0x2c9   : > { %1916 = vmatpush1.bf16.msra.mxu1 %v3930_v48  ;;  %2869 = vmatpush3.bf16.msra.mxu0 %v3975_v61  ;;  %v1777_v48 = vmul.f32 %v3160_v41, %v4162_v35  ;;  %v3205_v35 = vld [vmem:[#allocation6 + $0x1c] ss:$12 sps:$4 sm:$0xff]   ;;  %v4672_v41 = vld [vmem:[#allocation56_spill] sm:$0xff] }
 0x2ca   : > { %1917 = vmatprep.subr.bf16.mxu1 %v3936_v50  ;;  %2870 = vmatprep.subr.bf16.mxu0 %v4645_v4 }
 0x2cd   : > { %1918 = vmatpush1.bf16.msra.mxu1 %v3940_v51  ;;  %2871 = vmatpush3.bf16.msra.mxu0 %v3980_v62 }
 0x2ce   : > { %1919 = vmatprep.subr.bf16.mxu1 %v3946_v53  ;;  %2872 = vmatprep.subr.bf16.mxu0 %v4645_v4 }
 0x2d0   : > { %v3162_v45 = vpop.eup %3161 }
 0x2d1   : > { %1920 = vmatpush1.bf16.msra.mxu1 %v3952_v54  ;;  %2873 = vmatpush3.bf16.msra.mxu0 %v3987_v63  ;;  %v1776_v47 = vmul.f32 %v3162_v45, %v1775_v42  ;;  %v3203_v54 = vld [vmem:[#allocation6 + $0x4] ss:$12 sps:$4 sm:$0xff]  }
 0x2d2   : > { %1921 = vmatprep.subr.bf16.mxu1 %v3958_v56  ;;  %2874 = vmatprep.subr.bf16.mxu0 %v4645_v4  ;;  %v3204_v56 = vld [vmem:[#allocation6] ss:$12 sps:$4 sm:$0xff]  }
 0x2d3   : > { %v1778_v50 = vadd.f32 %v1777_v48, %v1776_v47 }
 0x2d5   : > { %1922 = vmatpush1.bf16.msra.mxu1 %v3962_v57  ;;  %2875 = vmatpush3.bf16.msra.mxu0 %v3993_v0  ;;  %v4256_v51 = vsel %vm1781_vm6, %v1778_v50, 0.0  ;;  %v2637_v53 = vpack.c.bf16 %v1778_v50, %v1778_v50  ;;  %v3206_v57 = vld [vmem:[#allocation6 + $0x18] ss:$12 sps:$4 sm:$0xff]  }
 0x2d6   : > { %2632 = vst [vmem:[%s3782_s24 + $0x10] sm:$0xff] %v4256_v51  ;;  %2022 = vmatprep.subr.bf16.mxu1 %v3203_v54  ;;  %2880 = vmatprep.subr.bf16.mxu0 %v4645_v4 }
 0x2d8   : > { %2638 = vmatmul.mubr.msk.bf16.vlgmr.msra.gmra.mrb[32].mxu1 %vm2636_vm7, %v2637_v53  ;;  %2877 = vmatmul.mubr.msk.bf16.vlgmr.msra.gmra.mrb[32].mxu0 %vm2636_vm7, %v2637_v53 }
 0x2d9   : > { %2023 = vmatpush1.bf16.msra.mxu1 %v3204_v56  ;;  %2881 = vmatpush3.bf16.msra.mxu0 %v3846_v23  ;;  %v3209_v23 = vld [vmem:[#allocation6 + $0x4c] ss:$12 sps:$4 sm:$0xff]  }
 0x2da   : > { %2024 = vmatprep.subr.bf16.mxu1 %v3205_v35  ;;  %2882 = vmatprep.subr.bf16.mxu0 %v4645_v4  ;;  %v1895_v35 = vstv %s1894_s29  ;;  %s3286_s29 = scalar_lea.vmem %s4345_s27, 512 }
 0x2db   : > { %2054 = vmatprep.mubr.bf16.mxu1 %v4646_v16  ;;  %2896 = vmatprep.mubr.msk.bf16.mxu0 %vm3497_vm1, %v4645_v4  ;;  %vm1896_vm8 = vcmp.lt.s32.totalorder %v1895_v35, %v4107_v34  ;;  %p3287_p3 = scmp.ne.s32.totalorder %s4345_s27, %s3286_s29 }
 0x2dd   : > { %2025 = vmatpush1.bf16.msra.mxu1 %v3206_v57  ;;  %2883 = vmatpush3.bf16.msra.mxu0 %v3856_v26  ;;  %v3212_v26 = vld [vmem:[#allocation6 + $0x60] ss:$12 sps:$4 sm:$0xff]   ;;  %p3288_p10 = pnand %p3287_p3, %p4683_p5 }
 0x2de   : > { %2026 = vmatprep.subr.bf16.mxu1 %v3207_v28  ;;  %2884 = vmatprep.subr.bf16.mxu0 %v4645_v4 }
 0x2df   : > { %p3289_p12 = pneg %p3288_p10 }
 0x2e1   : > { %2027 = vmatpush1.bf16.msra.mxu1 %v3208_v40  ;;  %2885 = vmatpush3.bf16.msra.mxu0 %v3868_v29  ;;  %v3214_v29 = vld [vmem:[#allocation6 + $0x78] ss:$12 sps:$4 sm:$0xff]  }
 0x2e2   : > { %2028 = vmatprep.subr.bf16.mxu1 %v3209_v23  ;;  %2886 = vmatprep.subr.bf16.mxu0 %v4645_v4 }
 0x2e5   : > { %2029 = vmatpush1.bf16.msra.mxu1 %v3210_v25  ;;  %2887 = vmatpush3.bf16.msra.mxu0 %v4648_v11 }
 0x2e6   : > { %2030 = vmatprep.subr.bf16.mxu1 %v3211_v8  ;;  %2888 = vmatprep.subr.bf16.mxu0 %v4645_v4 }
 0x2e9   : > { %2031 = vmatpush1.bf16.msra.mxu1 %v3212_v26  ;;  %2889 = vmatpush3.bf16.msra.mxu0 %v4651_v15 }
 0x2ea   : > { %2032 = vmatprep.subr.bf16.mxu1 %v3213_v32  ;;  %2890 = vmatprep.subr.bf16.mxu0 %v4645_v4 }
 0x2ed   : > { %2033 = vmatpush1.bf16.msra.mxu1 %v3214_v29  ;;  %2891 = vmatpush3.bf16.msra.mxu0 %v4654_v19  ;;  %v4668_v19 = vld [vmem:[#allocation58_spill] sm:$0xff] }
 0x2ee   : > { %2034 = vmatprep.subr.bf16.mxu1 %v4655_v17  ;;  %2892 = vmatprep.subr.bf16.mxu0 %v4645_v4 }
 0x2f1   : > { %2035 = vmatpush1.bf16.msra.mxu1 %v4656_v24  ;;  %2893 = vmatpush3.bf16.msra.mxu0 %v4657_v31 }
 0x2f2   : > { %2036 = vmatprep.subr.bf16.mxu1 %v4658_v9  ;;  %2894 = vmatprep.subr.bf16.mxu0 %v4645_v4 }
 0x2f5   : > { %2037 = vmatpush1.bf16.msra.mxu1 %v4659_v22  ;;  %2895 = vmatpush3.bf16.msra.mxu0 %v4660_v2 }
 0x2f6   : > { %2138 = vmatprep.subr.bf16.mxu1 %v4661_v33  ;;  %2900 = vmatprep.subr.bf16.mxu0 %v4645_v4 }
 0x38b   : > { %v1825_v11 = vpop.f32.mrb[28].mxu1  ;;  %v1866_v15 = vpop.f32.mrb[28].mxu0 }
 0x38c   : > { %v1872_v17 = vadd.f32 %v1825_v11, %v4668_v19  ;;  %v1827_v43 = vpop.f32.mrb[29].mxu1  ;;  %v2858_v24 = vpop.f32.mrb[29].mxu0  ;;  %v1886_v6 = vadd.f32 %v1866_v15, %v4097_v30  ;;  %v3215_v11 = vld [vmem:[#allocation9] ss:$12 sps:$4 sm:$0xff]   ;;  %v3216_v15 = vld [vmem:[#allocation9 + $0x1c] ss:$12 sps:$4 sm:$0xff]  }
 0x38d   : > { %v1879_v31 = vadd.f32 %v1827_v43, %v4669_v7  ;;  %v1829_v13 = vpop.f32.mrb[30].mxu1  ;;  %v1869_v9 = vpop.f32.mrb[30].mxu0  ;;  %v3218_v43 = vld [vmem:[#allocation9 + $0x34] ss:$12 sps:$4 sm:$0xff]   ;;  %v3219_v7 = vld [vmem:[#allocation9 + $0x30] ss:$12 sps:$4 sm:$0xff]  }
 0x38e   : > { %v2633_v14 = vmul.f32 -1.442695, %v1872_v17  ;;  %v1830_v58 = vpop.f32.mrb[31].mxu1  ;;  %v2859_v18 = vpop.f32.mrb[31].mxu0  ;;  %v4673_v13 = vld [vmem:[#allocation66_spill] sm:$0xff] }
 0x38f   : > { %v2634_v22 = vmul.f32 -1.442695, %v1879_v31  ;;  %v3220_v31 = vld [vmem:[#allocation9 + $0x4c] ss:$12 sps:$4 sm:$0xff]   ;;  %v3221_v9 = vld [vmem:[#allocation9 + $0x48] ss:$12 sps:$4 sm:$0xff]  }
 0x390   : > { %3163 = vpow2.f32 %v2633_v14  ;;  %v3222_v14 = vld [vmem:[#allocation9 + $0x64] ss:$12 sps:$4 sm:$0xff]   ;;  %v3223_v58 = vld [vmem:[#allocation9 + $0x60] ss:$12 sps:$4 sm:$0xff]  }
 0x391   : > { %3165 = vpow2.f32 %v2634_v22  ;;  %v3225_v22 = vld [vmem:[#allocation9 + $0x78] ss:$12 sps:$4 sm:$0xff]  }
 0x39a   : > { %v3164_v2 = vpop.eup %3163 }
 0x39b   : > { %v1876_v33 = vadd.f32 1.0, %v3164_v2  ;;  %v3166_v20 = vpop.eup %3165 }
 0x39c   : > { %v1883_v60 = vadd.f32 1.0, %v3166_v20 }
 0x39d   : > { %3167 = vrcp.f32 %v1876_v33  ;;  %v2011_v33 = vstv %s2010_s12  ;;  %s3498_s12 = smov [#allocation11]  }
 0x39e   : > { %3169 = vrcp.f32 %v1883_v60  ;;  %v3227_v60 = vld [vmem:[#allocation9 + $0x90] ss:$12 sps:$4 sm:$0xff]   ;;  %vm2012_vm9 = vcmp.lt.s32.totalorder %v2011_v33, %v4107_v34 }
 0x39f   : > { %vm2648_vm10 = vmpackc.low %vm2012_vm9, %vm2012_vm9 }
 0x3a7   : > { %v3168_v12 = vpop.eup %3167 }
 0x3a8   : > { %v1887_v21 = vmul.f32 %v3168_v12, %v1886_v6  ;;  %v3170_v53 = vpop.eup %3169  ;;  %v3228_v12 = vld [vmem:[#allocation9 + $0xac] ss:$12 sps:$4 sm:$0xff]  }
 0x3a9   : > { %v1890_v56 = vsub.f32 1.0, %v3170_v53  ;;  %v1892_v28 = vmul.f32 %v3170_v53, %v4213_v3 }
 0x3aa   : > { %v1888_v46 = vadd.f32 %v1887_v21, %v4670_v1  ;;  %v3229_v21 = vld [vmem:[#allocation9 + $0xa8] ss:$12 sps:$4 sm:$0xff]  }
 0x3ab   : > { %v1941_v37 = vpop.f32.mrb[32].mxu1  ;;  %v1982_v36 = vpop.f32.mrb[32].mxu0 }
 0x3ac   : > { %3171 = vtanh.f32 %v1888_v46  ;;  %v1988_v5 = vadd.f32 %v1941_v37, %v4671_v38  ;;  %v1943_v39 = vpop.f32.mrb[33].mxu1  ;;  %v2878_v10 = vpop.f32.mrb[33].mxu0  ;;  %v4674_v37 = vld [vmem:[#allocation62_spill] sm:$0xff] }
 0x3ad   : > { %v1995_v42 = vadd.f32 %v1943_v39, %v4672_v41  ;;  %v1945_v44 = vpop.f32.mrb[34].mxu1  ;;  %v1985_v45 = vpop.f32.mrb[34].mxu0 }
 0x3ae   : > { %v2642_v47 = vmul.f32 -1.442695, %v1988_v5  ;;  %v1946_v48 = vpop.f32.mrb[35].mxu1  ;;  %v2879_v50 = vpop.f32.mrb[35].mxu0  ;;  %v4675_v5 = vld [vmem:[#allocation63_spill] sm:$0xff] }
 0x3af   : > { %v2643_v54 = vmul.f32 -1.442695, %v1995_v42 }
 0x3b0   : > { %3173 = vpow2.f32 %v2642_v47 }
 0x3b1   : > { %3175 = vpow2.f32 %v2643_v54 }
 0x3b6   : > { %v3172_v57 = vpop.eup %3171 }
 0x3b7   : > { %v1891_v40 = vmul.f32 %v3172_v57, %v1890_v56  ;;  %v4676_v57 = vld [vmem:[#allocation50_spill] sm:$0xff] }
 0x3b9   : > { %v1893_v23 = vadd.f32 %v1892_v28, %v1891_v40 }
 0x3ba   : > { %v3174_v25 = vpop.eup %3173 }
 0x3bb   : > { %v1992_v8 = vadd.f32 1.0, %v3174_v25  ;;  %v1897_v26 = vsel %vm1896_vm8, %v1893_v23, 0.0  ;;  %v4295_v32 = vsel %vm1896_vm8, %v1893_v23, %v4213_v3  ;;  %v3176_v19 = vpop.eup %3175  ;;  %v3217_v3 = vld [vmem:[#allocation9 + $0x18] ss:$12 sps:$4 sm:$0xff]  }
 0x3bc   : > { %2635 = vst [vmem:[%s3780_s5 + $0x10] sm:$0xff] %v1897_v26  ;;  %v2021_v29 = vpack.c.bf16 %v4295_v32, %v4295_v32  ;;  %v1999_v17 = vadd.f32 1.0, %v3176_v19  ;;  %v4677_v25 = vld [vmem:[#allocation52_spill] sm:$0xff] }
 0x3bd   : > { %3177 = vrcp.f32 %v1992_v8 }
 0x3be   : > { %2055 = vmatmul.mubr.bf16.vlgmr.msra.gmra.mrb[36].mxu1 %v2021_v29  ;;  %2897 = vmatmul.mubr.bf16.vlgmr.msra.gmra.mrb[36].mxu0 %v2021_v29  ;;  %3179 = vrcp.f32 %v1999_v17 }
 0x3bf   : > { %2139 = vmatpush1.bf16.msra.mxu1 %v3215_v11  ;;  %2901 = vmatpush3.bf16.msra.mxu0 %v3933_v49  ;;  %v2002_v49 = vadd.f32 %v1982_v36, %v4125_v27  ;;  %v4678_v11 = vld [vmem:[#allocation53_spill] sm:$0xff] }
 0x3c0   : > { %2140 = vmatprep.subr.bf16.mxu1 %v3216_v15  ;;  %2902 = vmatprep.subr.bf16.mxu0 %v4645_v4 }
 0x3c1   : > { %2170 = vmatprep.mubr.bf16.mxu1 %v4646_v16  ;;  %2916 = vmatprep.mubr.msk.bf16.mxu0 %vm3497_vm1, %v4645_v4 }
 0x3c3   : > { %2141 = vmatpush1.bf16.msra.mxu1 %v3217_v3  ;;  %2903 = vmatpush3.bf16.msra.mxu0 %v3943_v52 }
 0x3c4   : > { %2142 = vmatprep.subr.bf16.mxu1 %v3218_v43  ;;  %2904 = vmatprep.subr.bf16.mxu0 %v4645_v4 }
 0x3c7   : > { %v3178_v24 = vpop.eup %3177  ;;  %2143 = vmatpush1.bf16.msra.mxu1 %v3219_v7  ;;  %2905 = vmatpush3.bf16.msra.mxu0 %v3955_v55  ;;  %v3224_v55 = vld [vmem:[#allocation9 + $0x7c] ss:$12 sps:$4 sm:$0xff]  }
 0x3c8   : > { %v2003_v16 = vmul.f32 %v3178_v24, %v2002_v49  ;;  %2144 = vmatprep.subr.bf16.mxu1 %v3220_v31  ;;  %2906 = vmatprep.subr.bf16.mxu0 %v4645_v4  ;;  %v3180_v18 = vpop.eup %3179 }
 0x3c9   : > { %v2006_v2 = vsub.f32 1.0, %v3180_v18  ;;  %v2008_v6 = vmul.f32 %v3180_v18, %v4256_v51 }
 0x3ca   : > { %v2004_v52 = vadd.f32 %v2003_v16, %v4673_v13  ;;  %v2126_v16 = vstv %s2125_s25  ;;  %s3290_s25 = sshll.u32 %s3498_s12, 4  ;;  %s3291_s25 = int_to_ptr.vmem [resolvable:$false] %s3290_s25 }
 0x3cb   : > { %2145 = vmatpush1.bf16.msra.mxu1 %v3221_v9  ;;  %2907 = vmatpush3.bf16.msra.mxu0 %v3967_v59  ;;  %v3226_v59 = vld [vmem:[#allocation9 + $0x94] ss:$12 sps:$4 sm:$0xff]   ;;  %vm2127_vm11 = vcmp.lt.s32.totalorder %v2126_v16, %v4107_v34  ;;  %s3292_s28 = scalar_lea.vmem %s3291_s25, 1024  ;;  %p3293_p0 = scmp.lt.s32.totalorder %s4345_s27, %s3291_s25 }
 0x3cc   : > { %3181 = vtanh.f32 %v2004_v52  ;;  %2146 = vmatprep.subr.bf16.mxu1 %v3222_v14  ;;  %2908 = vmatprep.subr.bf16.mxu0 %v4645_v4  ;;  %p3294_p6 = scmp.lt.s32.totalorder %s3292_s28, %s3286_s29 }
 0x3ce   : > { %p3295_p2 = por %p3294_p6, %p3293_p0 }
 0x3cf   : > { %2147 = vmatpush1.bf16.msra.mxu1 %v3223_v58  ;;  %2909 = vmatpush3.bf16.msra.mxu0 %v3975_v61 }
 0x3d0   : > { %2148 = vmatprep.subr.bf16.mxu1 %v3224_v55  ;;  %2910 = vmatprep.subr.bf16.mxu0 %v4645_v4  ;;  %p3296_p4 = pnand %p3295_p2, %p3289_p12 }
 0x3d3   : > { %2149 = vmatpush1.bf16.msra.mxu1 %v3225_v22  ;;  %2911 = vmatpush3.bf16.msra.mxu0 %v3980_v62 }
 0x3d4   : > { %2150 = vmatprep.subr.bf16.mxu1 %v3226_v59  ;;  %2912 = vmatprep.subr.bf16.mxu0 %v4645_v4 }
 0x3d6   : > { %v3182_v20 = vpop.eup %3181 }
 0x3d7   : > { %2151 = vmatpush1.bf16.msra.mxu1 %v3227_v60  ;;  %2913 = vmatpush3.bf16.msra.mxu0 %v3987_v63  ;;  %v2007_v61 = vmul.f32 %v3182_v20, %v2006_v2 }
 0x3d8   : > { %2152 = vmatprep.subr.bf16.mxu1 %v3228_v12  ;;  %2914 = vmatprep.subr.bf16.mxu0 %v4645_v4 }
 0x3d9   : > { %v2009_v62 = vadd.f32 %v2008_v6, %v2007_v61 }
 0x3db   : > { %2153 = vmatpush1.bf16.msra.mxu1 %v3229_v21  ;;  %2915 = vmatpush3.bf16.msra.mxu0 %v3993_v0  ;;  %v4323_v1 = vsel %vm2012_vm9, %v2009_v62, 0.0  ;;  %v2649_v46 = vpack.c.bf16 %v2009_v62, %v2009_v62 }
 0x3dc   : > { %2644 = vst [vmem:[%s3782_s24 + $0x8] sm:$0xff] %v4323_v1 }
 0x3de   : > { %2650 = vmatmul.mubr.msk.bf16.vlgmr.msra.gmra.mrb[40].mxu1 %vm2648_vm10, %v2649_v46  ;;  %2917 = vmatmul.mubr.msk.bf16.vlgmr.msra.gmra.mrb[40].mxu0 %vm2648_vm10, %v2649_v46 }
 0x491   : > { %v2056_v63 = vpop.f32.mrb[36].mxu1  ;;  %v2097_v51 = vpop.f32.mrb[36].mxu0 }
 0x492   : > { %v2103_v36 = vadd.f32 %v2056_v63, %v4674_v37  ;;  %v2058_v4 = vpop.f32.mrb[37].mxu1  ;;  %v2898_v38 = vpop.f32.mrb[37].mxu0  ;;  %v2117_v54 = vadd.f32 %v2097_v51, %v4097_v30 }
 0x493   : > { %v2110_v39 = vadd.f32 %v2058_v4, %v4675_v5  ;;  %v2060_v10 = vpop.f32.mrb[38].mxu1  ;;  %v2100_v41 = vpop.f32.mrb[38].mxu0 }
 0x494   : > { %v2645_v42 = vmul.f32 -1.442695, %v2103_v36  ;;  %v2061_v0 = vpop.f32.mrb[39].mxu1  ;;  %v2899_v44 = vpop.f32.mrb[39].mxu0 }
 0x495   : > { %v2646_v45 = vmul.f32 -1.442695, %v2110_v39 }
 0x496   : > { %3183 = vpow2.f32 %v2645_v42 }
 0x497   : > { %3185 = vpow2.f32 %v2646_v45 }
 0x4a0   : > { %v3184_v47 = vpop.eup %3183 }
 0x4a1   : > { %v2107_v48 = vadd.f32 1.0, %v3184_v47  ;;  %v3186_v50 = vpop.eup %3185 }
 0x4a2   : > { %v2114_v53 = vadd.f32 1.0, %v3186_v50 }
 0x4a3   : > { %3187 = vrcp.f32 %v2107_v48 }
 0x4a4   : > { %3189 = vrcp.f32 %v2114_v53 }
 0x4ad   : > { %v3188_v56 = vpop.eup %3187 }
 0x4ae   : > { %v2118_v35 = vmul.f32 %v3188_v56, %v2117_v54  ;;  %v3190_v49 = vpop.eup %3189 }
 0x4af   : > { %v2121_v7 = vsub.f32 1.0, %v3190_v49  ;;  %v2123_v52 = vmul.f32 %v3190_v49, %v4295_v32 }
 0x4b0   : > { %v2119_v28 = vadd.f32 %v2118_v35, %v4676_v57 }
 0x4b1   : > { %v2172_v40 = vpop.f32.mrb[40].mxu1  ;;  %v4331_v23 = vpop.f32.mrb[40].mxu0 }
 0x4b2   : > { %3191 = vtanh.f32 %v2119_v28  ;;  %v2219_v8 = vadd.f32 %v2172_v40, %v4677_v25  ;;  %v2174_v26 = vpop.f32.mrb[41].mxu1  ;;  %v2918_v29 = vpop.f32.mrb[41].mxu0 }
 0x4b3   : > { %v2226_v15 = vadd.f32 %v2174_v26, %v4678_v11  ;;  %v2176_v19 = vpop.f32.mrb[42].mxu1  ;;  %v2216_v30 = vpop.f32.mrb[42].mxu0 }
 0x4b4   : > { %v2654_v3 = vmul.f32 -1.442695, %v2219_v8  ;;  %v2177_v17 = vpop.f32.mrb[43].mxu1  ;;  %v2919_v43 = vpop.f32.mrb[43].mxu0 }
 0x4b5   : > { %v2655_v24 = vmul.f32 -1.442695, %v2226_v15 }
 0x4b6   : > { %3193 = vpow2.f32 %v2654_v3 }
 0x4b7   : > { %3195 = vpow2.f32 %v2655_v24 }
 0x4bc   : > { %v3192_v31 = vpop.eup %3191 }
 0x4bd   : > { %v2122_v13 = vmul.f32 %v3192_v31, %v2121_v7 }
 0x4bf   : > { %v2124_v9 = vadd.f32 %v2123_v52, %v2122_v13 }
 0x4c0   : > { %v3194_v14 = vpop.eup %3193 }
 0x4c1   : > { %v2128_v58 = vsel %vm2127_vm11, %v2124_v9, 0.0  ;;  %v2223_v55 = vadd.f32 1.0, %v3194_v14  ;;  %v2131_v18 = vsel %vm2127_vm11, %v2124_v9, %v4295_v32 }
 0x4c2   : > { %2647 = vst [vmem:[%s3780_s5 + $0x18] sm:$0xff] %v2128_v58  ;;  %2245 = vst [vmem:[#allocation2] sm:$0xff] %v2131_v18 }
 0x4c3   : > { %2247 = vst [vmem:[#allocation14] sm:$0xff] %v2131_v18  ;;  %3197 = vrcp.f32 %v2223_v55 }
 0x4c4   : > { %3299 = shalt.err (!%p3296_p4)
}
 0x4c5   : > { %s3300_s5 = scalar_lea.hbm %s4343_s20, 512  ;;  %s3304_s18 = scalar_lea.hbm %s4681_s13, 1024 }
 0x4c6   : > { %p3301_p9 = scmp.ne.s32.totalorder %s4343_s20, %s3300_s5  ;;  %p3305_p8 = scmp.lt.u32.totalorder %s4343_s20, %s4681_s13 }
 0x4c7   : > { %p3306_p13 = scmp.lt.u32.totalorder %s3304_s18, %s3300_s5  ;;  %p3308_p3 = scmp.lt.u32.totalorder %s3300_s5, %s4343_s20 }
 0x4c8   : > { %p3302_p7 = pnand %p3301_p9, %p4683_p5 }
 0x4c9   : > { %p3307_p1 = por %p3306_p13, %p3305_p8 }
 0x4ca   : > { %p3303_p11 = pneg %p3302_p7 }
 0x4cb   : > { %p3309_p10 = por %p3308_p3, %p3307_p1 }
 0x4cd   : > { %p3310_p12 = pnand %p3309_p10, %p3303_p11 }
 0x4cf   : > { %3313 = shalt.err (!%p3310_p12)
}
 0x4d0   : > { %s3499_s29 = smov 128   ;;  %s3500_s25 = smov 8   ;;  %v3196_v32 = vpop.eup %3195  ;;  %v2233_v59 = vadd.f32 %v4331_v23, %v4125_v27  ;;  %v4684_v20 = vld [vmem:[#allocation65_spill] sm:$0xff]  ;;  %v2241_v12 = vstv %s3767_s11 }
 0x4d1   : > { %2928 = dma.vmem_to_hbm [thread:$0]  (%p4683_p5), %s4345_s27, 512, %s4343_s20, %s4351_s21, %s3499_s29, %s3499_s29, %s3500_s25   ;;  %v2230_v22 = vadd.f32 1.0, %v3196_v32  ;;  %v3198_v2 = vpop.eup %3197  ;;  %vm2242_vm12 = vcmp.lt.s32.totalorder %v2241_v12, %v4107_v34 }
 0x4d2   : > { %v2234_v33 = vmul.f32 %v3198_v2, %v2233_v59  ;;  %s2254_s23 = sand.u32 1, %s3625_s22   ;;  %s4685_s27 = ssub.s32 1, %s3480_s19 }
 0x4d3   : > { %3199 = vrcp.f32 %v2230_v22  ;;  %s2669_s20 = sshll.u32 %s4685_s27, 9  ;;  %s2287_s21 = sshll.u32 %s3782_s24, 4  ;;  %s4393_s21 = int_to_ptr.vmem [resolvable:$true] %s2287_s21 }
 0x4d4   : > { %v2235_v60 = vadd.f32 %v2234_v33, %v4684_v20  ;;  %s3501_s28 = smov [#allocation14]   ;;  %s3502_s16 = smov [#allocation15]  }
 0x4d5   : > { %s2303_s5 = sshll.u32 %s3501_s28, 4  ;;  %s2316_s14 = sshll.u32 %s3502_s16, 4  ;;  %s4395_s5 = int_to_ptr.vmem [resolvable:$true] %s2303_s5  ;;  %s4398_s14 = int_to_ptr.vmem [resolvable:$true] %s2316_s14 }
 0x4d6   : > { %3201 = vtanh.f32 %v2235_v60  ;;  %s4686_s11 = sld [smem:[#allocation69_spill]]  ;;  %s4400_s19 = scalar_lea.sflag [#allocation13], %s2254_s23 }
 0x4d7   : > { %s3314_s27 = scalar_lea.vmem %s4393_s21, 512  ;;  %p4687_p0 = scmp.ne.s32.totalorder %s4600_s26, 0 }
 0x4d8   : > { %p3315_p5 = scmp.ne.s32.totalorder %s4393_s21, %s3314_s27 }
 0x4da   : > { %p3316_p6 = pnand %p3315_p5, %p4687_p0 }
 0x4dc   : > { %s4391_s12 = scalar_lea.hbm %s4686_s11, %s2669_s20  ;;  %p3317_p2 = pneg %p3316_p6 }
 0x4dd   : > { %v3200_v61 = vpop.eup %3199  ;;  %s3503_s20 = smov [#allocation12]  }
 0x4de   : > { %v2237_v6 = vsub.f32 1.0, %v3200_v61  ;;  %v2239_v46 = vmul.f32 %v3200_v61, %v4323_v1  ;;  %s3318_s28 = sshll.u32 %s3503_s20, 4  ;;  %s3319_s28 = int_to_ptr.vmem [resolvable:$false] %s3318_s28 }
 0x4df   : > { %s3320_s16 = scalar_lea.vmem %s3319_s28, 1024  ;;  %p3321_p4 = scmp.lt.s32.totalorder %s4393_s21, %s3319_s28 }
 0x4e0   : > { %v3202_v62 = vpop.eup %3201  ;;  %p3322_p9 = scmp.lt.s32.totalorder %s3320_s16, %s3314_s27 }
 0x4e1   : > { %v2238_v21 = vmul.f32 %v3202_v62, %v2237_v6 }
 0x4e2   : > { %p3323_p7 = por %p3322_p9, %p3321_p4 }
 0x4e3   : > { %v2240_v27 = vadd.f32 %v2239_v46, %v2238_v21 }
 0x4e4   : > { %p3324_p11 = pnand %p3323_p7, %p3317_p2 }
 0x4e5   : > { %v2243_v1 = vsel %vm2242_vm12, %v2240_v27, 0.0 }
 0x4e6   : > { %2246 = vst [vmem:[#allocation3] sm:$0xff] %v2243_v1  ;;  %2244 = vst [vmem:[%s3782_s24] sm:$0xff] %v2243_v1 }
 0x4e7   : > { %2248 = vst [vmem:[#allocation15] sm:$0xff] %v2243_v1 }
 0x4e8   : > { %3327 = shalt.err (!%p3324_p11)
}
 0x4e9   : > { %s3328_s24 = scalar_lea.hbm %s4391_s12, 512  ;;  %s3332_s15 = scalar_lea.hbm %s4686_s11, 1024 }
 0x4ea   : > { %p3329_p8 = scmp.ne.s32.totalorder %s4391_s12, %s3328_s24  ;;  %p3333_p3 = scmp.lt.u32.totalorder %s4391_s12, %s4686_s11 }
 0x4eb   : > { %p3334_p10 = scmp.lt.u32.totalorder %s3332_s15, %s3328_s24  ;;  %p3336_p5 = scmp.lt.u32.totalorder %s3328_s24, %s4391_s12 }
 0x4ec   : > { %p3330_p13 = pnand %p3329_p8, %p4687_p0 }
 0x4ed   : > { %p3335_p12 = por %p3334_p10, %p3333_p3 }
 0x4ee   : > { %p3331_p1 = pneg %p3330_p13 }
 0x4ef   : > { %p3337_p6 = por %p3336_p5, %p3335_p12 }
 0x4f1   : > { %p3338_p2 = pnand %p3337_p6, %p3331_p1 }
 0x4f3   : > { %3341 = shalt.err (!%p3338_p2)
}
 0x4f4   : > { %2929 = dma.vmem_to_hbm [thread:$0]  (%p4687_p0), %s4393_s21, 512, %s4391_s12, %s4400_s19, %s3499_s29, %s3499_s29, %s3500_s25  }
 0x4f5   : > { %s3342_s27 = scalar_lea.vmem %s4395_s5, 128  ;;  %p4688_p9 = scmp.eq.s32.totalorder %s3625_s22, 1 }
 0x4f6   : > { %p3343_p4 = scmp.ne.s32.totalorder %s4395_s5, %s3342_s27  ;;  %p3349_p8 = scmp.lt.s32.totalorder %s4395_s5, %s4395_s5 }
 0x4f7   : > { %p3350_p13 = scmp.lt.s32.totalorder %s3342_s27, %s3342_s27 }
 0x4f8   : > { %p3344_p7 = pnand %p3343_p4, %p4688_p9 }
 0x4f9   : > { %p3351_p1 = por %p3350_p13, %p3349_p8 }
 0x4fa   : > { %p3345_p11 = pneg %p3344_p7 }
 0x4fc   : > { %p3352_p3 = pnand %p3351_p1, %p3345_p11 }
 0x4fe   : > { %3355 = shalt.err (!%p3352_p3)
}
 0x4ff   : > { %s4689_s24 = sld [smem:[#allocation70_spill]]  ;;  %p4690_p10 = pmov %p4688_p9 }
 0x505   : > { %s3356_s23 = scalar_lea.hbm %s4689_s24, 128 }
 0x506   : > { %p3357_p0 = scmp.ne.s32.totalorder %s4689_s24, %s3356_s23  ;;  %p3362_p6 = scmp.lt.u32.totalorder %s3356_s23, %s4689_s24 }
 0x508   : > { %p3358_p12 = pnand %p3357_p0, %p4690_p10 }
 0x50a   : > { %p3359_p5 = pneg %p3358_p12 }
 0x50c   : > { %p3364_p2 = pnand %p3362_p6, %p3359_p5 }
 0x50e   : > { %3367 = shalt.err (!%p3364_p2)
}
 0x50f   : > { %p4691_p4 = pmov %p4688_p9  ;;  %s3368_s19 = scalar_lea.vmem %s4398_s14, 128 }
 0x510   : > { %p3369_p9 = scmp.ne.s32.totalorder %s4398_s14, %s3368_s19  ;;  %p3375_p13 = scmp.lt.s32.totalorder %s4398_s14, %s4398_s14 }
 0x511   : > { %2931 = dma.vmem_to_hbm [thread:$0]  (%p4691_p4), %s4395_s5, 128, %s4689_s24, [#allocation13]  }
 0x512   : > { %p4692_p7 = pmov %p4691_p4  ;;  %p3376_p1 = scmp.lt.s32.totalorder %s3368_s19, %s3368_s19 }
 0x514   : > { %p3370_p11 = pnand %p3369_p9, %p4692_p7  ;;  %p3377_p3 = por %p3376_p1, %p3375_p13 }
 0x516   : > { %p3371_p8 = pneg %p3370_p11 }
 0x518   : > { %p3378_p0 = pnand %p3377_p3, %p3371_p8 }
 0x51a   : > { %3381 = shalt.err (!%p3378_p0)
}
 0x51b   : > { %s4693_s27 = sld [smem:[#allocation71_spill]]  ;;  %p4694_p12 = pmov %p4691_p4 }
 0x521   : > { %s3382_s26 = scalar_lea.hbm %s4693_s27, 128 }
 0x522   : > { %p3383_p10 = scmp.ne.s32.totalorder %s4693_s27, %s3382_s26  ;;  %p3388_p2 = scmp.lt.u32.totalorder %s3382_s26, %s4693_s27 }
 0x524   : > { %p3384_p5 = pnand %p3383_p10, %p4694_p12 }
 0x526   : > { %p3385_p6 = pneg %p3384_p5 }
 0x528   : > { %p3390_p4 = pnand %p3388_p2, %p3385_p6 }
 0x52a   : > { %3393 = shalt.err (!%p3390_p4)
}
 0x52b   : > { %p4695_p9 = pmov %p4692_p7 }
 0x52d   : > { %2933 = dma.vmem_to_hbm [thread:$0]  (%p4695_p9), %s4398_s14, 128, %s4693_s27, [#allocation16]  }
 0x52e   : > { %3439 = dma.done.wait (%p4692_p7), [#allocation13], 128   ;;  %p4696_p11 = pmov %p4692_p7 }
 0x52f   : > { %p4697_p8 = pmov %p4692_p7 }
 0x530   : > { %3441 = vsyncadd (%p4696_p11), [#allocation13], 4294967168 }
 0x531   : > { %3443 = dma.done.wait (%p4697_p8), [#allocation16], 128   ;;  %p4698_p13 = pmov %p4692_p7 }
 0x533   : > { %3445 = vsyncadd (%p4698_p13), [#allocation16], 4294967168 }
 0x534 PF: > { %s4699_s25 = sld [smem:[#allocation27_spill]]  ;;  %s4700_s21 = sld [smem:[#allocation24_spill]] }
 0x535   : > { %s4701_s12 = sld [smem:[#allocation30_spill]] }
 0x53a   : > { %p2962_p1 = scmp.ge.s32.totalorder %s4699_s25, 2  ;;  %s2336_s19 = sand.u32 1, %s4700_s21  }
 0x53b   : > { %p4702_p3 = scmp.ne.s32.totalorder %s4701_s12, 0  ;;  %s2337_s14 = scalar_lea.sflag [#allocation8], %s2336_s19 }
 0x53d   : > { %p2948_p0 = pnand %p2962_p1, %p4702_p3 }
 0x53f   : > { %3447 = dma.done.wait (!%p2948_p0), %s2337_s14, 512  }
 0x540   : > { %3449 = vsyncadd (!%p2948_p0), %s2337_s14, 4294966784  ;;  %s4703_s20 = sadd.s32 4294967294, %s4699_s25   ;;  %s4704_s28 = sld [smem:[#allocation33_spill]] }
 0x541   : > { %s2345_s26 = sand.u32 1, %s4703_s20  }
 0x542   : > { %s2346_s16 = scalar_lea.sflag [#allocation13], %s2345_s26 }
 0x546   : > { %p4705_p10 = scmp.ne.s32.totalorder %s4704_s28, 0 }
 0x548   : > { %p2951_p12 = pnand %p2962_p1, %p4705_p10 }
 0x54a   : > { %3451 = dma.done.wait (!%p2951_p12), %s2346_s16, 512  }
 0x54b   : > { %3453 = vsyncadd (!%p2951_p12), %s2346_s16, 4294966784  ;;  %s34_s21 = sadd.s32 1, %s4699_s25   ;;  %s4706_s22 = sld [smem:[#allocation23_spill]] }
 0x54c   : > { %p31_p5 = scmp.ge.s32.totalorder %s34_s21, 4   ;;  %s4707_s15 = sld [smem:[#allocation32_spill]] }
 0x54d   : > { %s4708_s23 = sld [smem:[#allocation25_spill]]  ;;  %s4709_s18 = sld [smem:[#allocation31_spill]] }
 0x54e   : > { %s4710_s19 = sld [smem:[#allocation26_spill]]  ;;  %s4711_s20 = sld [smem:[#allocation28_spill]] }
 0x54f   : > { %s4712_s29 = smov %s3460_s30  ;;  %s4714_s16 = smov %s3472_s17 }
 0x550   :  { %33 = sbr.rel (!%p31_p5) target bundleno = 17 (0x11), region = 173 }
 0x551   : > { %s4713_s30 = smov %s4706_s22 }
 0x553   : > { %s4715_s17 = smov %s4708_s23 }
 0x557   :  { %2351 = vsyncpa [#allocation7], 1 }
 0x558   :  { %2353 = vsyncpa [#allocation7 + $0x1], 1 }
 0x559   :  { %2354 = vsyncpa [#allocation10], 1 }
 0x55a   :  { %2355 = vsyncpa [#allocation8], 1 }
 0x55b   :  { %2357 = vsyncpa [#allocation8 + $0x1], 1 }
 0x55c   :  { %2358 = vsyncpa [#allocation13], 1 }
 0x55d   :  { %2360 = vsyncpa [#allocation13 + $0x1], 1 }
 0x55e   :  { %2361 = vsyncpa [#allocation16], 1 }

</bundles_post_ra>
